<compile_context>
chip_gen: v5e
topology: v5e:2x2
jax: 0.10.0
libtpu: 0.0.40
codegen_flags: <defaults>
</compile_context>

<pallas_src>
import jax
import jax.numpy as jnp
from jax.experimental import pallas as pl
from jax.experimental.pallas import tpu as pltpu


# ------------------------------ toy config ------------------------------
BATCH = 2
SEQ = 8
HIDDEN = 48            # == 4 * COORD + 2 * SHAPE (spatial concat width == hidden)
COORD = 8              # coordinate_size
SHAPE = 8              # shape_size
VOCAB = 64             # vocab_size
TYPE_VOCAB = 2         # type_vocab_size
MAX_POS = 64           # max_position_embeddings
MAX_2D = 128           # max_2d_position_embeddings (bbox coords in [0, MAX_2D-1])
PAD_ID = 1             # pad_token_id / padding_idx
LN_EPS = 1e-5

N_TOKENS = BATCH * SEQ
NUM_GATHERS = 9        # word, token_type, position, left, upper, right, lower, h, w

# row offsets inside the fused embedding table
OFF_WORD = 0
OFF_TTYPE = OFF_WORD + VOCAB
OFF_POS = OFF_TTYPE + TYPE_VOCAB
OFF_SPATIAL = OFF_POS + MAX_POS          # 6 spatial blocks of MAX_2D rows each
T_TOTAL = OFF_SPATIAL + 6 * MAX_2D       # = 898
T_PAD = 1024                             # pad so the one-hot lane dim is 128-aligned

assert HIDDEN == 4 * COORD + 2 * SHAPE


# ------------------------------- Pallas kernel -------------------------------
def _embeddings_kernel(idx_ref, table_ref, ln_ref, out_ref):
    # idx_ref:   (N, NUM_GATHERS) int32, indices already offset + clipped into
    #            the fused table (wrapper pre-combines all index arithmetic).
    # table_ref: (T_PAD, HIDDEN) f32 fused embedding table.
    # ln_ref:    (2, HIDDEN) f32 — row 0 = gamma, row 1 = beta.
    # out_ref:   (N, HIDDEN) f32.
    n = idx_ref.shape[0]
    t_pad = table_ref.shape[0]

    ids = idx_ref[...]                                          # (N, 9)
    col = jax.lax.broadcasted_iota(jnp.int32, (n, t_pad), 1)    # lane ids

    # Multi-hot selector: the 9 sub-ranges of the fused table are disjoint, so
    # a serial boolean-OR chain is exact (== the multi-hot sum) and needs only
    # one convert to the matmul dtype at the end.
    hot = col == ids[:, 0:1]
    for j in range(1, NUM_GATHERS):                             # static unroll
        hot = hot | (col == ids[:, j:j + 1])
    hot_f = hot.astype(jnp.float32)

    # Fused gather + (word + token_type + position + spatial-concat) sum:
    # a single MXU matmul.  HIGHEST precision keeps the one-hot gather exact.
    emb = jnp.dot(hot_f, table_ref[...],
                  precision=jax.lax.Precision.HIGHEST,
                  preferred_element_type=jnp.float32)           # (N, H)

    # LayerNorm (biased variance, matching torch.nn.LayerNorm).
    mean = jnp.mean(emb, axis=-1, keepdims=True)
    centered = emb - mean
    var = jnp.mean(centered * centered, axis=-1, keepdims=True)
    normed = centered * jax.lax.rsqrt(var + LN_EPS)
    out = normed * ln_ref[0:1, :] + ln_ref[1:2, :]

    # TODO(synk): hidden_dropout is identity in eval mode; training-mode dropout
    # (pltpu.prng_seed / pltpu.prng_random_bits) is not implemented.
    out_ref[...] = out.astype(out_ref.dtype)


# ------------------------------ wrapper / glue ------------------------------
def build_fused_table(raw):
    """Pack every embedding table into one (T_PAD, HIDDEN) matrix.

    Parameter-only work, done ONCE outside the call path.  Spatial sub-tables
    are placed into the lane range they occupy after the concat, so summing
    contributions == concatenation.  The x/y tables are duplicated (left/right,
    upper/lower) at distinct row offsets, which keeps all 9 index ranges
    disjoint — the precondition for the boolean-OR selector in the kernel.
    """
    def lane_pad(tab, off):
        out = jnp.zeros((MAX_2D, HIDDEN), tab.dtype)
        return out.at[:, off:off + tab.shape[1]].set(tab)

    blocks = [
        raw["word"],                                 # rows [OFF_WORD, +VOCAB)
        raw["token_type"],                           # rows [OFF_TTYPE, +TYPE_VOCAB)
        raw["position"],                             # rows [OFF_POS, +MAX_POS)
        lane_pad(raw["x"], 0 * COORD),               # left  -> lanes [0, 8)
        lane_pad(raw["y"], 1 * COORD),               # upper -> lanes [8, 16)
        lane_pad(raw["x"], 2 * COORD),               # right -> lanes [16, 24)
        lane_pad(raw["y"], 3 * COORD),               # lower -> lanes [24, 32)
        lane_pad(raw["h"], 4 * COORD),               # h     -> lanes [32, 40)
        lane_pad(raw["w"], 4 * COORD + SHAPE),       # w     -> lanes [40, 48)
    ]
    table = jnp.concatenate(blocks, axis=0)          # (T_TOTAL, HIDDEN)
    return jnp.pad(table, ((0, T_PAD - T_TOTAL), (0, 0)))


def _gather_indices(input_ids, bbox, token_type_ids):
    """Integer glue: position-ids (fairseq-style), clipping, table offsets.

    Every id column is clipped into its sub-table's range so an out-of-range
    input can never shift into a neighboring sub-table or the zero-pad rows
    (the one-hot compare gather fails silently, it never faults).
    """
    mask = (input_ids != PAD_ID).astype(jnp.int32)
    position_ids = jnp.cumsum(mask, axis=1) * mask + PAD_ID

    word_ids = jnp.clip(input_ids, 0, VOCAB - 1)
    ttype_ids = jnp.clip(token_type_ids, 0, TYPE_VOCAB - 1)
    pos_ids = jnp.clip(position_ids, 0, MAX_POS - 1)
    bb = jnp.clip(bbox, 0, MAX_2D - 1)
    h_ids = jnp.clip(bbox[:, :, 3] - bbox[:, :, 1], 0, MAX_2D - 1)
    w_ids = jnp.clip(bbox[:, :, 2] - bbox[:, :, 0], 0, MAX_2D - 1)

    cols = [
        OFF_WORD + word_ids,
        OFF_TTYPE + ttype_ids,
        OFF_POS + pos_ids,
        OFF_SPATIAL + 0 * MAX_2D + bb[:, :, 0],      # left  (x table)
        OFF_SPATIAL + 1 * MAX_2D + bb[:, :, 1],      # upper (y table)
        OFF_SPATIAL + 2 * MAX_2D + bb[:, :, 2],      # right (x table)
        OFF_SPATIAL + 3 * MAX_2D + bb[:, :, 3],      # lower (y table)
        OFF_SPATIAL + 4 * MAX_2D + h_ids,            # height
        OFF_SPATIAL + 5 * MAX_2D + w_ids,            # width
    ]
    return jnp.stack([c.reshape(-1) for c in cols], axis=-1).astype(jnp.int32)


def layoutlmv3_embeddings(input_ids, bbox, params, token_type_ids=None):
    """input_ids: (B, S) int; bbox: (B, S, 4) int. Returns (B, S, HIDDEN) f32."""
    B, S = input_ids.shape
    if token_type_ids is None:
        token_type_ids = jnp.zeros_like(input_ids)

    idx = _gather_indices(input_ids, bbox, token_type_ids)            # (B*S, 9)
    ln = jnp.stack([params["ln_gamma"], params["ln_beta"]], axis=0)   # (2, H)

    # Whole problem fits VMEM in one shot: no grid, no pipeline scaffolding,
    # every operand is a plain full-array VMEM block (single-buffered).
    out = pl.pallas_call(
        _embeddings_kernel,
        out_shape=jax.ShapeDtypeStruct((B * S, HIDDEN), jnp.float32),
        in_specs=[
            pl.BlockSpec(memory_space=pltpu.MemorySpace.VMEM),   # gather indices
            pl.BlockSpec(memory_space=pltpu.MemorySpace.VMEM),   # fused table
            pl.BlockSpec(memory_space=pltpu.MemorySpace.VMEM),   # LN gamma/beta
        ],
        out_specs=pl.BlockSpec(memory_space=pltpu.MemorySpace.VMEM),
    )(idx, params["fused_table"], ln)
    return out.reshape(B, S, HIDDEN)


# ------------------------------ pure-JAX reference ----------------------------
def _reference(input_ids, bbox, token_type_ids, raw):
    mask = (input_ids != PAD_ID).astype(jnp.int32)
    position_ids = jnp.cumsum(mask, axis=1) * mask + PAD_ID

    words = raw["word"][input_ids]
    ttype = raw["token_type"][token_type_ids]
    pos = raw["position"][position_ids]

    left = raw["x"][bbox[:, :, 0]]
    upper = raw["y"][bbox[:, :, 1]]
    right = raw["x"][bbox[:, :, 2]]
    lower = raw["y"][bbox[:, :, 3]]
    h = raw["h"][jnp.clip(bbox[:, :, 3] - bbox[:, :, 1], 0, MAX_2D - 1)]
    w = raw["w"][jnp.clip(bbox[:, :, 2] - bbox[:, :, 0], 0, MAX_2D - 1)]
    spatial = jnp.concatenate([left, upper, right, lower, h, w], axis=-1)

    emb = words + ttype + pos + spatial
    mean = emb.mean(-1, keepdims=True)
    var = ((emb - mean) ** 2).mean(-1, keepdims=True)
    return (emb - mean) / jnp.sqrt(var + LN_EPS) * raw["ln_gamma"] + raw["ln_beta"]


# ------------------------------------ main ------------------------------------
if __name__ == "__main__":
    key = jax.random.PRNGKey(0)
    ks = jax.random.split(key, 12)

    scale = 0.5
    raw = {
        "word": scale * jax.random.normal(ks[0], (VOCAB, HIDDEN), jnp.float32),
        "token_type": scale * jax.random.normal(ks[1], (TYPE_VOCAB, HIDDEN), jnp.float32),
        "position": scale * jax.random.normal(ks[2], (MAX_POS, HIDDEN), jnp.float32),
        "x": scale * jax.random.normal(ks[3], (MAX_2D, COORD), jnp.float32),
        "y": scale * jax.random.normal(ks[4], (MAX_2D, COORD), jnp.float32),
        "h": scale * jax.random.normal(ks[5], (MAX_2D, SHAPE), jnp.float32),
        "w": scale * jax.random.normal(ks[6], (MAX_2D, SHAPE), jnp.float32),
        "ln_gamma": 1.0 + 0.1 * jax.random.normal(ks[7], (HIDDEN,), jnp.float32),
        "ln_beta": 0.1 * jax.random.normal(ks[8], (HIDDEN,), jnp.float32),
    }
    # nn.Embedding(padding_idx=...) keeps a zero row at the padding index
    raw["word"] = raw["word"].at[PAD_ID].set(0.0)
    raw["position"] = raw["position"].at[PAD_ID].set(0.0)

    # token ids in [2, VOCAB); batch element 1 ends with 2 padding tokens
    input_ids = jax.random.randint(ks[9], (BATCH, SEQ), 2, VOCAB)
    input_ids = input_ids.at[1, -2:].set(PAD_ID)
    token_type_ids = jnp.zeros((BATCH, SEQ), dtype=jnp.int32)

    # bboxes (x0, y0, x1, y1) with x0<=x1, y0<=y1, all coords in [0, MAX_2D)
    p0 = jax.random.randint(ks[10], (BATCH, SEQ, 2), 0, MAX_2D // 2)
    wh = jax.random.randint(ks[11], (BATCH, SEQ, 2), 0, MAX_2D // 2)
    bbox = jnp.concatenate([p0, p0 + wh], axis=-1)

    params = dict(raw)
    params["fused_table"] = build_fused_table(raw)   # one-time parameter packing

    out = layoutlmv3_embeddings(input_ids, bbox, params, token_type_ids)
    out = jax.block_until_ready(out)

    ref = _reference(input_ids, bbox, token_type_ids, raw)
    max_err = jnp.max(jnp.abs(out - ref))
    assert jnp.allclose(out, ref, atol=1e-5, rtol=1e-5), f"max abs err = {max_err}"

    print("KERNEL_OK")
</pallas_src>

<mosaic_0001>
module attributes {stable_mosaic.version = 11 : i64} {
  func.func @_embeddings_kernel(%arg0: memref<16x9xi32, #tpu.memory_space<vmem>>, %arg1: memref<1024x48xf32, #tpu.memory_space<vmem>>, %arg2: memref<2x48xf32, #tpu.memory_space<vmem>>, %arg3: memref<16x48xf32, #tpu.memory_space<vmem>>) attributes {dimension_semantics = [], scalar_prefetch = 0 : i64, scratch_operands = 0 : i64, tpu.core_type = #tpu.core_type<tc>} {
    %c0 = arith.constant 0 : index
    %c0_0 = arith.constant 0 : index
    %0 = vector.load %arg0[%c0, %c0_0] : memref<16x9xi32, #tpu.memory_space<vmem>>, vector<16x9xi32>
    %1 = tpu.iota {dimensions = array<i32: 1>} : vector<16x1024xi32>
    %2 = vector.extract_strided_slice %0 {offsets = [0, 0], sizes = [16, 1], strides = [1, 1]} : vector<16x9xi32> to vector<16x1xi32>
    %3 = vector.broadcast %2 : vector<16x1xi32> to vector<16x1024xi32>
    %4 = arith.cmpi eq, %1, %3 : vector<16x1024xi32>
    %5 = vector.extract_strided_slice %0 {offsets = [0, 1], sizes = [16, 1], strides = [1, 1]} : vector<16x9xi32> to vector<16x1xi32>
    %6 = vector.broadcast %5 : vector<16x1xi32> to vector<16x1024xi32>
    %7 = arith.cmpi eq, %1, %6 : vector<16x1024xi32>
    %8 = arith.ori %4, %7 : vector<16x1024xi1>
    %9 = vector.extract_strided_slice %0 {offsets = [0, 2], sizes = [16, 1], strides = [1, 1]} : vector<16x9xi32> to vector<16x1xi32>
    %10 = vector.broadcast %9 : vector<16x1xi32> to vector<16x1024xi32>
    %11 = arith.cmpi eq, %1, %10 : vector<16x1024xi32>
    %12 = arith.ori %8, %11 : vector<16x1024xi1>
    %13 = vector.extract_strided_slice %0 {offsets = [0, 3], sizes = [16, 1], strides = [1, 1]} : vector<16x9xi32> to vector<16x1xi32>
    %14 = vector.broadcast %13 : vector<16x1xi32> to vector<16x1024xi32>
    %15 = arith.cmpi eq, %1, %14 : vector<16x1024xi32>
    %16 = arith.ori %12, %15 : vector<16x1024xi1>
    %17 = vector.extract_strided_slice %0 {offsets = [0, 4], sizes = [16, 1], strides = [1, 1]} : vector<16x9xi32> to vector<16x1xi32>
    %18 = vector.broadcast %17 : vector<16x1xi32> to vector<16x1024xi32>
    %19 = arith.cmpi eq, %1, %18 : vector<16x1024xi32>
    %20 = arith.ori %16, %19 : vector<16x1024xi1>
    %21 = vector.extract_strided_slice %0 {offsets = [0, 5], sizes = [16, 1], strides = [1, 1]} : vector<16x9xi32> to vector<16x1xi32>
    %22 = vector.broadcast %21 : vector<16x1xi32> to vector<16x1024xi32>
    %23 = arith.cmpi eq, %1, %22 : vector<16x1024xi32>
    %24 = arith.ori %20, %23 : vector<16x1024xi1>
    %25 = vector.extract_strided_slice %0 {offsets = [0, 6], sizes = [16, 1], strides = [1, 1]} : vector<16x9xi32> to vector<16x1xi32>
    %26 = vector.broadcast %25 : vector<16x1xi32> to vector<16x1024xi32>
    %27 = arith.cmpi eq, %1, %26 : vector<16x1024xi32>
    %28 = arith.ori %24, %27 : vector<16x1024xi1>
    %29 = vector.extract_strided_slice %0 {offsets = [0, 7], sizes = [16, 1], strides = [1, 1]} : vector<16x9xi32> to vector<16x1xi32>
    %30 = vector.broadcast %29 : vector<16x1xi32> to vector<16x1024xi32>
    %31 = arith.cmpi eq, %1, %30 : vector<16x1024xi32>
    %32 = arith.ori %28, %31 : vector<16x1024xi1>
    %33 = vector.extract_strided_slice %0 {offsets = [0, 8], sizes = [16, 1], strides = [1, 1]} : vector<16x9xi32> to vector<16x1xi32>
    %34 = vector.broadcast %33 : vector<16x1xi32> to vector<16x1024xi32>
    %35 = arith.cmpi eq, %1, %34 : vector<16x1024xi32>
    %36 = arith.ori %32, %35 : vector<16x1024xi1>
    %37 = arith.extui %36 : vector<16x1024xi1> to vector<16x1024xi32>
    %38 = arith.sitofp %37 : vector<16x1024xi32> to vector<16x1024xf32>
    %c0_1 = arith.constant 0 : index
    %c0_2 = arith.constant 0 : index
    %39 = vector.load %arg1[%c0_1, %c0_2] : memref<1024x48xf32, #tpu.memory_space<vmem>>, vector<1024x48xf32>
    %cst = arith.constant dense<0.000000e+00> : vector<16x48xf32>
    %40 = tpu.matmul %38, %39, %cst {dimension_numbers = #tpu.dot_dimension_numbers<[1], [0], [0], [1], [0, 0, 1, 1], [], []>, precision = #tpu.contract_precision<fp32>} : vector<16x1024xf32>, vector<1024x48xf32>, vector<16x48xf32> -> vector<16x48xf32>
    %cst_3 = arith.constant dense<0.000000e+00> : vector<16xf32>
    %41 = vector.multi_reduction <add>, %40, %cst_3 [1] : vector<16x48xf32> to vector<16xf32>
    %42 = vector.shape_cast %41 : vector<16xf32> to vector<16x1xf32>
    %cst_4 = arith.constant 4.800000e+01 : f32
    %43 = vector.broadcast %cst_4 : f32 to vector<16x1xf32>
    %44 = arith.divf %42, %43 : vector<16x1xf32>
    %45 = vector.broadcast %44 : vector<16x1xf32> to vector<16x48xf32>
    %46 = arith.subf %40, %45 : vector<16x48xf32>
    %47 = arith.mulf %46, %46 : vector<16x48xf32>
    %cst_5 = arith.constant dense<0.000000e+00> : vector<16xf32>
    %48 = vector.multi_reduction <add>, %47, %cst_5 [1] : vector<16x48xf32> to vector<16xf32>
    %49 = vector.shape_cast %48 : vector<16xf32> to vector<16x1xf32>
    %cst_6 = arith.constant 4.800000e+01 : f32
    %50 = vector.broadcast %cst_6 : f32 to vector<16x1xf32>
    %51 = arith.divf %49, %50 : vector<16x1xf32>
    %cst_7 = arith.constant 9.99999974E-6 : f32
    %52 = vector.broadcast %cst_7 : f32 to vector<16x1xf32>
    %53 = arith.addf %51, %52 : vector<16x1xf32>
    %54 = math.rsqrt %53 : vector<16x1xf32>
    %55 = vector.broadcast %54 : vector<16x1xf32> to vector<16x48xf32>
    %56 = arith.mulf %46, %55 : vector<16x48xf32>
    %c0_8 = arith.constant 0 : index
    %c0_9 = arith.constant 0 : index
    %57 = vector.load %arg2[%c0_8, %c0_9] : memref<2x48xf32, #tpu.memory_space<vmem>>, vector<1x48xf32>
    %58 = vector.broadcast %57 : vector<1x48xf32> to vector<16x48xf32>
    %59 = arith.mulf %56, %58 : vector<16x48xf32>
    %c1 = arith.constant 1 : index
    %c0_10 = arith.constant 0 : index
    %60 = vector.load %arg2[%c1, %c0_10] : memref<2x48xf32, #tpu.memory_space<vmem>>, vector<1x48xf32>
    %61 = vector.broadcast %60 : vector<1x48xf32> to vector<16x48xf32>
    %62 = arith.addf %59, %61 : vector<16x48xf32>
    %c0_11 = arith.constant 0 : index
    %c0_12 = arith.constant 0 : index
    %63 = vector.load %arg3[%c0_11, %c0_12] : memref<16x48xf32, #tpu.memory_space<vmem>>, vector<16x48xf32>
    tpu.vector_store %arg3[%c0_11, %c0_12], %62 {strides = array<i32>} : memref<16x48xf32, #tpu.memory_space<vmem>>, vector<16x48xf32>,
    return
  }
}

</mosaic_0001>

<bundles_post_ra>
// kernel: tpu_custom_call.1
= control target key start
LH: loop header
LB: loop body
LE: loop exit
PB: predicated region body
PF: predicated region fallthrough
CT: control target
= control target key end

     0   :  { %v3651_v1 = vmov 2   ;;  %v3652_v2 = vmov 0   ;;  %s7283_s0 = inlined_call_operand.vmem [shape: s32[16,9], index: 0, kind: input, shape index: {}]   ;;  %s7284_s1 = inlined_call_operand.vmem [shape: f32[1024,48], index: 1, kind: input, shape index: {}]   ;;  %s7285_s2 = inlined_call_operand.vmem [shape: f32[2,48], index: 2, kind: input, shape index: {}]   ;;  %s7286_s3 = inlined_call_operand.hbm [shape: f32[16,48], index: 3, kind: output, shape index: {}]  }
   0x1   :  { %v15_v0 = vld [vmem:[%s7283_s0] sm:$0xff]  ;;  %3600 = vset.pattern.permute.xlu1 %v3651_v1  ;;  %3598 = vset.pattern.permute.xlu0 %v3652_v2 }
   0x2   :  { %87 = vperm.xlu1 %3600, %v15_v0   ;;  %27 = vperm.xlu0 %3598, %v15_v0  }
   0x3   :  { %8 = vsyncpa [#allocation3], 0  ;;  %v3653_v3 = vmov 4   ;;  %v3654_v4 = vmov 3   ;;  %v3655_v5 = vmov 1   ;;  %v3656_v6 = vmov 5  }
   0x4   :  { %3602 = vset.pattern.permute.xlu2 %v3653_v3  ;;  %v3657_v7 = vmov 6   ;;  %v3658_v8 = vmov 8   ;;  %v3659_v9 = vmov 7   ;;  %v3697_v10 = vld [vmem:[%s7283_s0 + $0x8] sm:$0xff]  ;;  %v399_v11 = vld [vmem:[%s7284_s1 + $0x78] sm:$0xff]  ;;  %v398_v12 = vld [vmem:[%s7284_s1 + $0x70] sm:$0xff] }
   0x5   :  { %163 = vperm.xlu2 %3602, %v15_v0   ;;  %v397_v13 = vld [vmem:[%s7284_s1 + $0x68] sm:$0xff]  ;;  %v3708_v14 = vand.u32 4294901760, %v399_v11  ;;  %v3710_v15 = vand.u32 4294901760, %v398_v12  ;;  %v396_v17 = vld [vmem:[%s7284_s1 + $0x60] sm:$0xff]  ;;  %v395_v18 = vld [vmem:[%s7284_s1 + $0x58] sm:$0xff]  ;;  %s3662_s22 = smov [#allocation2]  }
   0x6   :  { %v3712_v16 = vand.u32 4294901760, %v397_v13  ;;  %v394_v19 = vld [vmem:[%s7284_s1 + $0x50] sm:$0xff]  ;;  %v3723_v20 = vand.u32 4294901760, %v396_v17  ;;  %v3725_v21 = vand.u32 4294901760, %v395_v18  ;;  %v393_v23 = vld [vmem:[%s7284_s1 + $0x48] sm:$0xff]  ;;  %v392_v24 = vld [vmem:[%s7284_s1 + $0x40] sm:$0xff] }
   0x7   :  { %v3727_v22 = vand.u32 4294901760, %v394_v19  ;;  %v3738_v25 = vsub.f32 %v399_v11, %v3708_v14  ;;  %v3741_v26 = vsub.f32 %v398_v12, %v3710_v15  ;;  %v3746_v28 = vand.u32 4294901760, %v393_v23  ;;  %726 = vmatpush.msra.mxu3 %v3708_v14  ;;  %513 = vmatpush.msra.mxu0 %v3708_v14  ;;  %v391_v44 = vld [vmem:[%s7284_s1 + $0x38] sm:$0xff]  ;;  %v390_v45 = vld [vmem:[%s7284_s1 + $0x30] sm:$0xff]  ;;  %v389_v46 = vld [vmem:[%s7284_s1 + $0x28] sm:$0xff]  ;;  %s3554_s23 = sshll.u32 %s3662_s22, 4  ;;  %s3555_s23 = int_to_ptr.vmem [resolvable:$true] %s3554_s23 }
   0x8   :  { %v3744_v27 = vsub.f32 %v397_v13, %v3712_v16  ;;  %v3750_v29 = vsub.f32 %v396_v17, %v3723_v20  ;;  %v3753_v30 = vsub.f32 %v395_v18, %v3725_v21  ;;  %v3758_v32 = vand.u32 4294901760, %v392_v24  ;;  %v388_v52 = vld [vmem:[%s7284_s1 + $0x20] sm:$0xff]  ;;  %v387_v59 = vld [vmem:[%s7284_s1 + $0x18] sm:$0xff]  ;;  %s3556_s26 = sshll.u32 %s7286_s3, 4  ;;  %s3664_s27 = smov 8   ;;  %s3557_s26 = int_to_ptr.hbm [resolvable:$true] %s3556_s26 }
   0x9   :  { %v3756_v31 = vsub.f32 %v394_v19, %v3727_v22  ;;  %v563_v33 = vand.u32 4294901760, %v3738_v25  ;;  %v569_v34 = vand.u32 4294901760, %v3741_v26  ;;  %668 = vmatpush.msra.mxu2 %v3738_v25  ;;  %728 = vmatpush.msra.mxu3 %v3710_v15  ;;  %v3770_v38 = vsub.f32 %v393_v23, %v3746_v28 }
   0xa   :  { %3601 = vset.pattern.permute.xlu1 %v3654_v4  ;;  %3599 = vset.pattern.permute.xlu0 %v3655_v5  ;;  %v575_v35 = vand.u32 4294901760, %v3744_v27  ;;  %v581_v36 = vand.u32 4294901760, %v3750_v29  ;;  %v587_v37 = vand.u32 4294901760, %v3753_v30  ;;  %v3786_v43 = vsub.f32 %v392_v24, %v3758_v32 }
   0xb   :  { %125 = vperm.xlu1 %3601, %v15_v0   ;;  %49 = vperm.xlu0 %3599, %v15_v0   ;;  %v564_v39 = vsub.f32 %v3738_v25, %v563_v33  ;;  %v570_v40 = vsub.f32 %v3741_v26, %v569_v34  ;;  %v593_v42 = vand.u32 4294901760, %v3756_v31  ;;  %v599_v51 = vand.u32 4294901760, %v3770_v38 }
   0xc   :  { %v576_v41 = vsub.f32 %v3744_v27, %v575_v35  ;;  %671 = vmatpush.msra.mxu2 %v3741_v26  ;;  %730 = vmatpush.msra.mxu3 %v3712_v16  ;;  %v582_v49 = vsub.f32 %v3750_v29, %v581_v36  ;;  %v588_v50 = vsub.f32 %v3753_v30, %v587_v37  ;;  %v3811_v54 = vand.u32 4294901760, %v391_v44 }
   0xd   :  { %3603 = vset.pattern.permute.xlu2 %v3656_v6  ;;  %515 = vmatpush.msra.mxu0 %v3710_v15  ;;  %v565_v47 = vand.u32 4294901760, %v564_v39  ;;  %v571_v48 = vand.u32 4294901760, %v570_v40  ;;  %v3813_v55 = vand.u32 4294901760, %v390_v45  ;;  %v3815_v56 = vand.u32 4294901760, %v389_v46 }
   0xe   :  { %201 = vperm.xlu2 %3603, %v15_v0   ;;  %674 = vmatpush.msra.mxu2 %v3744_v27  ;;  %v577_v53 = vand.u32 4294901760, %v576_v41  ;;  %v594_v57 = vsub.f32 %v3756_v31, %v593_v42  ;;  %v605_v58 = vand.u32 4294901760, %v3786_v43  ;;  %v583_v60 = vand.u32 4294901760, %v582_v49 }
   0xf   :  { %732 = vmatpush.msra.mxu3 %v3723_v20  ;;  %517 = vmatpush.msra.mxu0 %v3712_v16  ;;  %v3828_v61 = vsub.f32 %v391_v44, %v3811_v54  ;;  %v3831_v62 = vsub.f32 %v390_v45, %v3813_v55  ;;  %v3833_v63 = vand.u32 4294901760, %v388_v52 }
  0x10   :  { %566 = vmatpush.msra.mxu1 %v565_v47  ;;  %677 = vmatpush.msra.mxu2 %v3750_v29  ;;  %v595_v11 = vand.u32 4294901760, %v594_v57  ;;  %v606_v12 = vsub.f32 %v3786_v43, %v605_v58 }
  0x11   :  { %734 = vmatpush.msra.mxu3 %v3725_v21  ;;  %519 = vmatpush.msra.mxu0 %v3723_v20  ;;  %v617_v13 = vand.u32 4294901760, %v3831_v62  ;;  %v3858_v17 = vsub.f32 %v388_v52, %v3833_v63 }
  0x12   :  { %572 = vmatpush.msra.mxu1 %v571_v48  ;;  %680 = vmatpush.msra.mxu2 %v3753_v30  ;;  %v607_v40 = vand.u32 4294901760, %v606_v12 }
  0x13   :  { %3604 = vset.pattern.permute.xlu1 %v3657_v7  ;;  %3606 = vset.pattern.permute.xlu0 %v3658_v8  ;;  %v618_v41 = vsub.f32 %v3831_v62, %v617_v13  ;;  %v629_v44 = vand.u32 4294901760, %v3858_v17 }
  0x14   :  { %239 = vperm.xlu1 %3604, %v15_v0   ;;  %315 = vperm.xlu0 %3606, %v15_v0  }
  0x15   :  { %578 = vmatpush.msra.mxu1 %v577_v53  ;;  %683 = vmatpush.msra.mxu2 %v3756_v31  ;;  %v619_v48 = vand.u32 4294901760, %v618_v41 }
  0x16   :  { %3605 = vset.pattern.permute.xlu2 %v3659_v9  ;;  %736 = vmatpush.msra.mxu3 %v3727_v22 }
  0x17   :  { %277 = vperm.xlu2 %3605, %v15_v0   ;;  %v600_v0 = vsub.f32 %v3770_v38, %v599_v51  ;;  %584 = vmatpush.msra.mxu1 %v583_v60 }
  0x18   :  { %686 = vmatpush.msra.mxu2 %v3770_v38  ;;  %521 = vmatpush.msra.mxu0 %v3725_v21 }
  0x19   :  { %v601_v19 = vand.u32 4294901760, %v600_v0  ;;  %738 = vmatpush.msra.mxu3 %v3746_v28  ;;  %v384_v0 = vld [vmem:[%s7284_s1] sm:$0xff] }
  0x1a   :  { %689 = vmatpush.msra.mxu2 %v3786_v43  ;;  %523 = vmatpush.msra.mxu0 %v3727_v22 }
  0x1b   :  { %740 = vmatpush.msra.mxu3 %v3758_v32 }
  0x1c   :  { %3607 = vset.pattern.permute.xlu1 %v3652_v2  ;;  %3611 = vset.pattern.permute.xlu0 %v3653_v3  ;;  %v589_v2 = vand.u32 4294901760, %v588_v50  ;;  %v611_v3 = vand.u32 4294901760, %v3828_v61 }
  0x1d   :  { %30 = vperm.xlu1 %3607, %v3697_v10   ;;  %166 = vperm.xlu0 %3611, %v3697_v10  }
  0x1e   :  { %590 = vmatpush.msra.mxu1 %v589_v2  ;;  %v612_v23 = vsub.f32 %v3828_v61, %v611_v3  ;;  %692 = vmatpush.msra.mxu2 %v3828_v61  ;;  %v409_v61 = vld [vmem:[%s7284_s1 + $0xc8] sm:$0xff] }
  0x1f   :  { %3608 = vset.pattern.permute.xlu2 %v3655_v5  ;;  %v3848_v5 = vand.u32 4294901760, %v387_v59  ;;  %525 = vmatpush.msra.mxu0 %v3746_v28 }
  0x20   :  { %52 = vperm.xlu2 %3608, %v3697_v10   ;;  %596 = vmatpush.msra.mxu1 %v595_v11 }
  0x21   :  { %v3870_v39 = vsub.f32 %v387_v59, %v3848_v5  ;;  %695 = vmatpush.msra.mxu2 %v3831_v62  ;;  %742 = vmatpush.msra.mxu3 %v3811_v54  ;;  %v408_v62 = vld [vmem:[%s7284_s1 + $0xc0] sm:$0xff] }
  0x22   :  { %602 = vmatpush.msra.mxu1 %v601_v19  ;;  %527 = vmatpush.msra.mxu0 %v3758_v32 }
  0x23   :  { %v635_v47 = vand.u32 4294901760, %v3870_v39  ;;  %744 = vmatpush.msra.mxu3 %v3813_v55 }
  0x24   :  { %608 = vmatpush.msra.mxu1 %v607_v40  ;;  %529 = vmatpush.msra.mxu0 %v3811_v54 }
  0x25   :  { %3609 = vset.pattern.permute.xlu1 %v3651_v1  ;;  %v386_v1 = vld [vmem:[%s7284_s1 + $0x10] sm:$0xff]  ;;  %v636_v52 = vsub.f32 %v3870_v39, %v635_v47  ;;  %746 = vmatpush.msra.mxu3 %v3815_v56 }
  0x26   :  { %90 = vperm.xlu1 %3609, %v3697_v10   ;;  %v3860_v18 = vand.u32 4294901760, %v386_v1  ;;  %531 = vmatpush.msra.mxu0 %v3813_v55 }
  0x27   :  { %v637_v59 = vand.u32 4294901760, %v636_v52  ;;  %748 = vmatpush.msra.mxu3 %v3833_v63  ;;  %3616 = vset.pattern.permute.xlu0 %v3658_v8 }
  0x28   :  { %3610 = vset.pattern.permute.xlu2 %v3654_v4  ;;  %v3846_v4 = vsub.f32 %v389_v46, %v3815_v56  ;;  %v3880_v45 = vsub.f32 %v386_v1, %v3860_v18  ;;  %533 = vmatpush.msra.mxu0 %v3815_v56 }
  0x29   :  { %128 = vperm.xlu2 %3610, %v3697_v10   ;;  %750 = vmatpush.msra.mxu3 %v3848_v5 }
  0x2a   :  { %v623_v24 = vand.u32 4294901760, %v3846_v4  ;;  %v641_v49 = vand.u32 4294901760, %v3880_v45  ;;  %698 = vmatpush.msra.mxu2 %v3846_v4  ;;  %535 = vmatpush.msra.mxu0 %v3833_v63 }
  0x2b   :  { %752 = vmatpush.msra.mxu3 %v3860_v18 }
  0x2c   :  { %v624_v46 = vsub.f32 %v3846_v4, %v623_v24  ;;  %v642_v57 = vsub.f32 %v3880_v45, %v641_v49  ;;  %701 = vmatpush.msra.mxu2 %v3858_v17  ;;  %537 = vmatpush.msra.mxu0 %v3848_v5 }
  0x2e   :  { %3612 = vset.pattern.permute.xlu1 %v3656_v6  ;;  %v613_v6 = vand.u32 4294901760, %v612_v23  ;;  %v625_v50 = vand.u32 4294901760, %v624_v46  ;;  %704 = vmatpush.msra.mxu2 %v3870_v39  ;;  %v415_v23 = vld [vmem:[%s7284_s1 + $0xf8] sm:$0xff]  ;;  %v414_v46 = vld [vmem:[%s7284_s1 + $0xf0] sm:$0xff] }
  0x2f   :  { %204 = vperm.xlu1 %3612, %v3697_v10   ;;  %539 = vmatpush.msra.mxu0 %v3860_v18  ;;  %v3957_v40 = vand.u32 4294901760, %v415_v23 }
  0x30   :  { %614 = vmatpush.msra.mxu1 %v613_v6  ;;  %707 = vmatpush.msra.mxu2 %v3880_v45 }
  0x31   :  { %3613 = vset.pattern.permute.xlu2 %v3657_v7  ;;  %v630_v7 = vsub.f32 %v3858_v17, %v629_v44  ;;  %v3971_v25 = vsub.f32 %v415_v23, %v3957_v40  ;;  %v406_v17 = vld [vmem:[%s7284_s1 + $0xb0] sm:$0xff] }
  0x32   :  { %242 = vperm.xlu2 %3613, %v3697_v10   ;;  %620 = vmatpush.msra.mxu1 %v619_v48  ;;  %v3968_v48 = vand.u32 4294901760, %v414_v46 }
  0x33   :  { %v631_v53 = vand.u32 4294901760, %v630_v7  ;;  %v935_v7 = vand.u32 4294901760, %v3971_v25 }
  0x34   :  { %626 = vmatpush.msra.mxu1 %v625_v50  ;;  %v3995_v29 = vsub.f32 %v414_v46, %v3968_v48 }
  0x35   :  { %v936_v26 = vsub.f32 %v3971_v25, %v935_v7 }
  0x36   :  { %632 = vmatpush.msra.mxu1 %v631_v53  ;;  %v941_v30 = vand.u32 4294901760, %v3995_v29 }
  0x37   :  { %3614 = vset.pattern.permute.xlu1 %v3659_v9  ;;  %v643_v9 = vand.u32 4294901760, %v642_v57  ;;  %v937_v27 = vand.u32 4294901760, %v936_v26 }
  0x38   :  { %280 = vperm.xlu1 %3614, %v3697_v10   ;;  %638 = vmatpush.msra.mxu1 %v637_v59  ;;  %v4068_v59 = vand.u32 4294901760, %v408_v62 }
  0x3a   :  { %3615 = vset.pattern.permute.xlu2 %v3658_v8  ;;  %644 = vmatpush.msra.mxu1 %v643_v9  ;;  %v3936_v8 = vand.u32 4294901760, %v384_v0  ;;  %v4088_v23 = vsub.f32 %v408_v62, %v4068_v59 }
  0x3b   :  { %318 = vperm.xlu2 %3615, %v3697_v10   ;;  %v385_v10 = vld [vmem:[%s7284_s1 + $0x8] sm:$0xff] }
  0x3c   :  { %v3928_v60 = vand.u32 4294901760, %v385_v10  ;;  %v3942_v11 = vsub.f32 %v384_v0, %v3936_v8 }
  0x3e   :  { %v3934_v1 = vsub.f32 %v385_v10, %v3928_v60  ;;  %754 = vmatpush.msra.mxu3 %v3928_v60  ;;  %541 = vmatpush.msra.mxu0 %v3928_v60  ;;  %v653_v19 = vand.u32 4294901760, %v3942_v11  ;;  %v407_v10 = vld [vmem:[%s7284_s1 + $0xb8] sm:$0xff] }
  0x40   :  { %v647_v2 = vand.u32 4294901760, %v3934_v1  ;;  %710 = vmatpush.msra.mxu2 %v3934_v1  ;;  %756 = vmatpush.msra.mxu3 %v3936_v8  ;;  %v654_v6 = vsub.f32 %v3942_v11, %v653_v19 }
  0x41   :  { %543 = vmatpush.msra.mxu0 %v3936_v8 }
  0x42   :  { %v648_v12 = vsub.f32 %v3934_v1, %v647_v2  ;;  %713 = vmatpush.msra.mxu2 %v3942_v11  ;;  %938 = vmatpush.msrb.mxu3 %v937_v27  ;;  %v404_v27 = vld [vmem:[%s7284_s1 + $0xa0] sm:$0xff]  ;;  %v403_v1 = vld [vmem:[%s7284_s1 + $0x98] sm:$0xff]  ;;  %v402_v11 = vld [vmem:[%s7284_s1 + $0x90] sm:$0xff] }
  0x43   :  { %773 = vmatpush.msrb.mxu0 %v563_v33  ;;  %v655_v33 = vand.u32 4294901760, %v654_v6 }
  0x44   :  { %v649_v41 = vand.u32 4294901760, %v648_v12  ;;  %885 = vmatpush.msrb.mxu2 %v3957_v40  ;;  %v4082_v12 = vand.u32 4294901760, %v407_v10 }
  0x45   :  { %777 = vmatpush.msrb.mxu0 %v569_v34  ;;  %v413_v34 = vld [vmem:[%s7284_s1 + $0xe8] sm:$0xff] }
  0x46   :  { %650 = vmatpush.msra.mxu1 %v649_v41  ;;  %887 = vmatpush.msrb.mxu2 %v3968_v48 }
  0x47   :  { %781 = vmatpush.msrb.mxu0 %v575_v35  ;;  %v411_v35 = vld [vmem:[%s7284_s1 + $0xd8] sm:$0xff] }
  0x48   :  { %656 = vmatpush.msra.mxu1 %v655_v33  ;;  %v4104_v33 = vand.u32 4294901760, %v406_v17 }
  0x49   :  { %785 = vmatpush.msrb.mxu0 %v581_v36  ;;  %v4019_v36 = vand.u32 4294901760, %v411_v35 }
  0x4a   :  { %844 = vmatpush.msrb.mxu1 %v3708_v14  ;;  %v3992_v14 = vand.u32 4294901760, %v413_v34  ;;  %v4123_v45 = vsub.f32 %v406_v17, %v4104_v33 }
  0x4b   :  { %789 = vmatpush.msrb.mxu0 %v587_v37 }
  0x4c   :  { %846 = vmatpush.msrb.mxu1 %v3710_v15  ;;  %v412_v15 = vld [vmem:[%s7284_s1 + $0xe0] sm:$0xff]  ;;  %889 = vmatpush.msrb.mxu2 %v3992_v14  ;;  %v4008_v31 = vsub.f32 %v413_v34, %v3992_v14 }
  0x4d   :  { %793 = vmatpush.msrb.mxu0 %v593_v42  ;;  %v410_v42 = vld [vmem:[%s7284_s1 + $0xd0] sm:$0xff] }
  0x4e   :  { %848 = vmatpush.msrb.mxu1 %v3712_v16  ;;  %v4005_v16 = vand.u32 4294901760, %v412_v15  ;;  %v947_v37 = vand.u32 4294901760, %v4008_v31 }
  0x4f   :  { %797 = vmatpush.msrb.mxu0 %v599_v51  ;;  %v4035_v51 = vsub.f32 %v411_v35, %v4019_v36 }
  0x50   :  { %850 = vmatpush.msrb.mxu1 %v3723_v20  ;;  %v942_v20 = vsub.f32 %v3995_v29, %v941_v30  ;;  %891 = vmatpush.msrb.mxu2 %v4005_v16  ;;  %v4024_v38 = vsub.f32 %v412_v15, %v4005_v16  ;;  %v4136_v15 = vand.u32 4294901760, %v404_v27 }
  0x51   :  { %801 = vmatpush.msrb.mxu0 %v605_v58  ;;  %v948_v58 = vsub.f32 %v4008_v31, %v947_v37 }
  0x52   :  { %852 = vmatpush.msrb.mxu1 %v3725_v21  ;;  %v943_v43 = vand.u32 4294901760, %v942_v20  ;;  %v4032_v21 = vand.u32 4294901760, %v410_v42  ;;  %893 = vmatpush.msrb.mxu2 %v4019_v36  ;;  %v953_v50 = vand.u32 4294901760, %v4024_v38 }
  0x53   :  { %805 = vmatpush.msrb.mxu0 %v611_v3  ;;  %v4049_v3 = vand.u32 4294901760, %v409_v61  ;;  %v949_v53 = vand.u32 4294901760, %v948_v58  ;;  %v4157_v58 = vsub.f32 %v404_v27, %v4136_v15 }
  0x54   :  { %854 = vmatpush.msrb.mxu1 %v3727_v22  ;;  %944 = vmatpush.msrb.mxu3 %v943_v43  ;;  %v959_v22 = vand.u32 4294901760, %v4035_v51  ;;  %v4052_v52 = vsub.f32 %v410_v42, %v4032_v21  ;;  %v954_v57 = vsub.f32 %v4024_v38, %v953_v50  ;;  %v4154_v43 = vand.u32 4294901760, %v403_v1 }
  0x55   :  { %809 = vmatpush.msrb.mxu0 %v617_v13  ;;  %895 = vmatpush.msrb.mxu2 %v4032_v21  ;;  %v4071_v9 = vsub.f32 %v409_v61, %v4049_v3  ;;  %v1001_v62 = vand.u32 4294901760, %v4157_v58 }
  0x56   :  { %856 = vmatpush.msrb.mxu1 %v3746_v28  ;;  %v960_v28 = vsub.f32 %v4035_v51, %v959_v22  ;;  %v965_v13 = vand.u32 4294901760, %v4052_v52  ;;  %950 = vmatpush.msrb.mxu3 %v949_v53  ;;  %v955_v4 = vand.u32 4294901760, %v954_v57 }
  0x57   :  { %813 = vmatpush.msrb.mxu0 %v623_v24  ;;  %897 = vmatpush.msrb.mxu2 %v4049_v3  ;;  %v971_v0 = vand.u32 4294901760, %v4071_v9 }
  0x58   :  { %858 = vmatpush.msrb.mxu1 %v3758_v32  ;;  %v961_v24 = vand.u32 4294901760, %v960_v28  ;;  %v966_v32 = vsub.f32 %v4052_v52, %v965_v13  ;;  %956 = vmatpush.msrb.mxu3 %v955_v4  ;;  %v4175_v28 = vand.u32 4294901760, %v402_v11 }
  0x59   :  { %817 = vmatpush.msrb.mxu0 %v629_v44  ;;  %899 = vmatpush.msrb.mxu2 %v4068_v59  ;;  %v972_v6 = vsub.f32 %v4071_v9, %v971_v0 }
  0x5a   :  { %860 = vmatpush.msrb.mxu1 %v3811_v54  ;;  %v967_v41 = vand.u32 4294901760, %v966_v32  ;;  %962 = vmatpush.msrb.mxu3 %v961_v24  ;;  %v977_v54 = vand.u32 4294901760, %v4088_v23  ;;  %v400_v24 = vld [vmem:[%s7284_s1 + $0x80] sm:$0xff]  ;;  %v4194_v17 = vsub.f32 %v402_v11, %v4175_v28 }
  0x5b   :  { %821 = vmatpush.msrb.mxu0 %v635_v47  ;;  %901 = vmatpush.msrb.mxu2 %v4082_v12  ;;  %v973_v46 = vand.u32 4294901760, %v972_v6  ;;  %v405_v47 = vld [vmem:[%s7284_s1 + $0xa8] sm:$0xff] }
  0x5c   :  { %862 = vmatpush.msrb.mxu1 %v3813_v55  ;;  %v4107_v55 = vsub.f32 %v407_v10, %v4082_v12  ;;  %968 = vmatpush.msrb.mxu3 %v967_v41  ;;  %v978_v39 = vsub.f32 %v4088_v23, %v977_v54  ;;  %v4120_v26 = vand.u32 4294901760, %v405_v47  ;;  %v4178_v10 = vsub.f32 %v403_v1, %v4154_v43 }
  0x5d   :  { %825 = vmatpush.msrb.mxu0 %v641_v49  ;;  %903 = vmatpush.msrb.mxu2 %v4104_v33  ;;  %v4186_v41 = vand.u32 4294901760, %v400_v24 }
  0x5e   :  { %864 = vmatpush.msrb.mxu1 %v3815_v56  ;;  %v983_v56 = vand.u32 4294901760, %v4107_v55  ;;  %974 = vmatpush.msrb.mxu3 %v973_v46  ;;  %v979_v49 = vand.u32 4294901760, %v978_v39  ;;  %v4139_v35 = vsub.f32 %v405_v47, %v4120_v26  ;;  %v7290_v6 = vand.u32 4294901760, %v4178_v10 }
  0x5f   :  { %v4101_v44 = vpop.permute.xlu2 %163  ;;  %829 = vmatpush.msrb.mxu0 %v647_v2  ;;  %905 = vmatpush.msrb.mxu2 %v4120_v26  ;;  %v4200_v39 = vsub.f32 %v400_v24, %v4186_v41 }
  0x60   :  { %7434 = vst [vmem:[#allocation5_spill] sm:$0xff] %v4101_v44  ;;  %866 = vmatpush.msrb.mxu1 %v3833_v63  ;;  %v984_v34 = vsub.f32 %v4107_v55, %v983_v56  ;;  %v989_v63 = vand.u32 4294901760, %v4123_v45  ;;  %980 = vmatpush.msrb.mxu3 %v979_v49  ;;  %v995_v42 = vand.u32 4294901760, %v4139_v35  ;;  %v1008_v47 = vsub.f32 %v4178_v10, %v7290_v6 }
  0x61   :  { %833 = vmatpush.msrb.mxu0 %v653_v19  ;;  %907 = vmatpush.msrb.mxu2 %v4136_v15  ;;  %v7287_v49 = vand.u32 4294901760, %v4194_v17  ;;  %v7288_v1 = vand.u32 4294901760, %v4200_v39 }
  0x62   :  { %868 = vmatpush.msrb.mxu1 %v3848_v5  ;;  %v985_v2 = vand.u32 4294901760, %v984_v34  ;;  %v990_v20 = vsub.f32 %v4123_v45, %v989_v63  ;;  %v996_v57 = vsub.f32 %v4139_v35, %v995_v42  ;;  %v1009_v11 = vand.u32 4294901760, %v1008_v47 }
  0x63   :  { %909 = vmatpush.msrb.mxu2 %v4154_v43  ;;  %v1026_v24 = vsub.f32 %v4200_v39, %v7288_v1 }
  0x64   :  { %870 = vmatpush.msrb.mxu1 %v3860_v18  ;;  %986 = vmatpush.msrb.mxu3 %v985_v2  ;;  %v401_v18 = vld [vmem:[%s7284_s1 + $0x88] sm:$0xff]  ;;  %v991_v53 = vand.u32 4294901760, %v990_v20  ;;  %v997_v32 = vand.u32 4294901760, %v996_v57  ;;  %v17_v2 = vlaneseq }
  0x65   :  { %v4180_v4 = vand.u32 4294901760, %v401_v18  ;;  %911 = vmatpush.msrb.mxu2 %v4175_v28  ;;  %v1027_v47 = vand.u32 4294901760, %v1026_v24 }
  0x66   :  { %872 = vmatpush.msrb.mxu1 %v3928_v60  ;;  %992 = vmatpush.msrb.mxu3 %v991_v53  ;;  %v1002_v60 = vsub.f32 %v4157_v58, %v1001_v62 }
  0x67   :  { %v4197_v46 = vsub.f32 %v401_v18, %v4180_v4  ;;  %913 = vmatpush.msrb.mxu2 %v4180_v4  ;;  %v1014_v18 = vsub.f32 %v4194_v17, %v7287_v49 }
  0x68   :  { %v4168_v61 = vpop.permute.xlu2 %201  ;;  %874 = vmatpush.msrb.mxu1 %v3936_v8  ;;  %998 = vmatpush.msrb.mxu3 %v997_v32  ;;  %v1003_v8 = vand.u32 4294901760, %v1002_v60  ;;  %v4225_v32 = vand.u32 127, %v17_v2 }
  0x69   :  { %v7289_v34 = vand.u32 4294901760, %v4197_v46  ;;  %915 = vmatpush.msrb.mxu2 %v4186_v41  ;;  %v1015_v60 = vand.u32 4294901760, %v1014_v18 }
  0x6a   :  { %1004 = vmatpush.msrb.mxu3 %v1003_v8  ;;  %7440 = vst [vmem:[#allocation11_spill] sm:$0xff] %v4225_v32  ;;  %vm168_vm7 = vcmp.eq.s32.totalorder %v4225_v32, %v4101_v44  ;;  %vm206_vm10 = vcmp.eq.s32.totalorder %v4225_v32, %v4168_v61 }
  0x6b   :  { %v1020_v57 = vsub.f32 %v4197_v46, %v7289_v34 }
  0x6c   :  { %1010 = vmatpush.msrb.mxu3 %v1009_v11  ;;  %v4248_v11 = vadd.s32 128, %v4225_v32 }
  0x6d   :  { %v1021_v8 = vand.u32 4294901760, %v1020_v57  ;;  %v7298_v57 = vmov 0.0  }
  0x6e   :  { %1016 = vmatpush.msrb.mxu3 %v1015_v60 }
  0x70   :  { %1022 = vmatpush.msrb.mxu3 %v1021_v8 }
  0x71   :  { %v4217_v53 = vpop.permute.xlu2 %277 }
  0x72   :  { %7439 = vst [vmem:[#allocation10_spill] sm:$0xff] %v4217_v53  ;;  %1028 = vmatpush.msrb.mxu3 %v1027_v47  ;;  %vm282_vm11 = vcmp.eq.s32.totalorder %v4225_v32, %v4217_v53 }
  0x74   :  { %v4151_v5 = vpop.permute.xlu1 %87  ;;  %v4162_v19 = vpop.permute.xlu0 %27 }
  0x75   :  { %7435 = vst [vmem:[#allocation6_spill] sm:$0xff] %v4151_v5  ;;  %vm32_vm0 = vcmp.eq.s32.totalorder %v4225_v32, %v4162_v19  ;;  %vm92_vm3 = vcmp.eq.s32.totalorder %v4225_v32, %v4151_v5  ;;  %vm33_vm15 = vcmp.eq.s32.totalorder %v4248_v11, %v4162_v19 }
  0x76   :  { %7436 = vst [vmem:[#allocation7_spill] sm:$0xff] %v4162_v19 }
  0x7a   :  { %v4252_v18 = vpop.permute.xlu2 %52 }
  0x7b   :  { %7443 = vst [vmem:[#allocation14_spill] sm:$0xff] %v4252_v18 }
  0x7d   :  { %v4207_v27 = vpop.permute.xlu1 %125  ;;  %v4212_v20 = vpop.permute.xlu0 %49 }
  0x7e   :  { %7437 = vst [vmem:[#allocation8_spill] sm:$0xff] %v4207_v27  ;;  %vm54_vm1 = vcmp.eq.s32.totalorder %v4225_v32, %v4212_v20  ;;  %vm130_vm5 = vcmp.eq.s32.totalorder %v4225_v32, %v4207_v27 }
  0x7f   :  { %7438 = vst [vmem:[#allocation9_spill] sm:$0xff] %v4212_v20  ;;  %vm70_vm2 = vmor %vm32_vm0, %vm54_vm1  ;;  %vm55_vm0 = vcmp.eq.s32.totalorder %v4248_v11, %v4212_v20 }
  0x80   :  { %vm108_vm4 = vmor %vm70_vm2, %vm92_vm3 }
  0x81   :  { %vm146_vm6 = vmor %vm108_vm4, %vm130_vm5  ;;  %vm93_vm4 = vcmp.eq.s32.totalorder %v4248_v11, %v4151_v5 }
  0x82   :  { %vm184_vm9 = vmor %vm146_vm6, %vm168_vm7  ;;  %vm131_vm6 = vcmp.eq.s32.totalorder %v4248_v11, %v4207_v27 }
  0x83   :  { %vm222_vm12 = vmor %vm184_vm9, %vm206_vm10  ;;  %v4269_v1 = vpop.permute.xlu2 %128  ;;  %vm62_vm9 = vcmp.eq.s32.totalorder %v4225_v32, %v4252_v18  ;;  %vm169_vm10 = vcmp.eq.s32.totalorder %v4248_v11, %v4101_v44 }
  0x84   :  { %vm71_vm3 = vmor %vm33_vm15, %vm55_vm0  ;;  %vm63_vm0 = vcmp.eq.s32.totalorder %v4248_v11, %v4252_v18 }
  0x85   :  { %vm109_vm5 = vmor %vm71_vm3, %vm93_vm4 }
  0x86   :  { %v4231_v49 = vpop.permute.xlu1 %239  ;;  %v4235_v2 = vpop.permute.xlu0 %315  ;;  %vm147_vm7 = vmor %vm109_vm5, %vm131_vm6  ;;  %vm283_vm5 = vcmp.eq.s32.totalorder %v4248_v11, %v4217_v53 }
  0x87   :  { %7441 = vst [vmem:[#allocation12_spill] sm:$0xff] %v4231_v49  ;;  %vm244_vm8 = vcmp.eq.s32.totalorder %v4225_v32, %v4231_v49  ;;  %vm320_vm13 = vcmp.eq.s32.totalorder %v4225_v32, %v4235_v2 }
  0x88   :  { %7442 = vst [vmem:[#allocation13_spill] sm:$0xff] %v4235_v2  ;;  %vm260_vm14 = vmor %vm222_vm12, %vm244_vm8  ;;  %vm245_vm12 = vcmp.eq.s32.totalorder %v4248_v11, %v4231_v49 }
  0x89   :  { %vm298_vm1 = vmor %vm260_vm14, %vm282_vm11  ;;  %vm207_vm14 = vcmp.eq.s32.totalorder %v4248_v11, %v4168_v61 }
  0x8a   :  { %vm336_vm2 = vmor %vm298_vm1, %vm320_vm13 }
  0x8b   :  { %v4259_v24 = vsel %vm336_vm2, 1.0, %v7298_v57  ;;  %vm185_vm11 = vmor %vm147_vm7, %vm169_vm10  ;;  %vm139_vm10 = vcmp.eq.s32.totalorder %v4248_v11, %v4269_v1 }
  0x8c   :  { %658 = vmatmul.f32.vlgmr.msra.gmra.mxu1 %v4259_v24  ;;  %v545_v8 = vsub.f32 %v4259_v24, %v4259_v24  ;;  %vm223_vm2 = vmor %vm185_vm11, %vm207_vm14 }
  0x8d   :  { %1098 = vmatpush.msra.mxu1 %v3957_v40  ;;  %vm4320_vm3 = vmor %vm223_vm2, %vm245_vm12  ;;  %vm321_vm12 = vcmp.eq.s32.totalorder %v4248_v11, %v4235_v2 }
  0x8e   :  { %716 = vmatmul.f32.vlgmr.msra.gmra.mxu2 %v545_v8  ;;  %v546_v47 = vand.u32 4294901760, %v545_v8  ;;  %vm4360_vm11 = vmor %vm4320_vm3, %vm283_vm5 }
  0x8f   :  { %v4261_v60 = vpop.permute.xlu1 %30  ;;  %1100 = vmatpush.msra.mxu1 %v3968_v48  ;;  %1145 = vmatpush.msra.mxu2 %v935_v7  ;;  %vm4393_vm2 = vmor %vm4360_vm11, %vm321_vm12 }
  0x90   :  { %760 = vmatmul.f32.vlgmr.msra.gmra.mxu3 %v546_v47  ;;  %v547_v34 = vsub.f32 %v545_v8, %v546_v47  ;;  %vm40_vm8 = vcmp.eq.s32.totalorder %v4225_v32, %v4261_v60  ;;  %vm41_vm15 = vcmp.eq.s32.totalorder %v4248_v11, %v4261_v60  ;;  %v425_v47 = vld [vmem:[%s7284_s1 + $0x148] sm:$0xff] }
  0x91   :  { %1102 = vmatpush.msra.mxu1 %v3992_v14  ;;  %1149 = vmatpush.msra.mxu2 %v941_v30  ;;  %vm4301_vm13 = vmor %vm40_vm8, %vm62_vm9  ;;  %vm138_vm8 = vcmp.eq.s32.totalorder %v4225_v32, %v4269_v1 }
  0x92   :  { %v548_v6 = vand.u32 4294901760, %v547_v34  ;;  %1216 = vmatpush.msra.mxu3 %v3957_v40  ;;  %vm79_vm6 = vmor %vm41_vm15, %vm63_vm0  ;;  %v7463_v40 = vand.u32 4294901760, %v4197_v46 }
  0x93   :  { %1104 = vmatpush.msra.mxu1 %v4005_v16  ;;  %1153 = vmatpush.msra.mxu2 %v947_v37 }
  0x94   :  { %549 = vmatmul.f32.vlgmr.msra.gmra.mxu0 %v548_v6  ;;  %1218 = vmatpush.msra.mxu3 %v3968_v48  ;;  %v4316_v48 = vpop.permute.xlu2 %242 }
  0x95   :  { %1040 = vmatpush.msra.mxu0 %v3971_v25  ;;  %1106 = vmatpush.msra.mxu1 %v4019_v36 }
  0x96   :  { %1157 = vmatpush.msra.mxu2 %v953_v50  ;;  %1220 = vmatpush.msra.mxu3 %v3992_v14  ;;  %v4331_v14 = vpop.permute.xlu0 %166 }
  0x97   :  { %1043 = vmatpush.msra.mxu0 %v3995_v29  ;;  %1108 = vmatpush.msra.mxu1 %v4032_v21  ;;  %vm176_vm14 = vcmp.eq.s32.totalorder %v4225_v32, %v4331_v14  ;;  %vm177_vm0 = vcmp.eq.s32.totalorder %v4248_v11, %v4331_v14 }
  0x98   :  { %v4283_v7 = vpop.permute.xlu1 %90  ;;  %1161 = vmatpush.msra.mxu2 %v959_v22  ;;  %1222 = vmatpush.msra.mxu3 %v4005_v16  ;;  %v431_v16 = vld [vmem:[%s7284_s1 + $0x178] sm:$0xff] }
  0x99   :  { %7444 = vst [vmem:[#allocation15_spill] sm:$0xff] %v4283_v7  ;;  %vm100_vm1 = vcmp.eq.s32.totalorder %v4225_v32, %v4283_v7  ;;  %1046 = vmatpush.msra.mxu0 %v4008_v31  ;;  %1110 = vmatpush.msra.mxu1 %v4049_v3  ;;  %vm101_vm4 = vcmp.eq.s32.totalorder %v4248_v11, %v4283_v7  ;;  %v424_v31 = vld [vmem:[%s7284_s1 + $0x140] sm:$0xff] }
  0x9a   :  { %1165 = vmatpush.msra.mxu2 %v965_v13  ;;  %1224 = vmatpush.msra.mxu3 %v4019_v36  ;;  %vm116_vm7 = vmor %vm4301_vm13, %vm100_vm1  ;;  %v430_v36 = vld [vmem:[%s7284_s1 + $0x170] sm:$0xff]  ;;  %v4432_v13 = vsel %vm4393_vm2, 1.0, %v7298_v57 }
  0x9b   :  { %1049 = vmatpush.msra.mxu0 %v4024_v38  ;;  %1112 = vmatpush.msra.mxu1 %v4068_v59  ;;  %vm4342_vm9 = vmor %vm79_vm6, %vm101_vm4  ;;  %v4389_v38 = vand.u32 4294901760, %v431_v16  ;;  %v4407_v50 = vand.u32 4294901760, %v430_v36 }
  0x9c   :  { %1169 = vmatpush.msra.mxu2 %v971_v0  ;;  %1226 = vmatpush.msra.mxu3 %v4032_v21  ;;  %vm154_vm13 = vmor %vm116_vm7, %vm138_vm8  ;;  %v4411_v22 = vpop.permute.xlu2 %318  ;;  %vm252_vm7 = vcmp.eq.s32.totalorder %v4225_v32, %v4316_v48  ;;  %v4552_v21 = vand.u32 4294901760, %v425_v47 }
  0x9d   :  { %1052 = vmatpush.msra.mxu0 %v4035_v51  ;;  %1114 = vmatpush.msra.mxu1 %v4082_v12  ;;  %vm4378_vm15 = vmor %vm4342_vm9, %vm139_vm10  ;;  %v429_v51 = vld [vmem:[%s7284_s1 + $0x168] sm:$0xff]  ;;  %vm253_vm9 = vcmp.eq.s32.totalorder %v4248_v11, %v4316_v48  ;;  %vm328_vm11 = vcmp.eq.s32.totalorder %v4225_v32, %v4411_v22 }
  0x9e   :  { %1173 = vmatpush.msra.mxu2 %v977_v54  ;;  %1228 = vmatpush.msra.mxu3 %v4049_v3  ;;  %vm192_vm3 = vmor %vm154_vm13, %vm176_vm14  ;;  %v428_v3 = vld [vmem:[%s7284_s1 + $0x160] sm:$0xff]  ;;  %v427_v54 = vld [vmem:[%s7284_s1 + $0x158] sm:$0xff] }
  0x9f   :  { %1055 = vmatpush.msra.mxu0 %v4052_v52  ;;  %1116 = vmatpush.msra.mxu1 %v4104_v33  ;;  %vm193_vm5 = vmor %vm4378_vm15, %vm177_vm0  ;;  %v4427_v52 = vsub.f32 %v431_v16, %v4389_v38  ;;  %vm329_vm0 = vcmp.eq.s32.totalorder %v4248_v11, %v4411_v22 }
  0xa0   :  { %1177 = vmatpush.msra.mxu2 %v983_v56  ;;  %1230 = vmatpush.msra.mxu3 %v4068_v59  ;;  %v4434_v59 = vand.u32 4294901760, %v429_v51  ;;  %v7461_v56 = vand.u32 4294901760, %v4178_v10 }
  0xa1   :  { %v4348_v30 = vpop.permute.xlu1 %204  ;;  %1058 = vmatpush.msra.mxu0 %v4071_v9  ;;  %1118 = vmatpush.msra.mxu1 %v4120_v26 }
  0xa2   :  { %vm214_vm1 = vcmp.eq.s32.totalorder %v4225_v32, %v4348_v30  ;;  %vm215_vm4 = vcmp.eq.s32.totalorder %v4248_v11, %v4348_v30  ;;  %1181 = vmatpush.msra.mxu2 %v989_v63  ;;  %1232 = vmatpush.msra.mxu3 %v4082_v12  ;;  %v4455_v12 = vsub.f32 %v430_v36, %v4407_v50  ;;  %v426_v63 = vld [vmem:[%s7284_s1 + $0x150] sm:$0xff]  ;;  %v7464_v36 = vand.u32 4294901760, %v4200_v39 }
  0xa3   :  { %1061 = vmatpush.msra.mxu0 %v4088_v23  ;;  %1120 = vmatpush.msra.mxu1 %v4136_v15  ;;  %vm230_vm6 = vmor %vm192_vm3, %vm214_vm1  ;;  %v4457_v23 = vand.u32 4294901760, %v428_v3  ;;  %v4523_v8 = vand.u32 4294901760, %v426_v63 }
  0xa4   :  { %1185 = vmatpush.msra.mxu2 %v995_v42  ;;  %1234 = vmatpush.msra.mxu3 %v4104_v33  ;;  %vm4439_vm8 = vmor %vm193_vm5, %vm215_vm4  ;;  %v4468_v33 = vsub.f32 %v4432_v13, %v4432_v13  ;;  %v7295_v6 = vand.u32 4294901760, %v4455_v12 }
  0xa5   :  { %1064 = vmatpush.msra.mxu0 %v4107_v55  ;;  %1122 = vmatpush.msra.mxu1 %v4154_v43  ;;  %vm268_vm10 = vmor %vm230_vm6, %vm252_vm7  ;;  %v4508_v34 = vsub.f32 %v428_v3, %v4457_v23  ;;  %v4558_v9 = vsub.f32 %v426_v63, %v4523_v8  ;;  %v423_v63 = vld [vmem:[%s7284_s1 + $0x138] sm:$0xff] }
  0xa6   :  { %1189 = vmatpush.msra.mxu2 %v1001_v62  ;;  %1236 = vmatpush.msra.mxu3 %v4120_v26  ;;  %vm4475_vm13 = vmor %vm4439_vm8, %vm253_vm9  ;;  %v7297_v26 = vand.u32 4294901760, %v4427_v52  ;;  %v7462_v62 = vand.u32 4294901760, %v4194_v17  ;;  %v1314_v37 = vsub.f32 %v4455_v12, %v7295_v6  ;;  %v419_v6 = vld [vmem:[%s7284_s1 + $0x118] sm:$0xff] }
  0xa7   :  { %1067 = vmatpush.msra.mxu0 %v4123_v45  ;;  %1124 = vmatpush.msra.mxu1 %v4175_v28  ;;  %v4486_v45 = vsub.f32 %v429_v51, %v4434_v59  ;;  %7465 = vst [vmem:[#allocation16_spill] sm:$0xff] %v4558_v9 }
  0xa8   :  { %1193 = vmatpush.msra.mxu2 %v7461_v56  ;;  %1238 = vmatpush.msra.mxu3 %v4136_v15  ;;  %v4498_v15 = vand.u32 4294901760, %v427_v54  ;;  %v4569_v56 = vand.u32 4294901760, %v424_v31 }
  0xa9   :  { %1070 = vmatpush.msra.mxu0 %v4139_v35  ;;  %1126 = vmatpush.msra.mxu1 %v4180_v4  ;;  %v7294_v25 = vand.u32 4294901760, %v4486_v45 }
  0xaa   :  { %v4447_v0 = vpop.permute.xlu1 %280  ;;  %1197 = vmatpush.msra.mxu2 %v7462_v62  ;;  %1240 = vmatpush.msra.mxu3 %v4154_v43  ;;  %v7302_v43 = vand.u32 4294901760, %v4468_v33  ;;  %v4537_v29 = vsub.f32 %v427_v54, %v4498_v15 }
  0xab   :  { %vm290_vm12 = vcmp.eq.s32.totalorder %v4225_v32, %v4447_v0  ;;  %vm291_vm14 = vcmp.eq.s32.totalorder %v4248_v11, %v4447_v0  ;;  %1073 = vmatpush.msra.mxu0 %v4157_v58  ;;  %1128 = vmatpush.msra.mxu1 %v4186_v41  ;;  %v1308_v58 = vsub.f32 %v4427_v52, %v7297_v26 }
  0xac   :  { %vm306_vm15 = vmor %vm268_vm10, %vm290_vm12  ;;  %1201 = vmatpush.msra.mxu2 %v7463_v40  ;;  %1242 = vmatpush.msra.mxu3 %v4175_v28  ;;  %v7293_v28 = vand.u32 4294901760, %v4508_v34  ;;  %v919_v3 = vsub.f32 %v4468_v33, %v7302_v43  ;;  %v1320_v54 = vsub.f32 %v4486_v45, %v7294_v25  ;;  %v4581_v40 = vsub.f32 %v425_v47, %v4552_v21  ;;  %v417_v43 = vld [vmem:[%s7284_s1 + $0x108] sm:$0xff] }
  0xad   :  { %vm344_vm1 = vmor %vm306_vm15, %vm328_vm11  ;;  %1076 = vmatpush.msra.mxu0 %v4178_v10  ;;  %v1309_v10 = vand.u32 4294901760, %v1308_v58  ;;  %v422_v58 = vld [vmem:[%s7284_s1 + $0x130] sm:$0xff]  ;;  %v4593_v47 = vsub.f32 %v424_v31, %v4569_v56 }
  0xae   :  { %v4501_v42 = vsel %vm344_vm1, 1.0, %v7298_v57  ;;  %vm307_vm2 = vmor %vm4475_vm13, %vm291_vm14  ;;  %1205 = vmatpush.msra.mxu2 %v7464_v36  ;;  %1244 = vmatpush.msra.mxu3 %v4180_v4  ;;  %v1315_v4 = vand.u32 4294901760, %v1314_v37  ;;  %7466 = vst [vmem:[#allocation17_spill] sm:$0xff] %v4581_v40  ;;  %v7292_v36 = vand.u32 4294901760, %v4558_v9 }
  0xaf   :  { %662 = vmatmul.f32.gmra.mxu1 %v4501_v42  ;;  %v553_v35 = vsub.f32 %v4501_v42, %v4501_v42  ;;  %vm345_vm3 = vmor %vm307_vm2, %vm329_vm0  ;;  %1079 = vmatpush.msra.mxu0 %v4194_v17  ;;  %v1326_v17 = vsub.f32 %v4508_v34, %v7293_v28  ;;  %7467 = vst [vmem:[#allocation18_spill] sm:$0xff] %v4593_v47 }
  0xb0   :  { %v4540_v16 = vsel %vm345_vm3, 1.0, %v7298_v57  ;;  %1246 = vmatpush.msra.mxu3 %v4186_v41  ;;  %v4588_v41 = vand.u32 4294901760, %v423_v63  ;;  %v1338_v31 = vsub.f32 %v4558_v9, %v7292_v36  ;;  %v4623_v36 = vadd.s32 256, %v4225_v32  ;;  %v418_v57 = vld [vmem:[%s7284_s1 + $0x110] sm:$0xff] }
  0xb1   :  { %721 = vmatmul.f32.gmra.mxu2 %v553_v35  ;;  %v554_v11 = vand.u32 4294901760, %v553_v35  ;;  %v4567_v55 = vsub.f32 %v4540_v16, %v4540_v16  ;;  %1082 = vmatpush.msra.mxu0 %v4197_v46  ;;  %v1321_v46 = vand.u32 4294901760, %v1320_v54 }
  0xb2   :  { %v4610_v54 = vsub.f32 %v423_v63, %v4588_v41  ;;  %vm34_vm4 = vcmp.eq.s32.totalorder %v4623_v36, %v4162_v19  ;;  %vm56_vm5 = vcmp.eq.s32.totalorder %v4623_v36, %v4212_v20  ;;  %vm94_vm7 = vcmp.eq.s32.totalorder %v4623_v36, %v4151_v5 }
  0xb3   :  { %766 = vmatmul.f32.gmra.mxu3 %v554_v11  ;;  %v555_v51 = vsub.f32 %v553_v35, %v554_v11  ;;  %v7291_v35 = vand.u32 4294901760, %v4537_v29  ;;  %v920_v11 = vand.u32 4294901760, %v919_v3  ;;  %1085 = vmatpush.msra.mxu0 %v4200_v39  ;;  %v7301_v37 = vand.u32 4294901760, %v4567_v55  ;;  %v421_v3 = vld [vmem:[%s7284_s1 + $0x128] sm:$0xff]  ;;  %vm4666_vm6 = vmor %vm34_vm4, %vm56_vm5 }
  0xb4   :  { %v1327_v39 = vand.u32 4294901760, %v1326_v17  ;;  %7468 = vst [vmem:[#allocation19_spill] sm:$0xff] %v4610_v54  ;;  %v7300_v17 = vand.u32 4294901760, %v4593_v47  ;;  %vm4690_vm8 = vmor %vm4666_vm6, %vm94_vm7  ;;  %vm132_vm9 = vcmp.eq.s32.totalorder %v4623_v36, %v4207_v27  ;;  %vm170_vm11 = vcmp.eq.s32.totalorder %v4623_v36, %v4101_v44 }
  0xb5   :  { %v556_v62 = vand.u32 4294901760, %v555_v51  ;;  %v1332_v51 = vsub.f32 %v4537_v29, %v7291_v35  ;;  %v4620_v35 = vand.u32 4294901760, %v421_v3  ;;  %vm148_vm10 = vmor %vm4690_vm8, %vm132_vm9  ;;  %vm208_vm13 = vcmp.eq.s32.totalorder %v4623_v36, %v4168_v61 }
  0xb6   :  { %vm4738_vm12 = vmor %vm148_vm10, %vm170_vm11  ;;  %vm246_vm14 = vcmp.eq.s32.totalorder %v4623_v36, %v4231_v49  ;;  %vm42_vm15 = vcmp.eq.s32.totalorder %v4623_v36, %v4261_v60  ;;  %vm64_vm0 = vcmp.eq.s32.totalorder %v4623_v36, %v4252_v18  ;;  %vm102_vm2 = vcmp.eq.s32.totalorder %v4623_v36, %v4283_v7 }
  0xb7   :  { %557 = vmatmul.f32.gmra.mxu0 %v556_v62  ;;  %876 = vmatmul.f32.vlgmr.msrb.gmra.mxu1 %v4259_v24  ;;  %v4598_v62 = vand.u32 4294901760, %v422_v58  ;;  %v1333_v63 = vand.u32 4294901760, %v1332_v51  ;;  %v7303_v51 = vand.u32 4294901760, %v4610_v54  ;;  %v4651_v26 = vsub.f32 %v421_v3, %v4620_v35  ;;  %vm224_vm1 = vmor %vm4738_vm12, %vm208_vm13 }
  0xb8   :  { %1310 = vmatpush.msrb.mxu1 %v1309_v10  ;;  %v7296_v10 = vand.u32 4294901760, %v4581_v40  ;;  %vm4774_vm3 = vmor %vm224_vm1, %vm246_vm14  ;;  %vm284_vm4 = vcmp.eq.s32.totalorder %v4623_v36, %v4217_v53  ;;  %vm140_vm7 = vcmp.eq.s32.totalorder %v4623_v36, %v4269_v1  ;;  %vm322_vm9 = vcmp.eq.s32.totalorder %v4623_v36, %v4235_v2 }
  0xb9   :  { %921 = vmatmul.f32.vlgmr.msrb.gmra.mxu2 %v920_v11  ;;  %v420_v11 = vld [vmem:[%s7284_s1 + $0x120] sm:$0xff]  ;;  %v4627_v28 = vsub.f32 %v422_v58, %v4598_v62  ;;  %v1339_v58 = vand.u32 4294901760, %v1338_v31  ;;  %7471 = vst [vmem:[#allocation22_spill] sm:$0xff] %v4651_v26  ;;  %v4658_v31 = vand.u32 4294901760, %v419_v6  ;;  %vm80_vm5 = vmor %vm42_vm15, %vm64_vm0  ;;  %vm178_vm11 = vcmp.eq.s32.totalorder %v4623_v36, %v4331_v14 }
  0xba   :  { %1316 = vmatpush.msrb.mxu1 %v1315_v4  ;;  %1412 = vmatpush.msrb.mxu2 %v4427_v52  ;;  %v927_v4 = vsub.f32 %v4567_v55, %v7301_v37  ;;  %v4633_v25 = vand.u32 4294901760, %v420_v11  ;;  %v4678_v37 = vand.u32 4294901760, %v418_v57  ;;  %vm4801_vm6 = vmor %vm80_vm5, %vm102_vm2  ;;  %vm216_vm13 = vcmp.eq.s32.totalorder %v4623_v36, %v4348_v30 }
  0xbb   :  { %1030 = vmatmul.f32.vlgmr.msrb.gmra.mxu3 %v4432_v13  ;;  %7469 = vst [vmem:[#allocation20_spill] sm:$0xff] %v4627_v28  ;;  %vm4814_vm8 = vmor %vm4774_vm3, %vm284_vm4  ;;  %vm254_vm0 = vcmp.eq.s32.totalorder %v4623_v36, %v4316_v48  ;;  %vm292_vm1 = vcmp.eq.s32.totalorder %v4623_v36, %v4447_v0 }
  0xbc   :  { %1322 = vmatpush.msrb.mxu1 %v1321_v46  ;;  %1415 = vmatpush.msrb.mxu2 %v4455_v12  ;;  %v1344_v46 = vsub.f32 %v4581_v40, %v7296_v10  ;;  %7470 = vst [vmem:[#allocation21_spill] sm:$0xff] %v4633_v25  ;;  %v1350_v10 = vsub.f32 %v4593_v47, %v7300_v17  ;;  %vm4833_vm10 = vmor %vm4801_vm6, %vm140_vm7 }
  0xbd   :  { %1470 = vmatpush.msrb.mxu3 %v4389_v38  ;;  %v1356_v17 = vsub.f32 %v4610_v54, %v7303_v51  ;;  %v4700_v51 = vsub.f32 %v419_v6, %v4658_v31  ;;  %vm338_vm12 = vmor %vm4814_vm8, %vm322_vm9  ;;  %vm330_vm6 = vcmp.eq.s32.totalorder %v4623_v36, %v4411_v22 }
  0xbe   :  { %1328 = vmatpush.msrb.mxu1 %v1327_v39  ;;  %1418 = vmatpush.msrb.mxu2 %v4486_v45  ;;  %v928_v39 = vand.u32 4294901760, %v927_v4  ;;  %v1345_v4 = vand.u32 4294901760, %v1344_v46  ;;  %v4707_v46 = vand.u32 4294901760, %v417_v43  ;;  %vm194_vm14 = vmor %vm4833_vm10, %vm178_vm11 }
  0xbf   :  { %1472 = vmatpush.msrb.mxu3 %v4407_v50  ;;  %835 = vmatmul.f32.vlgmr.msrb.gmra.mxu0 %v4259_v24  ;;  %v7304_v24 = vand.u32 4294901760, %v4627_v28  ;;  %7477 = vst [vmem:[#allocation24_spill] sm:$0xff] %v4700_v51  ;;  %v1357_v6 = vand.u32 4294901760, %v1356_v17  ;;  %vm4875_vm15 = vmor %vm194_vm14, %vm216_vm13 }
  0xc0   :  { %880 = vmatmul.f32.gmra.mxu1 %v4501_v42  ;;  %1257 = vmatpush.msrb.mxu0 %v4389_v38  ;;  %vm270_vm4 = vmor %vm4875_vm15, %vm254_vm0 }
  0xc1   :  { %1334 = vmatpush.msrb.mxu1 %v1333_v63  ;;  %1421 = vmatpush.msrb.mxu2 %v4508_v34  ;;  %v4672_v63 = vsub.f32 %v420_v11, %v4633_v25  ;;  %v1351_v11 = vand.u32 4294901760, %v1350_v10  ;;  %v416_v10 = vld [vmem:[%s7284_s1 + $0x100] sm:$0xff]  ;;  %vm4919_vm5 = vmor %vm270_vm4, %vm292_vm1 }
  0xc2   :  { %1474 = vmatpush.msrb.mxu3 %v4434_v59  ;;  %929 = vmatmul.f32.gmra.mxu2 %v928_v39  ;;  %v1362_v39 = vsub.f32 %v4627_v28, %v7304_v24  ;;  %v4714_v24 = vsub.f32 %v418_v57, %v4678_v37  ;;  %v7307_v57 = vand.u32 4294901760, %v4700_v51  ;;  %vm4957_vm8 = vmor %vm4919_vm5, %vm330_vm6 }
  0xc3   :  { %7474 = vst [vmem:[#allocation23_spill] sm:$0xff] %v4672_v63  ;;  %1259 = vmatpush.msrb.mxu0 %v4407_v50  ;;  %1340 = vmatpush.msrb.mxu1 %v1339_v58  ;;  %v7481_v58 = vand.u32 4294901760, %v4672_v63 }
  0xc4   :  { %1424 = vmatpush.msrb.mxu2 %v4537_v29  ;;  %1476 = vmatpush.msrb.mxu3 %v4457_v23  ;;  %7478 = vst [vmem:[#allocation25_spill] sm:$0xff] %v4714_v24  ;;  %v1363_v17 = vand.u32 4294901760, %v1362_v39  ;;  %v7308_v39 = vand.u32 4294901760, %v4714_v24 }
  0xc5   :  { %1034 = vmatmul.f32.gmra.mxu3 %v4540_v16  ;;  %1261 = vmatpush.msrb.mxu0 %v4434_v59 }
  0xc6   :  { %1346 = vmatpush.msrb.mxu1 %v1345_v4  ;;  %1427 = vmatpush.msrb.mxu2 %v4558_v9  ;;  %v7479_v4 = vand.u32 4294901760, %v4651_v26  ;;  %v4722_v9 = vand.u32 4294901760, %v416_v10 }
  0xc7   :  { %1478 = vmatpush.msrb.mxu3 %v4498_v15  ;;  %1263 = vmatpush.msrb.mxu0 %v4457_v23 }
  0xc8   :  { %1352 = vmatpush.msrb.mxu1 %v1351_v11  ;;  %1430 = vmatpush.msrb.mxu2 %v4581_v40  ;;  %v1368_v3 = vsub.f32 %v4651_v26, %v7479_v4  ;;  %v7480_v11 = vand.u32 4294901760, %v4468_v33  ;;  %v1374_v4 = vsub.f32 %v4672_v63, %v7481_v58  ;;  %v4736_v40 = vsub.f32 %v417_v43, %v4707_v46  ;;  %v445_v58 = vld [vmem:[%s7284_s1 + $0x1e8] sm:$0xff] }
  0xc9   :  { %1480 = vmatpush.msrb.mxu3 %v4523_v8  ;;  %839 = vmatmul.f32.gmra.mxu0 %v4501_v42  ;;  %v446_v42 = vld [vmem:[%s7284_s1 + $0x1f0] sm:$0xff] }
  0xca   :  { %1132 = vmatmul.f32.vlgmr.msra.gmra.mxu1 %v7480_v11  ;;  %1265 = vmatpush.msrb.mxu0 %v4498_v15  ;;  %7482 = vst [vmem:[#allocation26_spill] sm:$0xff] %v4736_v40  ;;  %v1369_v43 = vand.u32 4294901760, %v1368_v3  ;;  %v4751_v11 = vsub.f32 %v416_v10, %v4722_v9  ;;  %v447_v10 = vld [vmem:[%s7284_s1 + $0x1f8] sm:$0xff]  ;;  %v1375_v3 = vand.u32 4294901760, %v1374_v4  ;;  %v1386_v4 = vsub.f32 %v4714_v24, %v7308_v39 }
  0xcb   :  { %1358 = vmatpush.msrb.mxu1 %v1357_v6  ;;  %1433 = vmatpush.msrb.mxu2 %v4593_v47  ;;  %v1380_v6 = vsub.f32 %v4700_v51, %v7307_v57  ;;  %v4796_v57 = vand.u32 4294901760, %v447_v10  ;;  %v4853_v39 = vand.u32 4294901760, %v445_v58 }
  0xcc   :  { %1482 = vmatpush.msrb.mxu3 %v4552_v21  ;;  %1207 = vmatmul.f32.vlgmr.msra.gmra.mxu2 %v4432_v13  ;;  %7485 = vst [vmem:[#allocation27_spill] sm:$0xff] %v4751_v11 }
  0xcd   :  { %1267 = vmatpush.msrb.mxu0 %v4523_v8  ;;  %1364 = vmatpush.msrb.mxu1 %v1363_v17  ;;  %v7311_v17 = vand.u32 4294901760, %v4736_v40  ;;  %7496 = vst [vmem:[#allocation28_spill] sm:$0xff] %v4853_v39 }
  0xce   :  { %1436 = vmatpush.msrb.mxu2 %v4610_v54  ;;  %1484 = vmatpush.msrb.mxu3 %v4569_v56  ;;  %v1387_v54 = vand.u32 4294901760, %v1386_v4  ;;  %v4869_v4 = vadd.s32 384, %v4225_v32 }
  0xcf   :  { %1248 = vmatmul.f32.vlgmr.msra.gmra.mxu3 %v4432_v13  ;;  %1269 = vmatpush.msrb.mxu0 %v4552_v21  ;;  %v7498_v13 = vmov 0.0  }
  0xd0   :  { %1370 = vmatpush.msrb.mxu1 %v1369_v43  ;;  %1439 = vmatpush.msrb.mxu2 %v4627_v28  ;;  %v1381_v43 = vand.u32 4294901760, %v1380_v6  ;;  %v1392_v28 = vsub.f32 %v4736_v40, %v7311_v17  ;;  %v4824_v6 = vand.u32 4294901760, %v446_v42  ;;  %v7494_v17 = vand.u32 4294901760, %v4567_v55 }
  0xd1   :  { %1486 = vmatpush.msrb.mxu3 %v4588_v41  ;;  %1271 = vmatpush.msrb.mxu0 %v4569_v56  ;;  %vm35_vm2 = vcmp.eq.s32.totalorder %v4869_v4, %v4162_v19  ;;  %vm57_vm3 = vcmp.eq.s32.totalorder %v4869_v4, %v4212_v20  ;;  %vm95_vm9 = vcmp.eq.s32.totalorder %v4869_v4, %v4151_v5 }
  0xd2   :  { %1376 = vmatpush.msrb.mxu1 %v1375_v3  ;;  %1442 = vmatpush.msrb.mxu2 %v4651_v26  ;;  %v7495_v26 = vand.u32 4294901760, %v4751_v11  ;;  %vm4943_vm7 = vmor %vm35_vm2, %vm57_vm3  ;;  %vm133_vm11 = vcmp.eq.s32.totalorder %v4869_v4, %v4207_v27  ;;  %vm171_vm13 = vcmp.eq.s32.totalorder %v4869_v4, %v4101_v44  ;;  %vm209_vm14 = vcmp.eq.s32.totalorder %v4869_v4, %v4168_v61 }
  0xd3   :  { %1488 = vmatpush.msrb.mxu3 %v4598_v62  ;;  %1088 = vmatmul.f32.vlgmr.msra.gmra.mxu0 %v4468_v33  ;;  %v4848_v33 = vsub.f32 %v447_v10, %v4796_v57  ;;  %v4861_v10 = vsub.f32 %v446_v42, %v4824_v6  ;;  %v443_v42 = vld [vmem:[%s7284_s1 + $0x1d8] sm:$0xff]  ;;  %vm4975_vm10 = vmor %vm4943_vm7, %vm95_vm9  ;;  %vm247_vm15 = vcmp.eq.s32.totalorder %v4869_v4, %v4231_v49 }
  0xd4   :  { %1138 = vmatmul.f32.gmra.mxu1 %v7494_v17  ;;  %1273 = vmatpush.msrb.mxu0 %v4588_v41  ;;  %v1398_v47 = vsub.f32 %v4751_v11, %v7495_v26  ;;  %v444_v17 = vld [vmem:[%s7284_s1 + $0x1e0] sm:$0xff]  ;;  %v1393_v26 = vand.u32 4294901760, %v1392_v28  ;;  %vm43_vm1 = vcmp.eq.s32.totalorder %v4869_v4, %v4261_v60  ;;  %vm65_vm2 = vcmp.eq.s32.totalorder %v4869_v4, %v4252_v18 }
  0xd5   :  { %1382 = vmatpush.msrb.mxu1 %v1381_v43  ;;  %1445 = vmatpush.msrb.mxu2 %v4672_v63  ;;  %7497 = vst [vmem:[#allocation29_spill] sm:$0xff] %v4861_v10  ;;  %v4873_v43 = vsel %vm338_vm12, 1.0, %v7498_v13  ;;  %v4887_v32 = vand.u32 4294901760, %v444_v17  ;;  %v4894_v63 = vsub.f32 %v445_v58, %v4853_v39  ;;  %vm5016_vm12 = vmor %vm4975_vm10, %vm133_vm11  ;;  %vm103_vm4 = vcmp.eq.s32.totalorder %v4869_v4, %v4283_v7  ;;  %v433_v7 = vld [vmem:[%s7284_s1 + $0x188] sm:$0xff] }
  0xd6   :  { %1490 = vmatpush.msrb.mxu3 %v4620_v35  ;;  %1211 = vmatmul.f32.gmra.mxu2 %v4540_v16  ;;  %v1399_v3 = vand.u32 4294901760, %v1398_v47  ;;  %v4910_v47 = vand.u32 4294901760, %v443_v42  ;;  %v1289_v58 = vsub.f32 %v4873_v43, %v4873_v43  ;;  %vm5056_vm0 = vmor %vm5016_vm12, %vm171_vm13  ;;  %vm285_vm6 = vcmp.eq.s32.totalorder %v4869_v4, %v4217_v53 }
  0xd7   :  { %1275 = vmatpush.msrb.mxu0 %v4598_v62  ;;  %1388 = vmatpush.msrb.mxu1 %v1387_v54  ;;  %v7320_v54 = vand.u32 4294901760, %v4848_v33  ;;  %7501 = vst [vmem:[#allocation30_spill] sm:$0xff] %v4894_v63  ;;  %v7513_v36 = vand.u32 4294901760, %v4894_v63  ;;  %vm225_vm3 = vmor %vm5056_vm0, %vm209_vm14  ;;  %vm141_vm10 = vcmp.eq.s32.totalorder %v4869_v4, %v4269_v1  ;;  %vm179_vm12 = vcmp.eq.s32.totalorder %v4869_v4, %v4331_v14 }
  0xd8   :  { %1448 = vmatpush.msrb.mxu2 %v4700_v51  ;;  %1492 = vmatpush.msrb.mxu3 %v4633_v25  ;;  %v442_v51 = vld [vmem:[%s7284_s1 + $0x1d0] sm:$0xff]  ;;  %v4962_v19 = vsub.f32 %v443_v42, %v4910_v47  ;;  %vm5104_vm5 = vmor %vm225_vm3, %vm247_vm15  ;;  %vm217_vm15 = vcmp.eq.s32.totalorder %v4869_v4, %v4348_v30  ;;  %vm293_vm3 = vcmp.eq.s32.totalorder %v4869_v4, %v4447_v0 }
  0xd9   :  { %1252 = vmatmul.f32.gmra.mxu3 %v4540_v16  ;;  %1277 = vmatpush.msrb.mxu0 %v4620_v35  ;;  %v1680_v28 = vsub.f32 %v4848_v33, %v7320_v54  ;;  %v4930_v16 = vsub.f32 %v444_v17, %v4887_v32  ;;  %v437_v17 = vld [vmem:[%s7284_s1 + $0x1a8] sm:$0xff]  ;;  %vm81_vm7 = vmor %vm43_vm1, %vm65_vm2  ;;  %vm255_vm1 = vcmp.eq.s32.totalorder %v4869_v4, %v4316_v48 }
  0xda   :  { %1394 = vmatpush.msrb.mxu1 %v1393_v26  ;;  %1451 = vmatpush.msrb.mxu2 %v4714_v24  ;;  %v4932_v24 = vand.u32 4294901760, %v442_v51  ;;  %7510 = vst [vmem:[#allocation32_spill] sm:$0xff] %v4962_v19  ;;  %vm5134_vm9 = vmor %vm81_vm7, %vm103_vm4 }
  0xdb   :  { %1494 = vmatpush.msrb.mxu3 %v4658_v31  ;;  %1279 = vmatpush.msrb.mxu0 %v4633_v25  ;;  %7504 = vst [vmem:[#allocation31_spill] sm:$0xff] %v4930_v16  ;;  %v441_v25 = vld [vmem:[%s7284_s1 + $0x1c8] sm:$0xff]  ;;  %v1681_v42 = vand.u32 4294901760, %v1680_v28  ;;  %vm5160_vm11 = vmor %vm5104_vm5, %vm285_vm6  ;;  %vm331_vm6 = vcmp.eq.s32.totalorder %v4869_v4, %v4411_v22 }
  0xdc   :  { %1400 = vmatpush.msrb.mxu1 %v1399_v3  ;;  %1454 = vmatpush.msrb.mxu2 %v4736_v40  ;;  %v7507_v3 = vand.u32 4294901760, %v4861_v10  ;;  %v4971_v26 = vand.u32 4294901760, %v441_v25  ;;  %v4983_v5 = vsub.f32 %v442_v51, %v4932_v24  ;;  %v1692_v40 = vsub.f32 %v4894_v63, %v7513_v36  ;;  %v438_v36 = vld [vmem:[%s7284_s1 + $0x1b0] sm:$0xff]  ;;  %vm5184_vm13 = vmor %vm5134_vm9, %vm141_vm10 }
  0xdd   :  { %1496 = vmatpush.msrb.mxu3 %v4678_v37  ;;  %1093 = vmatmul.f32.gmra.mxu0 %v4567_v55  ;;  %v1290_v55 = vand.u32 4294901760, %v1289_v58  ;;  %vm195_vm0 = vmor %vm5184_vm13, %vm179_vm12 }
  0xde   :  { %1588 = vmatpush.msra.mxu1 %v4389_v38  ;;  %v1686_v54 = vsub.f32 %v4861_v10, %v7507_v3  ;;  %v440_v38 = vld [vmem:[%s7284_s1 + $0x1c0] sm:$0xff]  ;;  %1281 = vmatpush.msrb.mxu0 %v4658_v31  ;;  %v5010_v63 = vsub.f32 %v441_v25, %v4971_v26  ;;  %v7517_v3 = vand.u32 4294901760, %v4962_v19  ;;  %vm233_vm2 = vmor %vm195_vm0, %vm217_vm15 }
  0xdf   :  { %1402 = vmatmul.f32.vlgmr.msrb.gmra.mxu1 %v4873_v43  ;;  %1457 = vmatpush.msrb.mxu2 %v4751_v11  ;;  %v439_v11 = vld [vmem:[%s7284_s1 + $0x1b8] sm:$0xff]  ;;  %v4998_v28 = vand.u32 4294901760, %v440_v38  ;;  %v1291_v20 = vsub.f32 %v1289_v58, %v1290_v55  ;;  %vm271_vm4 = vmor %vm233_vm2, %vm255_vm1 }
  0xe0   :  { %1498 = vmatpush.msrb.mxu3 %v4707_v46  ;;  %1590 = vmatpush.msra.mxu1 %v4407_v50  ;;  %v4996_v50 = vsel %vm4957_vm8, 1.0, %v7498_v13  ;;  %v1687_v51 = vand.u32 4294901760, %v1686_v54  ;;  %v5012_v10 = vand.u32 4294901760, %v439_v11  ;;  %v7520_v54 = vand.u32 4294901760, %v4427_v52  ;;  %vm309_vm5 = vmor %vm271_vm4, %vm293_vm3 }
  0xe1   :  { %1629 = vmatpush.msra.mxu2 %v4796_v57  ;;  %1283 = vmatpush.msrb.mxu0 %v4678_v37  ;;  %v5028_v25 = vsub.f32 %v4996_v50, %v4996_v50  ;;  %v5038_v27 = vsub.f32 %v440_v38, %v4998_v28  ;;  %v1292_v38 = vand.u32 4294901760, %v1291_v20  ;;  %v435_v20 = vld [vmem:[%s7284_s1 + $0x198] sm:$0xff]  ;;  %vm323_vm8 = vcmp.eq.s32.totalorder %v4869_v4, %v4235_v2  ;;  %vm347_vm7 = vmor %vm309_vm5, %vm331_vm6 }
  0xe2   :  { %1460 = vmatmul.f32.vlgmr.msrb.gmra.mxu2 %v1289_v58  ;;  %1500 = vmatpush.msrb.mxu3 %v4722_v9  ;;  %vm5197_vm14 = vmor %vm5160_vm11, %vm323_vm8 }
  0xe3   :  { %1592 = vmatpush.msra.mxu1 %v4434_v59  ;;  %1631 = vmatpush.msra.mxu2 %v4824_v6  ;;  %v7516_v59 = vand.u32 4294901760, %v4930_v16  ;;  %v7346_v52 = vand.u32 4294901760, %v5038_v27 }
  0xe4   :  { %1682 = vmatpush.msra.mxu3 %v1681_v42  ;;  %1285 = vmatpush.msrb.mxu0 %v4707_v46  ;;  %v1693_v42 = vand.u32 4294901760, %v1692_v40 }
  0xe5   :  { %v1698_v58 = vsub.f32 %v4930_v16, %v7516_v59  ;;  %1504 = vmatmul.f32.vlgmr.msrb.gmra.mxu3 %v1290_v55  ;;  %1594 = vmatpush.msra.mxu1 %v4457_v23  ;;  %v5040_v59 = vand.u32 4294901760, %v438_v36  ;;  %v1704_v16 = vsub.f32 %v4962_v19, %v7517_v3  ;;  %v436_v23 = vld [vmem:[%s7284_s1 + $0x1a0] sm:$0xff]  ;;  %v7343_v55 = vand.u32 4294901760, %v5010_v63 }
  0xe6   :  { %1633 = vmatpush.msra.mxu2 %v4853_v39  ;;  %1688 = vmatpush.msra.mxu3 %v1687_v51  ;;  %v5066_v51 = vsub.f32 %v439_v11, %v5012_v10  ;;  %v5068_v3 = vand.u32 4294901760, %v437_v17  ;;  %v1298_v19 = vand.u32 4294901760, %v5028_v25  ;;  %v7521_v39 = vand.u32 4294901760, %v4983_v5 }
  0xe7   :  { %1287 = vmatpush.msrb.mxu0 %v4722_v9  ;;  %1596 = vmatpush.msra.mxu1 %v4498_v15  ;;  %v1699_v44 = vand.u32 4294901760, %v1698_v58  ;;  %v5084_v11 = vsub.f32 %v438_v36, %v5040_v59  ;;  %v5086_v58 = vand.u32 4294901760, %v436_v23  ;;  %v434_v36 = vld [vmem:[%s7284_s1 + $0x190] sm:$0xff] }
  0xe8   :  { %1635 = vmatpush.msra.mxu2 %v4887_v32  ;;  %v1710_v15 = vsub.f32 %v4983_v5, %v7521_v39  ;;  %1694 = vmatpush.msra.mxu3 %v1693_v42  ;;  %v7522_v39 = vand.u32 4294901760, %v4455_v12  ;;  %v1705_v42 = vand.u32 4294901760, %v1704_v16  ;;  %v1716_v12 = vsub.f32 %v5010_v63, %v7343_v55 }
  0xe9   :  { %1517 = vmatpush.msra.mxu0 %v7520_v54  ;;  %1406 = vmatmul.f32.gmra.mxu1 %v4996_v50  ;;  %v5117_v40 = vsub.f32 %v437_v17, %v5068_v3  ;;  %v5119_v54 = vand.u32 4294901760, %v435_v20  ;;  %v5148_v55 = vsub.f32 %v436_v23, %v5086_v58  ;;  %v5150_v16 = vand.u32 4294901760, %v434_v36 }
  0xea   :  { %1293 = vmatmul.f32.vlgmr.msrb.gmra.mxu0 %v1292_v38  ;;  %1598 = vmatpush.msra.mxu1 %v4523_v8  ;;  %v1711_v8 = vand.u32 4294901760, %v1710_v15  ;;  %v1717_v23 = vand.u32 4294901760, %v1716_v12 }
  0xeb   :  { %1521 = vmatpush.msra.mxu0 %v7522_v39  ;;  %1637 = vmatpush.msra.mxu2 %v4910_v47  ;;  %v1299_v39 = vsub.f32 %v5028_v25, %v1298_v19  ;;  %v5174_v15 = vsub.f32 %v435_v20, %v5119_v54  ;;  %v5190_v20 = vand.u32 4294901760, %v433_v7 }
  0xec   :  { %1700 = vmatpush.msra.mxu3 %v1699_v44  ;;  %1465 = vmatmul.f32.gmra.mxu2 %v5028_v25  ;;  %v7527_v44 = vand.u32 4294901760, %v4486_v45  ;;  %v1722_v25 = vsub.f32 %v5038_v27, %v7346_v52  ;;  %v5210_v45 = vsub.f32 %v434_v36, %v5150_v16  ;;  %v7538_v36 = vand.u32 4294901760, %v5117_v40 }
  0xed   :  { %1600 = vmatpush.msra.mxu1 %v4552_v21  ;;  %1639 = vmatpush.msra.mxu2 %v4932_v24  ;;  %v7530_v21 = vand.u32 4294901760, %v4508_v34  ;;  %v1300_v34 = vand.u32 4294901760, %v1299_v39  ;;  %v7537_v39 = vand.u32 4294901760, %v5084_v11 }
  0xee   :  { %1525 = vmatpush.msra.mxu0 %v7527_v44  ;;  %1706 = vmatpush.msra.mxu3 %v1705_v42  ;;  %v7531_v44 = vand.u32 4294901760, %v5066_v51  ;;  %v432_v42 = vld [vmem:[%s7284_s1 + $0x180] sm:$0xff]  ;;  %v1723_v17 = vand.u32 4294901760, %v1722_v25  ;;  %v5230_v25 = vsel %vm5197_vm14, 1.0, %v7498_v13  ;;  %v7347_v12 = vand.u32 4294901760, %v5210_v45 }
  0xef   :  { %1510 = vmatmul.f32.gmra.mxu3 %v1298_v19  ;;  %1602 = vmatpush.msra.mxu1 %v4569_v56  ;;  %v7536_v56 = vand.u32 4294901760, %v4537_v29  ;;  %v5214_v38 = vand.u32 4294901760, %v432_v42  ;;  %v7539_v19 = vld [vmem:[#allocation16_spill] sm:$0xff] }
  0xf0   :  { %1529 = vmatpush.msra.mxu0 %v7530_v21  ;;  %v1728_v52 = vsub.f32 %v5066_v51, %v7531_v44  ;;  %1641 = vmatpush.msra.mxu2 %v4971_v26  ;;  %v1734_v21 = vsub.f32 %v5084_v11, %v7537_v39  ;;  %v1745_v44 = vand.u32 4294901760, %v5148_v55  ;;  %v7541_v39 = vld [vmem:[#allocation17_spill] sm:$0xff] }
  0xf1   :  { %1712 = vmatpush.msra.mxu3 %v1711_v8  ;;  %1604 = vmatpush.msra.mxu1 %v4588_v41  ;;  %v1740_v41 = vsub.f32 %v5117_v40, %v7538_v36  ;;  %v1751_v8 = vand.u32 4294901760, %v5174_v15  ;;  %v7542_v36 = vand.u32 4294901760, %v7541_v39  ;;  %v7546_v39 = vld [vmem:[#allocation19_spill] sm:$0xff] }
  0xf2   :  { %1533 = vmatpush.msra.mxu0 %v7536_v56  ;;  %1643 = vmatpush.msra.mxu2 %v4998_v28  ;;  %v1729_v29 = vand.u32 4294901760, %v1728_v52  ;;  %v7540_v56 = vand.u32 4294901760, %v7539_v19  ;;  %v5239_v52 = vsub.f32 %v433_v7, %v5190_v20  ;;  %v5253_v7 = vsub.f32 %v5230_v25, %v5230_v25  ;;  %v7545_v19 = vld [vmem:[#allocation21_spill] sm:$0xff] }
  0xf3   :  { %1718 = vmatpush.msra.mxu3 %v1717_v23  ;;  %1301 = vmatmul.f32.gmra.mxu0 %v1300_v34  ;;  %v1735_v23 = vand.u32 4294901760, %v1734_v21  ;;  %v1746_v34 = vsub.f32 %v5148_v55, %v1745_v44  ;;  %v1752_v21 = vsub.f32 %v5174_v15, %v1751_v8 }
  0xf4   :  { %1537 = vmatpush.msra.mxu0 %v7540_v56  ;;  %1606 = vmatpush.msra.mxu1 %v4598_v62  ;;  %v5256_v62 = vsub.f32 %v432_v42, %v5214_v38  ;;  %v1763_v56 = vand.u32 4294901760, %v5239_v52  ;;  %v1662_v4 = vand.u32 4294901760, %v5253_v7 }
  0xf5   :  { %1645 = vmatpush.msra.mxu2 %v5012_v10  ;;  %1724 = vmatpush.msra.mxu3 %v1723_v17  ;;  %v1741_v17 = vand.u32 4294901760, %v1740_v41  ;;  %v1758_v41 = vsub.f32 %v5210_v45, %v7347_v12 }
  0xf6   :  { %1541 = vmatpush.msra.mxu0 %v7542_v36  ;;  %1608 = vmatpush.msra.mxu1 %v4620_v35  ;;  %v7543_v35 = vld [vmem:[#allocation18_spill] sm:$0xff]  ;;  %v7547_v36 = vand.u32 4294901760, %v7546_v39  ;;  %v5292_v39 = vsel %vm347_vm7, 1.0, %v7498_v13 }
  0xf7   :  { %1647 = vmatpush.msra.mxu2 %v5040_v59  ;;  %1730 = vmatpush.msra.mxu3 %v1729_v29  ;;  %v7544_v42 = vand.u32 4294901760, %v7543_v35  ;;  %v1747_v29 = vand.u32 4294901760, %v1746_v34  ;;  %v1769_v35 = vand.u32 4294901760, %v5256_v62 }
  0xf8   :  { %1610 = vmatpush.msra.mxu1 %v7545_v19  ;;  %v1764_v19 = vsub.f32 %v5239_v52, %v1763_v56 }
  0xf9   :  { %1545 = vmatpush.msra.mxu0 %v7544_v42  ;;  %1649 = vmatpush.msra.mxu2 %v5068_v3  ;;  %v1753_v42 = vand.u32 4294901760, %v1752_v21  ;;  %v7552_v21 = vld [vmem:[#allocation23_spill] sm:$0xff] }
  0xfa   :  { %1736 = vmatpush.msra.mxu3 %v1735_v23  ;;  %1612 = vmatpush.msra.mxu1 %v4658_v31  ;;  %v7548_v23 = vld [vmem:[#allocation20_spill] sm:$0xff]  ;;  %v1759_v31 = vand.u32 4294901760, %v1758_v41  ;;  %v1765_v41 = vand.u32 4294901760, %v1764_v19  ;;  %v7556_v19 = vand.u32 4294901760, %v4848_v33 }
  0xfb   :  { %1549 = vmatpush.msra.mxu0 %v7547_v36  ;;  %1651 = vmatpush.msra.mxu2 %v5086_v58  ;;  %v7549_v34 = vand.u32 4294901760, %v7548_v23  ;;  %v7550_v36 = vld [vmem:[#allocation22_spill] sm:$0xff] }
  0xfc   :  { %1742 = vmatpush.msra.mxu3 %v1741_v17  ;;  %1614 = vmatpush.msra.mxu1 %v4678_v37  ;;  %v7551_v12 = vand.u32 4294901760, %v7550_v36  ;;  %v1663_v37 = vsub.f32 %v5253_v7, %v1662_v4  ;;  %v1770_v17 = vsub.f32 %v5256_v62, %v1769_v35 }
  0xfd   :  { %1553 = vmatpush.msra.mxu0 %v7549_v34  ;;  %1653 = vmatpush.msra.mxu2 %v5119_v54 }
  0xfe   :  { %1748 = vmatpush.msra.mxu3 %v1747_v29  ;;  %1616 = vmatpush.msra.mxu1 %v4707_v46  ;;  %v7553_v29 = vand.u32 4294901760, %v7552_v21  ;;  %v5309_v46 = vsub.f32 %v5292_v39, %v5292_v39  ;;  %v1664_v34 = vand.u32 4294901760, %v1663_v37  ;;  %v7559_v37 = vld [vmem:[#allocation28_spill] sm:$0xff] }
  0xff   :  { %1557 = vmatpush.msra.mxu0 %v7551_v12  ;;  %1655 = vmatpush.msra.mxu2 %v5150_v16  ;;  %v7554_v12 = vld [vmem:[#allocation24_spill] sm:$0xff] }
 0x100   :  { %1754 = vmatpush.msra.mxu3 %v1753_v42  ;;  %1618 = vmatpush.msra.mxu1 %v4722_v9  ;;  %v7555_v23 = vand.u32 4294901760, %v7554_v12  ;;  %v1771_v42 = vand.u32 4294901760, %v1770_v17  ;;  %v1670_v9 = vand.u32 4294901760, %v5309_v46  ;;  %v7560_v17 = vld [vmem:[#allocation29_spill] sm:$0xff] }
 0x101   :  { %1561 = vmatpush.msra.mxu0 %v7553_v29  ;;  %1657 = vmatpush.msra.mxu2 %v5190_v20  ;;  %v7561_v21 = vand.u32 4294901760, %v7560_v17 }
 0x102   :  { %1760 = vmatpush.msra.mxu3 %v1759_v31  ;;  %1620 = vmatmul.f32.vlgmr.msra.gmra.mxu1 %v4873_v43  ;;  %v7557_v31 = vld [vmem:[#allocation25_spill] sm:$0xff]  ;;  %v1671_v29 = vsub.f32 %v5309_v46, %v1670_v9 }
 0x103   :  { %1565 = vmatpush.msra.mxu0 %v7555_v23  ;;  %1842 = vmatpush.msrb.mxu1 %v4796_v57  ;;  %v7558_v36 = vand.u32 4294901760, %v7557_v31  ;;  %v7564_v23 = vld [vmem:[#allocation30_spill] sm:$0xff]  ;;  %v7568_v31 = vld [vmem:[#allocation31_spill] sm:$0xff] }
 0x104   :  { %1659 = vmatpush.msra.mxu2 %v5214_v38  ;;  %1766 = vmatpush.msra.mxu3 %v1765_v41  ;;  %v7562_v41 = vld [vmem:[#allocation26_spill] sm:$0xff] }
 0x105   :  { %1665 = vmatmul.f32.vlgmr.msra.gmra.mxu2 %v1664_v34  ;;  %1844 = vmatpush.msrb.mxu1 %v4824_v6  ;;  %v7563_v12 = vand.u32 4294901760, %v7562_v41  ;;  %v7565_v34 = vand.u32 4294901760, %v7564_v23 }
 0x106   :  { %1889 = vmatpush.msrb.mxu2 %v7556_v19  ;;  %1569 = vmatpush.msra.mxu0 %v7558_v36  ;;  %v7569_v36 = vand.u32 4294901760, %v7568_v31 }
 0x107   :  { %1772 = vmatpush.msra.mxu3 %v1771_v42  ;;  %1846 = vmatpush.msrb.mxu1 %v7559_v37  ;;  %v7566_v42 = vld [vmem:[#allocation27_spill] sm:$0xff] }
 0x108   :  { %1774 = vmatmul.f32.vlgmr.msra.gmra.mxu3 %v5230_v25  ;;  %1893 = vmatpush.msrb.mxu2 %v7561_v21  ;;  %v7567_v19 = vand.u32 4294901760, %v7566_v42  ;;  %v7574_v42 = vand.u32 4294901760, %v5038_v27 }
 0x109   :  { %1960 = vmatpush.msrb.mxu3 %v4796_v57  ;;  %1573 = vmatpush.msra.mxu0 %v7563_v12  ;;  %v1672_v57 = vand.u32 4294901760, %v1671_v29  ;;  %v461_v29 = vld [vmem:[%s7284_s1 + $0x268] sm:$0xff]  ;;  %v659_v41 = vpop.f32.mrf.mxu1 }
 0x10a   :  { %1848 = vmatpush.msrb.mxu1 %v4887_v32  ;;  %1897 = vmatpush.msrb.mxu2 %v7565_v34  ;;  %v460_v34 = vld [vmem:[%s7284_s1 + $0x260] sm:$0xff] }
 0x10b   :  { %1962 = vmatpush.msrb.mxu3 %v4824_v6  ;;  %1577 = vmatpush.msra.mxu0 %v7567_v19  ;;  %v7570_v6 = vld [vmem:[#allocation32_spill] sm:$0xff]  ;;  %v5387_v19 = vand.u32 4294901760, %v461_v29 }
 0x10c   :  { %1624 = vmatmul.f32.gmra.mxu1 %v4996_v50  ;;  %1579 = vmatmul.f32.vlgmr.msra.gmra.mxu0 %v4873_v43  ;;  %v7571_v21 = vand.u32 4294901760, %v7570_v6  ;;  %v463_v43 = vld [vmem:[%s7284_s1 + $0x278] sm:$0xff] }
 0x10d   :  { %1850 = vmatpush.msrb.mxu1 %v4910_v47  ;;  %1784 = vmatpush.msrb.mxu0 %v4848_v33  ;;  %v7572_v33 = vand.u32 4294901760, %v4983_v5 }
 0x10e   :  { %1901 = vmatpush.msrb.mxu2 %v7569_v36  ;;  %1964 = vmatpush.msrb.mxu3 %v7559_v37  ;;  %v462_v37 = vld [vmem:[%s7284_s1 + $0x270] sm:$0xff] }
 0x10f   :  { %1673 = vmatmul.f32.gmra.mxu2 %v1672_v57  ;;  %1787 = vmatpush.msrb.mxu0 %v7560_v17  ;;  %v7573_v17 = vand.u32 4294901760, %v5010_v63 }
 0x110   :  { %1852 = vmatpush.msrb.mxu1 %v4932_v24  ;;  %1905 = vmatpush.msrb.mxu2 %v7571_v21  ;;  %v459_v21 = vld [vmem:[%s7284_s1 + $0x258] sm:$0xff] }
 0x111   :  { %1966 = vmatpush.msrb.mxu3 %v4887_v32  ;;  %1790 = vmatpush.msrb.mxu0 %v7564_v23  ;;  %v5364_v32 = vand.u32 4294901760, %v463_v43  ;;  %v550_v12 = vpop.f32.mrf.mxu0 }
 0x112   :  { %1778 = vmatmul.f32.gmra.mxu3 %v5292_v39  ;;  %1854 = vmatpush.msrb.mxu1 %v4971_v26  ;;  %v660_v23 = vadd.f32 %v659_v41, %v550_v12 }
 0x113   :  { %1909 = vmatpush.msrb.mxu2 %v7572_v33  ;;  %1968 = vmatpush.msrb.mxu3 %v4910_v47  ;;  %v5374_v47 = vand.u32 4294901760, %v462_v37  ;;  %v761_v36 = vpop.f32.mrf.mxu3  ;;  %v5411_v33 = vsub.f32 %v461_v29, %v5387_v19 }
 0x114   :  { %1793 = vmatpush.msrb.mxu0 %v7568_v31  ;;  %1856 = vmatpush.msrb.mxu1 %v4998_v28  ;;  %v7575_v31 = vand.u32 4294901760, %v5066_v51 }
 0x115   :  { %1913 = vmatpush.msrb.mxu2 %v7573_v17  ;;  %1970 = vmatpush.msrb.mxu3 %v4932_v24  ;;  %v717_v24 = vpop.f32.mrf.mxu2  ;;  %7578 = vst [vmem:[#allocation17_spill] sm:$0xff] %v5411_v33  ;;  %v7579_v17 = vand.u32 4294901760, %v5117_v40  ;;  %v7352_v41 = vand.u32 4294901760, %v5411_v33 }
 0x116   :  { %1583 = vmatmul.f32.gmra.mxu0 %v4996_v50  ;;  %1858 = vmatpush.msrb.mxu1 %v5012_v10  ;;  %v5385_v50 = vsub.f32 %v463_v43, %v5364_v32  ;;  %v718_v57 = vadd.f32 %v717_v24, %v660_v23  ;;  %v7577_v43 = vand.u32 4294901760, %v5084_v11 }
 0x117   :  { %1796 = vmatpush.msrb.mxu0 %v7570_v6  ;;  %1917 = vmatpush.msrb.mxu2 %v7574_v42  ;;  %v5395_v6 = vsub.f32 %v462_v37, %v5374_v47  ;;  %v5415_v37 = vand.u32 4294901760, %v459_v21 }
 0x118   :  { %1972 = vmatpush.msrb.mxu3 %v4971_v26  ;;  %1860 = vmatpush.msrb.mxu1 %v5040_v59  ;;  %v5397_v26 = vand.u32 4294901760, %v460_v34 }
 0x119   :  { %1799 = vmatpush.msrb.mxu0 %v4983_v5  ;;  %1921 = vmatpush.msrb.mxu2 %v7575_v31  ;;  %7576 = vst [vmem:[#allocation16_spill] sm:$0xff] %v5395_v6  ;;  %v5404_v5 = vadd.f32 %v761_v36, %v718_v57  ;;  %v7584_v57 = vld [vmem:[#allocation11_spill] sm:$0xff] }
 0x11a   :  { %1974 = vmatpush.msrb.mxu3 %v4998_v28  ;;  %1862 = vmatpush.msrb.mxu1 %v5068_v3  ;;  %v7355_v28 = vand.u32 4294901760, %v5385_v50  ;;  %v5425_v29 = vsub.f32 %v460_v34, %v5397_v26  ;;  %v7582_v34 = vand.u32 4294901760, %v5210_v45  ;;  %v5478_v31 = vadd.s32 512, %v7584_v57 }
 0x11b   :  { %1802 = vmatpush.msrb.mxu0 %v5010_v63  ;;  %1925 = vmatpush.msrb.mxu2 %v7577_v43  ;;  %v458_v63 = vld [vmem:[%s7284_s1 + $0x250] sm:$0xff] }
 0x11c   :  { %1976 = vmatpush.msrb.mxu3 %v5012_v10  ;;  %1864 = vmatpush.msrb.mxu1 %v5086_v58  ;;  %v7354_v10 = vand.u32 4294901760, %v5395_v6  ;;  %7580 = vst [vmem:[#allocation18_spill] sm:$0xff] %v5425_v29  ;;  %v5439_v12 = vand.u32 4294901760, %v458_v63  ;;  %vm210_vm0 = vcmp.eq.s32.totalorder %v5478_v31, %v4168_v61  ;;  %vm248_vm2 = vcmp.eq.s32.totalorder %v5478_v31, %v4231_v49 }
 0x11d   :  { %1805 = vmatpush.msrb.mxu0 %v5038_v27  ;;  %1929 = vmatpush.msrb.mxu2 %v7579_v17  ;;  %v457_v27 = vld [vmem:[%s7284_s1 + $0x248] sm:$0xff]  ;;  %vm44_vm3 = vcmp.eq.s32.totalorder %v5478_v31, %v4261_v60  ;;  %vm66_vm4 = vcmp.eq.s32.totalorder %v5478_v31, %v4252_v18 }
 0x11e   :  { %1978 = vmatpush.msrb.mxu3 %v5040_v59  ;;  %1866 = vmatpush.msrb.mxu1 %v5119_v54  ;;  %v2052_v59 = vsub.f32 %v5385_v50, %v7355_v28  ;;  %v5456_v23 = vand.u32 4294901760, %v457_v27  ;;  %v5467_v42 = vsub.f32 %v458_v63, %v5439_v12  ;;  %v7587_v63 = vld [vmem:[#allocation9_spill] sm:$0xff] }
 0x11f   :  { %1808 = vmatpush.msrb.mxu0 %v5066_v51  ;;  %1933 = vmatpush.msrb.mxu2 %v1745_v44  ;;  %v5444_v51 = vsub.f32 %v459_v21, %v5415_v37  ;;  %v456_v44 = vld [vmem:[%s7284_s1 + $0x240] sm:$0xff]  ;;  %vm58_vm9 = vcmp.eq.s32.totalorder %v5478_v31, %v7587_v63 }
 0x120   :  { %1980 = vmatpush.msrb.mxu3 %v5068_v3  ;;  %1868 = vmatpush.msrb.mxu1 %v5150_v16  ;;  %v2058_v3 = vsub.f32 %v5395_v6, %v7354_v10  ;;  %7583 = vst [vmem:[#allocation19_spill] sm:$0xff] %v5467_v42  ;;  %v5469_v24 = vand.u32 4294901760, %v456_v44  ;;  %v5487_v43 = vsub.f32 %v457_v27, %v5456_v23  ;;  %v7349_v27 = vand.u32 4294901760, %v5467_v42  ;;  %v7601_v10 = vld [vmem:[#allocation5_spill] sm:$0xff] }
 0x121   :  { %1811 = vmatpush.msrb.mxu0 %v5084_v11  ;;  %7581 = vst [vmem:[#allocation21_spill] sm:$0xff] %v5444_v51  ;;  %1937 = vmatpush.msrb.mxu2 %v1751_v8  ;;  %v7350_v11 = vand.u32 4294901760, %v5425_v29  ;;  %v2053_v8 = vand.u32 4294901760, %v2052_v59  ;;  %vm172_vm15 = vcmp.eq.s32.totalorder %v5478_v31, %v7601_v10 }
 0x122   :  { %1982 = vmatpush.msrb.mxu3 %v5086_v58  ;;  %1870 = vmatpush.msrb.mxu1 %v5190_v20  ;;  %v2064_v58 = vsub.f32 %v5411_v33, %v7352_v41  ;;  %v2059_v36 = vand.u32 4294901760, %v2058_v3  ;;  %7585 = vst [vmem:[#allocation20_spill] sm:$0xff] %v5487_v43  ;;  %v5505_v59 = vsub.f32 %v456_v44, %v5469_v24  ;;  %v7351_v44 = vand.u32 4294901760, %v5487_v43 }
 0x123   :  { %1814 = vmatpush.msrb.mxu0 %v5117_v40  ;;  %1941 = vmatpush.msrb.mxu2 %v7582_v34  ;;  %v455_v40 = vld [vmem:[%s7284_s1 + $0x238] sm:$0xff]  ;;  %v2070_v21 = vsub.f32 %v5425_v29, %v7350_v11  ;;  %v452_v34 = vld [vmem:[%s7284_s1 + $0x220] sm:$0xff] }
 0x124   :  { %1984 = vmatpush.msrb.mxu3 %v5119_v54  ;;  %1872 = vmatpush.msrb.mxu1 %v5214_v38  ;;  %v7348_v54 = vand.u32 4294901760, %v5444_v51  ;;  %v2065_v17 = vand.u32 4294901760, %v2064_v58  ;;  %7588 = vst [vmem:[#allocation22_spill] sm:$0xff] %v5505_v59 }
 0x125   :  { %1817 = vmatpush.msrb.mxu0 %v5148_v55  ;;  %1945 = vmatpush.msrb.mxu2 %v1763_v56  ;;  %v454_v55 = vld [vmem:[%s7284_s1 + $0x230] sm:$0xff]  ;;  %v5495_v56 = vand.u32 4294901760, %v455_v40 }
 0x126   :  { %1986 = vmatpush.msrb.mxu3 %v5150_v16  ;;  %1876 = vmatmul.f32.vlgmr.msrb.gmra.mxu1 %v1662_v4  ;;  %v7586_v16 = vld [vmem:[#allocation7_spill] sm:$0xff]  ;;  %v2076_v4 = vsub.f32 %v5444_v51, %v7348_v54  ;;  %v5515_v3 = vand.u32 4294901760, %v454_v55  ;;  %v7592_v54 = vld [vmem:[#allocation6_spill] sm:$0xff] }
 0x127   :  { %1820 = vmatpush.msrb.mxu0 %v5174_v15  ;;  %vm36_vm8 = vcmp.eq.s32.totalorder %v5478_v31, %v7586_v16  ;;  %2054 = vmatpush.msra.mxu1 %v2053_v8  ;;  %v453_v15 = vld [vmem:[%s7284_s1 + $0x228] sm:$0xff]  ;;  %v5535_v8 = vsub.f32 %v455_v40, %v5495_v56  ;;  %vm96_vm11 = vcmp.eq.s32.totalorder %v5478_v31, %v7592_v54  ;;  %v5554_v40 = vand.u32 4294901760, %v452_v34 }
 0x128   :  { %1949 = vmatpush.msrb.mxu2 %v1769_v35  ;;  %1988 = vmatpush.msrb.mxu3 %v5190_v20  ;;  %v2071_v35 = vand.u32 4294901760, %v2070_v21  ;;  %vm5528_vm10 = vmor %vm36_vm8, %vm58_vm9  ;;  %v5537_v58 = vand.u32 4294901760, %v453_v15  ;;  %v7353_v21 = vand.u32 4294901760, %v5505_v59  ;;  %vm286_vm8 = vcmp.eq.s32.totalorder %v5478_v31, %v4217_v53 }
 0x129   :  { %1951 = vmatmul.f32.vlgmr.msrb.gmra.mxu2 %v5230_v25  ;;  %2060 = vmatpush.msra.mxu1 %v2059_v36  ;;  %7591 = vst [vmem:[#allocation23_spill] sm:$0xff] %v5535_v8  ;;  %v2082_v36 = vsub.f32 %v5467_v42, %v7349_v27  ;;  %vm5558_vm12 = vmor %vm5528_vm10, %vm96_vm11  ;;  %v2088_v27 = vsub.f32 %v5487_v43, %v7351_v44 }
 0x12a   :  { %2156 = vmatpush.msra.mxu2 %v5385_v50  ;;  %1823 = vmatpush.msrb.mxu0 %v5210_v45  ;;  %v451_v45 = vld [vmem:[%s7284_s1 + $0x218] sm:$0xff]  ;;  %v5573_v20 = vsub.f32 %v453_v15, %v5537_v58  ;;  %v2094_v44 = vsub.f32 %v5505_v59, %v7353_v21  ;;  %v449_v15 = vld [vmem:[%s7284_s1 + $0x208] sm:$0xff]  ;;  %vm82_vm9 = vmor %vm44_vm3, %vm66_vm4  ;;  %vm142_vm10 = vcmp.eq.s32.totalorder %v5478_v31, %v4269_v1 }
 0x12b   :  { %1990 = vmatpush.msrb.mxu3 %v5214_v38  ;;  %2066 = vmatpush.msra.mxu1 %v2065_v17  ;;  %v2077_v38 = vand.u32 4294901760, %v2076_v4  ;;  %v7356_v4 = vand.u32 4294901760, %v5535_v8  ;;  %v5575_v11 = vand.u32 4294901760, %v451_v45  ;;  %v2089_v21 = vand.u32 4294901760, %v2088_v27  ;;  %v448_v17 = vld [vmem:[%s7284_s1 + $0x200] sm:$0xff] }
 0x12c   :  { %1992 = vmatmul.f32.vlgmr.msrb.gmra.mxu3 %v5230_v25  ;;  %2159 = vmatpush.msra.mxu2 %v5395_v6  ;;  %v5552_v25 = vsub.f32 %v454_v55, %v5515_v3  ;;  %v450_v55 = vld [vmem:[%s7284_s1 + $0x210] sm:$0xff]  ;;  %7596 = vst [vmem:[#allocation25_spill] sm:$0xff] %v5573_v20  ;;  %v5643_v27 = vand.u32 4294901760, %v448_v17  ;;  %vm256_vm4 = vcmp.eq.s32.totalorder %v5478_v31, %v4316_v48 }
 0x12d   :  { %2214 = vmatpush.msra.mxu3 %v5364_v32  ;;  %1826 = vmatpush.msrb.mxu0 %v5239_v52  ;;  %v7597_v52 = vld [vmem:[#allocation8_spill] sm:$0xff] }
 0x12e   :  { %7593 = vst [vmem:[#allocation24_spill] sm:$0xff] %v5552_v25  ;;  %2072 = vmatpush.msra.mxu1 %v2071_v35  ;;  %2162 = vmatpush.msra.mxu2 %v5411_v33  ;;  %vm134_vm13 = vcmp.eq.s32.totalorder %v5478_v31, %v7597_v52  ;;  %v2083_v35 = vand.u32 4294901760, %v2082_v36  ;;  %v5599_v36 = vand.u32 4294901760, %v450_v55  ;;  %v7605_v41 = vand.u32 4294901760, %v5552_v25 }
 0x12f   :  { %2216 = vmatpush.msra.mxu3 %v5374_v47  ;;  %1829 = vmatpush.msrb.mxu0 %v5256_v62  ;;  %vm5590_vm14 = vmor %vm5558_vm12, %vm134_vm13  ;;  %v2095_v62 = vand.u32 4294901760, %v2094_v44  ;;  %v663_v44 = vpop.f32.mrf.mxu1  ;;  %vm324_vm13 = vcmp.eq.s32.totalorder %v5478_v31, %v4235_v2 }
 0x130   :  { %1882 = vmatmul.f32.gmra.mxu1 %v1670_v9  ;;  %1832 = vmatmul.f32.vlgmr.msrb.gmra.mxu0 %v5253_v7  ;;  %v5597_v9 = vsub.f32 %v452_v34, %v5554_v40  ;;  %v2100_v7 = vsub.f32 %v5535_v8, %v7356_v4  ;;  %v5617_v34 = vsub.f32 %v451_v45, %v5575_v11  ;;  %vm5623_vm1 = vmor %vm5590_vm14, %vm172_vm15 }
 0x131   :  { %2078 = vmatpush.msra.mxu1 %v2077_v38  ;;  %2001 = vmatpush.msra.mxu0 %v5364_v32  ;;  %v5619_v38 = vand.u32 4294901760, %v449_v15  ;;  %v2106_v45 = vsub.f32 %v5552_v25, %v7605_v41  ;;  %v5641_v4 = vsub.f32 %v450_v55, %v5599_v36  ;;  %vm226_vm5 = vmor %vm5623_vm1, %vm210_vm0  ;;  %vm180_vm15 = vcmp.eq.s32.totalorder %v5478_v31, %v4331_v14 }
 0x132   :  { %7600 = vst [vmem:[#allocation28_spill] sm:$0xff] %v5597_v9  ;;  %2165 = vmatpush.msra.mxu2 %v5425_v29  ;;  %2218 = vmatpush.msra.mxu3 %v5387_v19  ;;  %v2101_v55 = vand.u32 4294901760, %v2100_v7  ;;  %vm5665_vm7 = vmor %vm226_vm5, %vm248_vm2  ;;  %v7612_v7 = vand.u32 4294901760, %v5597_v9  ;;  %vm218_vm0 = vcmp.eq.s32.totalorder %v5478_v31, %v4348_v30  ;;  %vm294_vm5 = vcmp.eq.s32.totalorder %v5478_v31, %v4447_v0 }
 0x133   :  { %1955 = vmatmul.f32.gmra.mxu2 %v5292_v39  ;;  %7602 = vst [vmem:[#allocation29_spill] sm:$0xff] %v5617_v34  ;;  %2003 = vmatpush.msra.mxu0 %v5374_v47  ;;  %v5660_v6 = vsub.f32 %v449_v15, %v5619_v38  ;;  %v2107_v15 = vand.u32 4294901760, %v2106_v45  ;;  %vm5713_vm12 = vmor %vm5665_vm7, %vm286_vm8  ;;  %vm332_vm8 = vcmp.eq.s32.totalorder %v5478_v31, %v4411_v22 }
 0x134   :  { %2084 = vmatpush.msra.mxu1 %v2083_v35  ;;  %2168 = vmatpush.msra.mxu2 %v5444_v51  ;;  %7606 = vst [vmem:[#allocation26_spill] sm:$0xff] %v5641_v4  ;;  %v558_v29 = vpop.f32.mrf.mxu0  ;;  %v7607_v51 = vld [vmem:[#allocation15_spill] sm:$0xff]  ;;  %v7608_v35 = vand.u32 4294901760, %v5573_v20  ;;  %vm5751_vm1 = vmor %vm5713_vm12, %vm324_vm13 }
 0x135   :  { %2220 = vmatpush.msra.mxu3 %v5397_v26  ;;  %2005 = vmatpush.msra.mxu0 %v5387_v19  ;;  %v664_v41 = vadd.f32 %v663_v44, %v558_v29  ;;  %vm104_vm6 = vcmp.eq.s32.totalorder %v5478_v31, %v7607_v51  ;;  %7609 = vst [vmem:[#allocation30_spill] sm:$0xff] %v5660_v6  ;;  %v722_v29 = vpop.f32.mrf.mxu2  ;;  %v7625_v33 = vand.u32 4294901760, %v5660_v6  ;;  %v473_v31 = vld [vmem:[%s7284_s1 + $0x2c8] sm:$0xff] }
 0x136   :  { %1996 = vmatmul.f32.gmra.mxu3 %v5292_v39  ;;  %2090 = vmatpush.msra.mxu1 %v2089_v21  ;;  %v2112_v39 = vsub.f32 %v5573_v20, %v7608_v35  ;;  %v2118_v35 = vsub.f32 %v5597_v9, %v7612_v7  ;;  %vm5692_vm11 = vmor %vm82_vm9, %vm104_vm6  ;;  %v7616_v7 = vand.u32 4294901760, %v5617_v34 }
 0x137   :  { %2171 = vmatpush.msra.mxu2 %v5467_v42  ;;  %2222 = vmatpush.msra.mxu3 %v5415_v37  ;;  %v723_v21 = vadd.f32 %v722_v29, %v664_v41  ;;  %v5687_v41 = vsub.f32 %v448_v17, %v5643_v27  ;;  %v767_v29 = vpop.f32.mrf.mxu3  ;;  %vm5729_vm14 = vmor %vm5692_vm11, %vm142_vm10 }
 0x138   :  { %2007 = vmatpush.msra.mxu0 %v5397_v26  ;;  %2096 = vmatpush.msra.mxu1 %v2095_v62  ;;  %v479_v62 = vld [vmem:[%s7284_s1 + $0x2f8] sm:$0xff]  ;;  %v2113_v17 = vand.u32 4294901760, %v2112_v39  ;;  %v2124_v44 = vsub.f32 %v5617_v34, %v7616_v7  ;;  %v2119_v28 = vand.u32 4294901760, %v2118_v35  ;;  %vm196_vm2 = vmor %vm5729_vm14, %vm180_vm15 }
 0x139   :  { %2174 = vmatpush.msra.mxu2 %v5487_v43  ;;  %7613 = vst [vmem:[#allocation27_spill] sm:$0xff] %v5687_v41  ;;  %2224 = vmatpush.msra.mxu3 %v5439_v12  ;;  %v5701_v45 = vadd.f32 %v767_v29, %v723_v21  ;;  %v7621_v21 = vand.u32 4294901760, %v5641_v4  ;;  %v5742_v7 = vand.u32 4294901760, %v479_v62  ;;  %vm5775_vm3 = vmor %vm196_vm2, %vm218_vm0 }
 0x13a   :  { %1837 = vmatmul.f32.gmra.mxu0 %v5309_v46  ;;  %2102 = vmatpush.msra.mxu1 %v2101_v55  ;;  %v478_v55 = vld [vmem:[%s7284_s1 + $0x2f0] sm:$0xff]  ;;  %v7628_v46 = vand.u32 4294901760, %v5687_v41  ;;  %vm272_vm6 = vmor %vm5775_vm3, %vm256_vm4 }
 0x13b   :  { %2009 = vmatpush.msra.mxu0 %v5415_v37  ;;  %2177 = vmatpush.msra.mxu2 %v5505_v59  ;;  %v2130_v29 = vsub.f32 %v5641_v4, %v7621_v21  ;;  %7622 = vst [vmem:[#allocation31_spill] sm:$0xff] %v5742_v7  ;;  %v2125_v21 = vand.u32 4294901760, %v2124_v44  ;;  %v877_v59 = vpop.f32.mrf.mxu1  ;;  %v5760_v42 = vand.u32 4294901760, %v478_v55  ;;  %vm5819_vm7 = vmor %vm272_vm6, %vm294_vm5 }
 0x13c   :  { %2226 = vmatpush.msra.mxu3 %v5456_v23  ;;  %2108 = vmatpush.msra.mxu1 %v2107_v15  ;;  %v836_v43 = vpop.f32.mrf.mxu0  ;;  %v2142_v39 = vsub.f32 %v5687_v41, %v7628_v46  ;;  %vm5852_vm11 = vmor %vm5819_vm7, %vm332_vm8 }
 0x13d   :  { %2011 = vmatpush.msra.mxu0 %v5439_v12  ;;  %2180 = vmatpush.msra.mxu2 %v5535_v8  ;;  %v837_v35 = vadd.f32 %v836_v43, %v5404_v5  ;;  %v2136_v8 = vsub.f32 %v5660_v6, %v7625_v33  ;;  %v477_v5 = vld [vmem:[%s7284_s1 + $0x2e8] sm:$0xff]  ;;  %v5786_v33 = vsub.f32 %v479_v62, %v5742_v7  ;;  %v5799_v62 = vsel %vm5751_vm1, 1.0, %v7498_v13 }
 0x13e   :  { %2228 = vmatpush.msra.mxu3 %v5469_v24  ;;  %2114 = vmatpush.msra.mxu1 %v2113_v17  ;;  %v2131_v17 = vand.u32 4294901760, %v2130_v29  ;;  %v5804_v46 = vsub.f32 %v478_v55, %v5760_v42  ;;  %v475_v55 = vld [vmem:[%s7284_s1 + $0x2d8] sm:$0xff]  ;;  %v2143_v43 = vand.u32 4294901760, %v2142_v39  ;;  %v472_v39 = vld [vmem:[%s7284_s1 + $0x2c0] sm:$0xff] }
 0x13f   :  { %2013 = vmatpush.msra.mxu0 %v5456_v23  ;;  %2183 = vmatpush.msra.mxu2 %v5552_v25  ;;  %v878_v44 = vadd.f32 %v877_v59, %v837_v35  ;;  %7629 = vst [vmem:[#allocation32_spill] sm:$0xff] %v5786_v33  ;;  %v922_v25 = vpop.f32.mrf.mxu2  ;;  %v476_v59 = vld [vmem:[%s7284_s1 + $0x2e0] sm:$0xff]  ;;  %v2137_v29 = vand.u32 4294901760, %v2136_v8  ;;  %v5801_v35 = vand.u32 4294901760, %v477_v5  ;;  %v7636_v8 = vand.u32 4294901760, %v5786_v33 }
 0x140   :  { %2230 = vmatpush.msra.mxu3 %v5495_v56  ;;  %2120 = vmatpush.msra.mxu1 %v2119_v28  ;;  %7630 = vst [vmem:[#allocation33_spill] sm:$0xff] %v5804_v46 }
 0x141   :  { %2015 = vmatpush.msra.mxu0 %v5469_v24  ;;  %2186 = vmatpush.msra.mxu2 %v5573_v20  ;;  %v923_v28 = vadd.f32 %v922_v25, %v878_v44  ;;  %v1031_v25 = vpop.f32.mrf.mxu3  ;;  %v5859_v44 = vand.u32 4294901760, %v475_v55 }
 0x142   :  { %2232 = vmatpush.msra.mxu3 %v5515_v3  ;;  %2126 = vmatpush.msra.mxu1 %v2125_v21  ;;  %v5812_v21 = vadd.s32 640, %v7584_v57  ;;  %v5832_v57 = vand.u32 4294901760, %v476_v59 }
 0x143   :  { %2017 = vmatpush.msra.mxu0 %v5495_v56  ;;  %2189 = vmatpush.msra.mxu2 %v5597_v9  ;;  %v5828_v15 = vadd.f32 %v1031_v25, %v923_v28  ;;  %v2033_v9 = vsub.f32 %v5799_v62, %v5799_v62  ;;  %v474_v28 = vld [vmem:[%s7284_s1 + $0x2d0] sm:$0xff]  ;;  %v5857_v25 = vsub.f32 %v477_v5, %v5801_v35 }
 0x144   :  { %2234 = vmatpush.msra.mxu3 %v5537_v58  ;;  %2132 = vmatpush.msra.mxu1 %v2131_v17  ;;  %vm37_vm9 = vcmp.eq.s32.totalorder %v5812_v21, %v7586_v16  ;;  %vm59_vm10 = vcmp.eq.s32.totalorder %v5812_v21, %v7587_v63  ;;  %v2424_v5 = vsub.f32 %v5786_v33, %v7636_v8  ;;  %v881_v17 = vpop.f32.mrf.mxu1  ;;  %v7640_v8 = vand.u32 4294901760, %v5804_v46 }
 0x145   :  { %2019 = vmatpush.msra.mxu0 %v5515_v3  ;;  %2192 = vmatpush.msra.mxu2 %v5617_v34  ;;  %7635 = vst [vmem:[#allocation34_spill] sm:$0xff] %v5857_v25  ;;  %v5872_v20 = vsub.f32 %v476_v59, %v5832_v57  ;;  %vm5882_vm12 = vmor %vm37_vm9, %vm59_vm10  ;;  %v5891_v59 = vsel %vm5852_vm11, 1.0, %v7498_v13  ;;  %v5902_v33 = vand.u32 4294901760, %v473_v31  ;;  %vm97_vm13 = vcmp.eq.s32.totalorder %v5812_v21, %v7592_v54 }
 0x146   :  { %2236 = vmatpush.msra.mxu3 %v5554_v40  ;;  %2138 = vmatpush.msra.mxu1 %v2137_v29  ;;  %v840_v34 = vpop.f32.mrf.mxu0  ;;  %v2430_v63 = vsub.f32 %v5804_v46, %v7640_v8  ;;  %vm135_vm14 = vcmp.eq.s32.totalorder %v5812_v21, %v7597_v52  ;;  %vm5915_vm15 = vmor %vm5882_vm12, %vm97_vm13  ;;  %v2425_v8 = vand.u32 4294901760, %v2424_v5  ;;  %v5931_v54 = vsub.f32 %v5891_v59, %v5891_v59 }
 0x147   :  { %2021 = vmatpush.msra.mxu0 %v5537_v58  ;;  %2195 = vmatpush.msra.mxu2 %v5641_v4  ;;  %v841_v29 = vadd.f32 %v840_v34, %v5701_v45  ;;  %7637 = vst [vmem:[#allocation35_spill] sm:$0xff] %v5872_v20  ;;  %v5874_v4 = vand.u32 4294901760, %v474_v28  ;;  %v2034_v45 = vand.u32 4294901760, %v2033_v9  ;;  %v5933_v5 = vand.u32 4294901760, %v472_v39  ;;  %vm5959_vm1 = vmor %vm5915_vm15, %vm135_vm14 }
 0x148   :  { %2238 = vmatpush.msra.mxu3 %v5575_v11  ;;  %2144 = vmatpush.msra.mxu1 %v2143_v43  ;;  %vm173_vm0 = vcmp.eq.s32.totalorder %v5812_v21, %v7601_v10  ;;  %vm211_vm2 = vcmp.eq.s32.totalorder %v5812_v21, %v4168_v61  ;;  %vm249_vm3 = vcmp.eq.s32.totalorder %v5812_v21, %v4231_v49 }
 0x149   :  { %2023 = vmatpush.msra.mxu0 %v5554_v40  ;;  %2198 = vmatpush.msra.mxu2 %v5660_v6  ;;  %v882_v43 = vadd.f32 %v881_v17, %v841_v29  ;;  %v5900_v6 = vsub.f32 %v475_v55, %v5859_v44  ;;  %v930_v17 = vpop.f32.mrf.mxu2  ;;  %v2035_v34 = vsub.f32 %v2033_v9, %v2034_v45  ;;  %vm5997_vm4 = vmor %vm5959_vm1, %vm173_vm0 }
 0x14a   :  { %2240 = vmatpush.msra.mxu3 %v5599_v36  ;;  %2146 = vmatmul.f32.vlgmr.msra.gmra.mxu1 %v5799_v62  ;;  %v5978_v46 = vsub.f32 %v472_v39, %v5933_v5  ;;  %v468_v39 = vld [vmem:[%s7284_s1 + $0x2a0] sm:$0xff]  ;;  %vm45_vm5 = vcmp.eq.s32.totalorder %v5812_v21, %v4261_v60  ;;  %vm67_vm6 = vcmp.eq.s32.totalorder %v5812_v21, %v4252_v18  ;;  %vm227_vm8 = vmor %vm5997_vm4, %vm211_vm2 }
 0x14b   :  { %2025 = vmatpush.msra.mxu0 %v5575_v11  ;;  %2332 = vmatpush.msrb.mxu1 %v5364_v32  ;;  %v931_v29 = vadd.f32 %v930_v17, %v882_v43  ;;  %v5922_v32 = vsub.f32 %v474_v28, %v5874_v4  ;;  %v471_v43 = vld [vmem:[%s7284_s1 + $0x2b8] sm:$0xff]  ;;  %v1035_v17 = vpop.f32.mrf.mxu3  ;;  %v2431_v28 = vand.u32 4294901760, %v2430_v63  ;;  %vm105_vm7 = vcmp.eq.s32.totalorder %v5812_v21, %v7607_v51  ;;  %vm6046_vm9 = vmor %vm227_vm8, %vm249_vm3  ;;  %v465_v51 = vld [vmem:[%s7284_s1 + $0x288] sm:$0xff] }
 0x14c   :  { %2201 = vmatpush.msra.mxu2 %v5687_v41  ;;  %2242 = vmatpush.msra.mxu3 %v5619_v38  ;;  %v7643_v41 = vand.u32 4294901760, %v5857_v25  ;;  %v5952_v63 = vand.u32 4294901760, %v471_v43  ;;  %vm287_vm10 = vcmp.eq.s32.totalorder %v5812_v21, %v4217_v53  ;;  %vm83_vm11 = vmor %vm45_vm5, %vm67_vm6  ;;  %vm325_vm12 = vcmp.eq.s32.totalorder %v5812_v21, %v4235_v2 }
 0x14d   :  { %2204 = vmatmul.f32.vlgmr.msra.gmra.mxu2 %v2033_v9  ;;  %2334 = vmatpush.msrb.mxu1 %v5374_v47  ;;  %v5935_v16 = vadd.f32 %v1035_v17, %v931_v29  ;;  %v5944_v9 = vsub.f32 %v473_v31, %v5902_v33  ;;  %v469_v29 = vld [vmem:[%s7284_s1 + $0x2a8] sm:$0xff]  ;;  %v2036_v17 = vand.u32 4294901760, %v2035_v34  ;;  %v1133_v34 = vpop.f32.mrf.mxu1  ;;  %vm6075_vm13 = vmor %vm83_vm11, %vm105_vm7  ;;  %vm143_vm14 = vcmp.eq.s32.totalorder %v5812_v21, %v4269_v1 }
 0x14e   :  { %2373 = vmatpush.msrb.mxu2 %v5742_v7  ;;  %2027 = vmatpush.msra.mxu0 %v5599_v36  ;;  %v2436_v47 = vsub.f32 %v5857_v25, %v7643_v41  ;;  %v470_v7 = vld [vmem:[%s7284_s1 + $0x2b0] sm:$0xff]  ;;  %vm6100_vm15 = vmor %vm6046_vm9, %vm287_vm10  ;;  %vm181_vm0 = vcmp.eq.s32.totalorder %v5812_v21, %v4331_v14  ;;  %vm219_vm3 = vcmp.eq.s32.totalorder %v5812_v21, %v4348_v30 }
 0x14f   :  { %2244 = vmatpush.msra.mxu3 %v5643_v27  ;;  %2336 = vmatpush.msrb.mxu1 %v5387_v19  ;;  %v7646_v19 = vand.u32 4294901760, %v5872_v20  ;;  %vm6125_vm1 = vmor %vm6075_vm13, %vm143_vm14  ;;  %vm257_vm5 = vcmp.eq.s32.totalorder %v5812_v21, %v4316_v48  ;;  %vm295_vm7 = vcmp.eq.s32.totalorder %v5812_v21, %v4447_v0  ;;  %vm333_vm10 = vcmp.eq.s32.totalorder %v5812_v21, %v4411_v22 }
 0x150   :  { %2248 = vmatmul.f32.vlgmr.msra.gmra.mxu3 %v2034_v45  ;;  %2375 = vmatpush.msrb.mxu2 %v5760_v42  ;;  %v1089_v55 = vpop.f32.mrf.mxu0  ;;  %v2042_v45 = vand.u32 4294901760, %v5931_v54  ;;  %vm6139_vm2 = vmor %vm6100_vm15, %vm325_vm12 }
 0x151   :  { %2426 = vmatpush.msrb.mxu3 %v2425_v8  ;;  %v2442_v31 = vsub.f32 %v5872_v20, %v7646_v19  ;;  %2029 = vmatpush.msra.mxu0 %v5619_v38  ;;  %v5980_v8 = vand.u32 4294901760, %v470_v7  ;;  %v1090_v52 = vadd.f32 %v1089_v55, %v5828_v15  ;;  %v2437_v19 = vand.u32 4294901760, %v2436_v47  ;;  %v1208_v10 = vpop.f32.mrf.mxu2  ;;  %vm197_vm4 = vmor %vm6125_vm1, %vm181_vm0 }
 0x152   :  { %2338 = vmatpush.msrb.mxu1 %v5397_v26  ;;  %2377 = vmatpush.msrb.mxu2 %v5801_v35  ;;  %v7647_v20 = vand.u32 4294901760, %v5900_v6  ;;  %v7650_v55 = vand.u32 4294901760, %v5922_v32  ;;  %vm6177_vm6 = vmor %vm197_vm4, %vm219_vm3 }
 0x153   :  { %2432 = vmatpush.msrb.mxu3 %v2431_v28  ;;  %2031 = vmatpush.msra.mxu0 %v5643_v27  ;;  %v6006_v28 = vand.u32 4294901760, %v469_v29  ;;  %v1134_v47 = vadd.f32 %v1133_v34, %v1090_v52  ;;  %v2443_v41 = vand.u32 4294901760, %v2442_v31  ;;  %v7651_v52 = vand.u32 4294901760, %v5385_v50  ;;  %vm273_vm8 = vmor %vm6177_vm6, %vm257_vm5 }
 0x154   :  { %v2448_v25 = vsub.f32 %v5900_v6, %v7647_v20  ;;  %2150 = vmatmul.f32.gmra.mxu1 %v5891_v59  ;;  %v6004_v20 = vsub.f32 %v471_v43, %v5952_v63  ;;  %2037 = vmatmul.f32.vlgmr.msra.gmra.mxu0 %v2036_v17  ;;  %v2454_v26 = vsub.f32 %v5922_v32, %v7650_v55  ;;  %v467_v43 = vld [vmem:[%s7284_s1 + $0x298] sm:$0xff]  ;;  %v6028_v17 = vand.u32 4294901760, %v468_v39  ;;  %vm311_vm9 = vmor %vm273_vm8, %vm295_vm7 }
 0x155   :  { %2340 = vmatpush.msrb.mxu1 %v5415_v37  ;;  %2261 = vmatpush.msrb.mxu0 %v7651_v52  ;;  %v6026_v31 = vsub.f32 %v470_v7, %v5980_v8  ;;  %v1209_v34 = vadd.f32 %v1208_v10, %v1134_v47  ;;  %v2043_v55 = vsub.f32 %v5931_v54, %v2042_v45  ;;  %v7652_v52 = vand.u32 4294901760, %v5944_v9  ;;  %v1249_v37 = vpop.f32.mrf.mxu3  ;;  %v466_v10 = vld [vmem:[%s7284_s1 + $0x290] sm:$0xff]  ;;  %vm349_vm11 = vmor %vm311_vm9, %vm333_vm10 }
 0x156   :  { %2379 = vmatpush.msrb.mxu2 %v5832_v57  ;;  %2438 = vmatpush.msrb.mxu3 %v2437_v19  ;;  %v2449_v50 = vand.u32 4294901760, %v2448_v25  ;;  %v6057_v47 = vsub.f32 %v469_v29, %v6006_v28  ;;  %v6090_v19 = vand.u32 4294901760, %v466_v10 }
 0x157   :  { %2209 = vmatmul.f32.gmra.mxu2 %v5931_v54  ;;  %v2460_v7 = vsub.f32 %v5944_v9, %v7652_v52  ;;  %v7655_v54 = vld [vmem:[#allocation16_spill] sm:$0xff]  ;;  %2342 = vmatpush.msrb.mxu1 %v5439_v12  ;;  %v6059_v52 = vand.u32 4294901760, %v467_v43  ;;  %v6061_v49 = vadd.f32 %v1249_v37, %v1209_v34  ;;  %v2455_v12 = vand.u32 4294901760, %v2454_v26  ;;  %v7659_v37 = vld [vmem:[#allocation17_spill] sm:$0xff] }
 0x158   :  { %v7656_v25 = vand.u32 4294901760, %v7655_v54  ;;  %2381 = vmatpush.msrb.mxu2 %v5859_v44  ;;  %2444 = vmatpush.msrb.mxu3 %v2443_v41  ;;  %v7660_v34 = vand.u32 4294901760, %v7659_v37  ;;  %v7661_v41 = vand.u32 4294901760, %v5978_v46  ;;  %v7664_v37 = vld [vmem:[#allocation18_spill] sm:$0xff]  ;;  %v7666_v54 = vand.u32 4294901760, %v6004_v20 }
 0x159   :  { %2254 = vmatmul.f32.gmra.mxu3 %v2042_v45  ;;  %2344 = vmatpush.msrb.mxu1 %v5456_v23  ;;  %v6115_v18 = vsub.f32 %v467_v43, %v6059_v52  ;;  %v464_v23 = vld [vmem:[%s7284_s1 + $0x280] sm:$0xff]  ;;  %v6131_v43 = vand.u32 4294901760, %v465_v51  ;;  %v7671_v29 = vand.u32 4294901760, %v6026_v31  ;;  %v7672_v45 = vld [vmem:[#allocation21_spill] sm:$0xff] }
 0x15a   :  { %2265 = vmatpush.msrb.mxu0 %v7656_v25  ;;  %v2466_v26 = vsub.f32 %v5978_v46, %v7661_v41  ;;  %v6088_v25 = vsub.f32 %v468_v39, %v6028_v17  ;;  %2383 = vmatpush.msrb.mxu2 %v5874_v4  ;;  %v2044_v39 = vand.u32 4294901760, %v2043_v55  ;;  %v2461_v41 = vand.u32 4294901760, %v2460_v7  ;;  %v1094_v55 = vpop.f32.mrf.mxu0 }
 0x15b   :  { %2450 = vmatpush.msrb.mxu3 %v2449_v50  ;;  %v2472_v15 = vsub.f32 %v6004_v20, %v7666_v54  ;;  %2346 = vmatpush.msrb.mxu1 %v5469_v24  ;;  %v1095_v7 = vadd.f32 %v1094_v55, %v5935_v16  ;;  %v1139_v16 = vpop.f32.mrf.mxu1  ;;  %v6150_v55 = vsub.f32 %v466_v10, %v6090_v19  ;;  %v7673_v53 = vand.u32 4294901760, %v7672_v45 }
 0x15c   :  { %2269 = vmatpush.msrb.mxu0 %v7660_v34  ;;  %v7665_v34 = vand.u32 4294901760, %v7664_v37  ;;  %2385 = vmatpush.msrb.mxu2 %v5902_v33  ;;  %v2467_v24 = vand.u32 4294901760, %v2466_v26  ;;  %v2478_v37 = vsub.f32 %v6026_v31, %v7671_v29  ;;  %v6155_v2 = vand.u32 4294901760, %v464_v23 }
 0x15d   :  { %2456 = vmatpush.msrb.mxu3 %v2455_v12  ;;  %2045 = vmatmul.f32.gmra.mxu0 %v2044_v39  ;;  %v1140_v12 = vadd.f32 %v1139_v16, %v1095_v7  ;;  %v2473_v10 = vand.u32 4294901760, %v2472_v15  ;;  %v2495_v26 = vand.u32 4294901760, %v6115_v18  ;;  %v1212_v39 = vpop.f32.mrf.mxu2  ;;  %v6172_v7 = vsel %vm6139_vm2, 1.0, %v7498_v13 }
 0x15e   :  { %2273 = vmatpush.msrb.mxu0 %v7665_v34  ;;  %v2489_v34 = vand.u32 4294901760, %v6088_v25  ;;  %2348 = vmatpush.msrb.mxu1 %v5495_v56  ;;  %v6185_v29 = vsub.f32 %v465_v51, %v6131_v43  ;;  %v2479_v54 = vand.u32 4294901760, %v2478_v37  ;;  %v6199_v51 = vsub.f32 %v6172_v7, %v6172_v7 }
 0x15f   :  { %2387 = vmatpush.msrb.mxu2 %v5933_v5  ;;  %2462 = vmatpush.msrb.mxu3 %v2461_v41  ;;  %v7677_v41 = vld [vmem:[#allocation19_spill] sm:$0xff]  ;;  %v1213_v16 = vadd.f32 %v1212_v39, %v1140_v12  ;;  %v6202_v12 = vsub.f32 %v464_v23, %v6155_v2  ;;  %v7681_v23 = vld [vmem:[#allocation22_spill] sm:$0xff] }
 0x160   :  { %2277 = vmatpush.msrb.mxu0 %v7673_v53  ;;  %v7674_v53 = vand.u32 4294901760, %v6057_v47  ;;  %v7678_v15 = vand.u32 4294901760, %v7677_v41  ;;  %2350 = vmatpush.msrb.mxu1 %v5515_v3  ;;  %v2490_v45 = vsub.f32 %v6088_v25, %v2489_v34  ;;  %v1253_v41 = vpop.f32.mrf.mxu3  ;;  %v7682_v39 = vand.u32 4294901760, %v7681_v23 }
 0x161   :  { %2389 = vmatpush.msrb.mxu2 %v5952_v63  ;;  %2468 = vmatpush.msrb.mxu3 %v2467_v24  ;;  %v1254_v24 = vadd.f32 %v1253_v41, %v1213_v16  ;;  %v2507_v50 = vand.u32 4294901760, %v6185_v29  ;;  %v7683_v16 = vld [vmem:[#allocation23_spill] sm:$0xff]  ;;  %v2406_v21 = vand.u32 4294901760, %v6199_v51 }
 0x162   :  { %v2484_v56 = vsub.f32 %v6057_v47, %v7674_v53  ;;  %2281 = vmatpush.msrb.mxu0 %v7678_v15  ;;  %v2501_v53 = vand.u32 4294901760, %v6150_v55  ;;  %v7679_v15 = vld [vmem:[#allocation20_spill] sm:$0xff]  ;;  %2352 = vmatpush.msrb.mxu1 %v5537_v58  ;;  %v2496_v58 = vsub.f32 %v6115_v18, %v2495_v26  ;;  %v7684_v41 = vand.u32 4294901760, %v7683_v16 }
 0x163   :  { %v7680_v3 = vand.u32 4294901760, %v7679_v15  ;;  %2391 = vmatpush.msrb.mxu2 %v5980_v8  ;;  %2474 = vmatpush.msrb.mxu3 %v2473_v10  ;;  %v2491_v10 = vand.u32 4294901760, %v2490_v45  ;;  %v2513_v15 = vand.u32 4294901760, %v6202_v12 }
 0x164   :  { %v2485_v37 = vand.u32 4294901760, %v2484_v56  ;;  %2354 = vmatpush.msrb.mxu1 %v5554_v40  ;;  %v2502_v56 = vsub.f32 %v6150_v55, %v2501_v53 }
 0x165   :  { %2285 = vmatpush.msrb.mxu0 %v7680_v3  ;;  %2393 = vmatpush.msrb.mxu2 %v6006_v28  ;;  %v7685_v3 = vld [vmem:[#allocation24_spill] sm:$0xff] }
 0x166   :  { %2480 = vmatpush.msrb.mxu3 %v2479_v54  ;;  %2356 = vmatpush.msrb.mxu1 %v5575_v11  ;;  %v2497_v54 = vand.u32 4294901760, %v2496_v58  ;;  %v7686_v23 = vand.u32 4294901760, %v7685_v3  ;;  %v2508_v11 = vsub.f32 %v6185_v29, %v2507_v50  ;;  %v2503_v16 = vand.u32 4294901760, %v2502_v56  ;;  %v7687_v58 = vld [vmem:[#allocation25_spill] sm:$0xff]  ;;  %v1461_v3 = vpop.f32.mrf.mxu2  ;;  %v7689_v56 = vld [vmem:[#allocation28_spill] sm:$0xff] }
 0x167   :  { %2289 = vmatpush.msrb.mxu0 %v7682_v39  ;;  %v1294_v40 = vpop.f32.mrf.mxu0  ;;  %2395 = vmatpush.msrb.mxu2 %v6028_v17  ;;  %v1403_v39 = vpop.f32.mrf.mxu1 }
 0x168   :  { %2486 = vmatpush.msrb.mxu3 %v2485_v37  ;;  %v1295_v45 = vadd.f32 %v1294_v40, %v6061_v49  ;;  %2358 = vmatpush.msrb.mxu1 %v5599_v36  ;;  %v6241_v37 = vsel %vm349_vm11, 1.0, %v7498_v13  ;;  %v7688_v49 = vand.u32 4294901760, %v7687_v58  ;;  %v2407_v36 = vsub.f32 %v6199_v51, %v2406_v21 }
 0x169   :  { %2293 = vmatpush.msrb.mxu0 %v7684_v41  ;;  %2397 = vmatpush.msrb.mxu2 %v6059_v52  ;;  %v2514_v40 = vsub.f32 %v6202_v12, %v2513_v15 }
 0x16a   :  { %2492 = vmatpush.msrb.mxu3 %v2491_v10  ;;  %v1404_v41 = vadd.f32 %v1403_v39, %v1295_v45  ;;  %2360 = vmatpush.msrb.mxu1 %v5619_v38  ;;  %v7690_v45 = vand.u32 4294901760, %v7689_v56  ;;  %v6258_v38 = vsub.f32 %v6241_v37, %v6241_v37  ;;  %v1505_v39 = vpop.f32.mrf.mxu3  ;;  %v7694_v56 = vld [vmem:[#allocation31_spill] sm:$0xff] }
 0x16b   :  { %2297 = vmatpush.msrb.mxu0 %v7686_v23  ;;  %2399 = vmatpush.msrb.mxu2 %v6090_v19  ;;  %v2509_v23 = vand.u32 4294901760, %v2508_v11 }
 0x16c   :  { %2498 = vmatpush.msrb.mxu3 %v2497_v54  ;;  %v1462_v10 = vadd.f32 %v1461_v3, %v1404_v41  ;;  %2362 = vmatpush.msrb.mxu1 %v5643_v27  ;;  %v7692_v54 = vld [vmem:[#allocation29_spill] sm:$0xff]  ;;  %v2515_v3 = vand.u32 4294901760, %v2514_v40  ;;  %v2414_v27 = vand.u32 4294901760, %v6258_v38 }
 0x16d   :  { %2301 = vmatpush.msrb.mxu0 %v7688_v49  ;;  %2401 = vmatpush.msrb.mxu2 %v6131_v43  ;;  %v7693_v41 = vand.u32 4294901760, %v7692_v54  ;;  %v2408_v49 = vand.u32 4294901760, %v2407_v36 }
 0x16e   :  { %2504 = vmatpush.msrb.mxu3 %v2503_v16  ;;  %v6261_v58 = vadd.f32 %v1505_v39, %v1462_v10  ;;  %2364 = vmatmul.f32.vlgmr.msrb.gmra.mxu1 %v5799_v62  ;;  %v7695_v16 = vld [vmem:[#allocation32_spill] sm:$0xff]  ;;  %v7697_v39 = vld [vmem:[#allocation26_spill] sm:$0xff] }
 0x16f   :  { %2305 = vmatpush.msrb.mxu0 %v7690_v45  ;;  %2586 = vmatpush.msra.mxu1 %v7694_v56  ;;  %v7696_v10 = vand.u32 4294901760, %v7695_v16  ;;  %v7698_v54 = vand.u32 4294901760, %v7697_v39  ;;  %v1407_v36 = vpop.f32.mrf.mxu1  ;;  %v7703_v39 = vld [vmem:[#allocation34_spill] sm:$0xff] }
 0x170   :  { %7691 = vst [vmem:[#allocation16_spill] sm:$0xff] %v6261_v58  ;;  %2403 = vmatpush.msrb.mxu2 %v6155_v2  ;;  %2510 = vmatpush.msrb.mxu3 %v2509_v23  ;;  %v1302_v11 = vpop.f32.mrf.mxu0  ;;  %v7699_v23 = vld [vmem:[#allocation33_spill] sm:$0xff] }
 0x171   :  { %2309 = vmatpush.msrb.mxu0 %v7693_v41  ;;  %2409 = vmatmul.f32.vlgmr.msrb.gmra.mxu2 %v2408_v49  ;;  %v1303_v45 = vadd.f32 %v1302_v11, %v1254_v24  ;;  %v7700_v41 = vand.u32 4294901760, %v7699_v23  ;;  %v2415_v49 = vsub.f32 %v6258_v38, %v2414_v27  ;;  %v1466_v24 = vpop.f32.mrf.mxu2  ;;  %v7701_v11 = vld [vmem:[#allocation30_spill] sm:$0xff] }
 0x172   :  { %2588 = vmatpush.msra.mxu1 %v5760_v42  ;;  %2633 = vmatpush.msra.mxu2 %v7696_v10  ;;  %v7702_v10 = vand.u32 4294901760, %v7701_v11 }
 0x173   :  { %2313 = vmatpush.msrb.mxu0 %v7698_v54  ;;  %2516 = vmatpush.msrb.mxu3 %v2515_v3  ;;  %v1408_v40 = vadd.f32 %v1407_v36, %v1303_v45  ;;  %v7704_v54 = vand.u32 4294901760, %v7703_v39  ;;  %v1511_v45 = vpop.f32.mrf.mxu3  ;;  %v7705_v36 = vld [vmem:[#allocation27_spill] sm:$0xff]  ;;  %v2416_v11 = vand.u32 4294901760, %v2415_v49  ;;  %v493_v49 = vld [vmem:[%s7284_s1 + $0x368] sm:$0xff] }
 0x174   :  { %2518 = vmatmul.f32.vlgmr.msrb.gmra.mxu3 %v6172_v7  ;;  %2590 = vmatpush.msra.mxu1 %v5801_v35 }
 0x175   :  { %2637 = vmatpush.msra.mxu2 %v7700_v41  ;;  %2704 = vmatpush.msra.mxu3 %v7694_v56  ;;  %v1467_v3 = vadd.f32 %v1466_v24, %v1408_v40  ;;  %v7706_v41 = vand.u32 4294901760, %v7705_v36  ;;  %v7708_v40 = vld [vmem:[#allocation35_spill] sm:$0xff] }
 0x176   :  { %2317 = vmatpush.msrb.mxu0 %v7702_v10  ;;  %2592 = vmatpush.msra.mxu1 %v5832_v57  ;;  %v7709_v24 = vand.u32 4294901760, %v7708_v40 }
 0x177   :  { %2641 = vmatpush.msra.mxu2 %v7704_v54  ;;  %2706 = vmatpush.msra.mxu3 %v5760_v42  ;;  %v6291_v56 = vadd.f32 %v1511_v45, %v1467_v3  ;;  %v7710_v42 = vand.u32 4294901760, %v5900_v6  ;;  %v7713_v3 = vand.u32 4294901760, %v5978_v46 }
 0x178   :  { %2321 = vmatpush.msrb.mxu0 %v7706_v41  ;;  %2368 = vmatmul.f32.gmra.mxu1 %v5891_v59  ;;  %v7716_v41 = vand.u32 4294901760, %v6057_v47 }
 0x179   :  { %7707 = vst [vmem:[#allocation17_spill] sm:$0xff] %v6291_v56  ;;  %2323 = vmatmul.f32.vlgmr.msrb.gmra.mxu0 %v5799_v62  ;;  %2594 = vmatpush.msra.mxu1 %v5859_v44  ;;  %v495_v62 = vld [vmem:[%s7284_s1 + $0x378] sm:$0xff] }
 0x17a   :  { %2528 = vmatpush.msra.mxu0 %v7695_v16  ;;  %2645 = vmatpush.msra.mxu2 %v7709_v24  ;;  %v494_v16 = vld [vmem:[%s7284_s1 + $0x370] sm:$0xff] }
 0x17b   :  { %2708 = vmatpush.msra.mxu3 %v5801_v35  ;;  %2417 = vmatmul.f32.gmra.mxu2 %v2416_v11  ;;  %v7711_v35 = vand.u32 4294901760, %v5922_v32  ;;  %v6327_v10 = vand.u32 4294901760, %v494_v16 }
 0x17c   :  { %2531 = vmatpush.msra.mxu0 %v7699_v23  ;;  %2596 = vmatpush.msra.mxu1 %v5874_v4  ;;  %v7712_v23 = vand.u32 4294901760, %v5944_v9 }
 0x17d   :  { %2649 = vmatpush.msra.mxu2 %v7710_v42  ;;  %2710 = vmatpush.msra.mxu3 %v5832_v57  ;;  %v6317_v57 = vand.u32 4294901760, %v495_v62 }
 0x17e   :  { %2522 = vmatmul.f32.gmra.mxu3 %v6241_v37  ;;  %2534 = vmatpush.msra.mxu0 %v7703_v39 }
 0x17f   :  { %2598 = vmatpush.msra.mxu1 %v5902_v33  ;;  %2653 = vmatpush.msra.mxu2 %v7711_v35  ;;  %v6338_v39 = vsub.f32 %v495_v62, %v6317_v57 }
 0x180   :  { %2712 = vmatpush.msra.mxu3 %v5859_v44  ;;  %2537 = vmatpush.msra.mxu0 %v7708_v40  ;;  %v492_v44 = vld [vmem:[%s7284_s1 + $0x360] sm:$0xff] }
 0x181   :  { %2600 = vmatpush.msra.mxu1 %v5933_v5  ;;  %2657 = vmatpush.msra.mxu2 %v7712_v23  ;;  %v6350_v54 = vand.u32 4294901760, %v492_v44 }
 0x182   :  { %2714 = vmatpush.msra.mxu3 %v5874_v4  ;;  %2327 = vmatmul.f32.gmra.mxu0 %v5891_v59  ;;  %v6340_v4 = vand.u32 4294901760, %v493_v49  ;;  %v6348_v59 = vsub.f32 %v494_v16, %v6327_v10 }
 0x183   :  { %2540 = vmatpush.msra.mxu0 %v5900_v6  ;;  %2602 = vmatpush.msra.mxu1 %v5952_v63  ;;  %v7714_v6 = vand.u32 4294901760, %v6004_v20  ;;  %v6376_v11 = vsub.f32 %v492_v44, %v6350_v54 }
 0x184   :  { %2661 = vmatpush.msra.mxu2 %v7713_v3  ;;  %2716 = vmatpush.msra.mxu3 %v5902_v33  ;;  %v491_v33 = vld [vmem:[%s7284_s1 + $0x358] sm:$0xff]  ;;  %v6362_v45 = vsub.f32 %v493_v49, %v6340_v4 }
 0x185   :  { %2543 = vmatpush.msra.mxu0 %v5922_v32  ;;  %2604 = vmatpush.msra.mxu1 %v5980_v8  ;;  %v7715_v32 = vand.u32 4294901760, %v6026_v31  ;;  %v6366_v36 = vand.u32 4294901760, %v491_v33 }
 0x186   :  { %2665 = vmatpush.msra.mxu2 %v7714_v6  ;;  %2718 = vmatpush.msra.mxu3 %v5933_v5  ;;  %v7407_v5 = vand.u32 4294901760, %v6338_v39  ;;  %v7403_v40 = vand.u32 4294901760, %v6362_v45 }
 0x187   :  { %2546 = vmatpush.msra.mxu0 %v5944_v9  ;;  %2606 = vmatpush.msra.mxu1 %v6006_v28  ;;  %v490_v9 = vld [vmem:[%s7284_s1 + $0x350] sm:$0xff] }
 0x188   :  { %2669 = vmatpush.msra.mxu2 %v7715_v32  ;;  %2720 = vmatpush.msra.mxu3 %v5952_v63  ;;  %v7405_v63 = vand.u32 4294901760, %v6348_v59  ;;  %v6390_v24 = vand.u32 4294901760, %v490_v9  ;;  %v7722_v32 = vld [vmem:[#allocation9_spill] sm:$0xff] }
 0x189   :  { %2549 = vmatpush.msra.mxu0 %v5978_v46  ;;  %2608 = vmatpush.msra.mxu1 %v6028_v17  ;;  %v489_v46 = vld [vmem:[%s7284_s1 + $0x348] sm:$0xff] }
 0x18a   :  { %2673 = vmatpush.msra.mxu2 %v7716_v41  ;;  %2722 = vmatpush.msra.mxu3 %v5980_v8  ;;  %v2796_v8 = vsub.f32 %v6338_v39, %v7407_v5  ;;  %v6407_v42 = vand.u32 4294901760, %v489_v46  ;;  %v6418_v62 = vsub.f32 %v490_v9, %v6390_v24  ;;  %v484_v41 = vld [vmem:[%s7284_s1 + $0x320] sm:$0xff] }
 0x18b   :  { %2552 = vmatpush.msra.mxu0 %v6004_v20  ;;  %2610 = vmatpush.msra.mxu1 %v6059_v52  ;;  %v6395_v20 = vsub.f32 %v491_v33, %v6366_v36 }
 0x18c   :  { %2677 = vmatpush.msra.mxu2 %v2489_v34  ;;  %2724 = vmatpush.msra.mxu3 %v6006_v28  ;;  %v488_v34 = vld [vmem:[%s7284_s1 + $0x340] sm:$0xff]  ;;  %v2802_v28 = vsub.f32 %v6348_v59, %v7405_v63  ;;  %7717 = vst [vmem:[#allocation18_spill] sm:$0xff] %v6418_v62  ;;  %v6435_v23 = vsub.f32 %v489_v46, %v6407_v42  ;;  %v7398_v3 = vand.u32 4294901760, %v6418_v62 }
 0x18d   :  { %2555 = vmatpush.msra.mxu0 %v6026_v31  ;;  %2612 = vmatpush.msra.mxu1 %v6090_v19  ;;  %v7401_v31 = vand.u32 4294901760, %v6376_v11  ;;  %v6420_v35 = vand.u32 4294901760, %v488_v34 }
 0x18e   :  { %2681 = vmatpush.msra.mxu2 %v2495_v26  ;;  %2726 = vmatpush.msra.mxu3 %v6028_v17  ;;  %v2797_v26 = vand.u32 4294901760, %v2796_v8  ;;  %v2808_v17 = vsub.f32 %v6362_v45, %v7403_v40  ;;  %7718 = vst [vmem:[#allocation21_spill] sm:$0xff] %v6435_v23 }
 0x18f   :  { %2558 = vmatpush.msra.mxu0 %v6057_v47  ;;  %2614 = vmatpush.msra.mxu1 %v6131_v43  ;;  %v487_v47 = vld [vmem:[%s7284_s1 + $0x338] sm:$0xff]  ;;  %v2814_v16 = vsub.f32 %v6376_v11, %v7401_v31  ;;  %v6452_v6 = vsub.f32 %v488_v34, %v6420_v35  ;;  %v2826_v34 = vsub.f32 %v6418_v62, %v7398_v3  ;;  %v7735_v31 = vld [vmem:[#allocation5_spill] sm:$0xff] }
 0x190   :  { %2685 = vmatpush.msra.mxu2 %v2501_v53  ;;  %2728 = vmatpush.msra.mxu3 %v6059_v52  ;;  %v7400_v52 = vand.u32 4294901760, %v6395_v20  ;;  %v2803_v53 = vand.u32 4294901760, %v2802_v28  ;;  %v2809_v44 = vand.u32 4294901760, %v2808_v17  ;;  %v6503_v17 = vand.u32 4294901760, %v484_v41 }
 0x191   :  { %2561 = vmatpush.msra.mxu0 %v6088_v25  ;;  %2616 = vmatpush.msra.mxu1 %v6155_v2  ;;  %v486_v25 = vld [vmem:[%s7284_s1 + $0x330] sm:$0xff]  ;;  %7720 = vst [vmem:[#allocation19_spill] sm:$0xff] %v6452_v6  ;;  %v2815_v9 = vand.u32 4294901760, %v2814_v16  ;;  %v7399_v28 = vand.u32 4294901760, %v6452_v6  ;;  %v7726_v16 = vld [vmem:[#allocation6_spill] sm:$0xff] }
 0x192   :  { %2689 = vmatpush.msra.mxu2 %v2507_v50  ;;  %2730 = vmatpush.msra.mxu3 %v6090_v19  ;;  %v6443_v50 = vand.u32 4294901760, %v487_v47  ;;  %v7719_v19 = vld [vmem:[#allocation11_spill] sm:$0xff]  ;;  %v6462_v33 = vand.u32 4294901760, %v486_v25  ;;  %v6540_v3 = vsub.f32 %v484_v41, %v6503_v17 }
 0x193   :  { %2620 = vmatmul.f32.vlgmr.msra.gmra.mxu1 %v2406_v21  ;;  %2564 = vmatpush.msra.mxu0 %v6115_v18  ;;  %v6446_v49 = vadd.s32 768, %v7719_v19  ;;  %v485_v21 = vld [vmem:[%s7284_s1 + $0x328] sm:$0xff]  ;;  %v2820_v18 = vsub.f32 %v6395_v20, %v7400_v52 }
 0x194   :  { %2798 = vmatpush.msrb.mxu1 %v2797_v26  ;;  %2693 = vmatpush.msra.mxu2 %v2513_v15  ;;  %v7721_v15 = vld [vmem:[#allocation7_spill] sm:$0xff]  ;;  %v6476_v46 = vsub.f32 %v487_v47, %v6443_v50  ;;  %v6478_v8 = vand.u32 4294901760, %v485_v21  ;;  %v6501_v26 = vsub.f32 %v486_v25, %v6462_v33  ;;  %7730 = vst [vmem:[#allocation23_spill] sm:$0xff] %v6540_v3 }
 0x195   :  { %2732 = vmatpush.msra.mxu3 %v6131_v43  ;;  %2695 = vmatmul.f32.vlgmr.msra.gmra.mxu2 %v6172_v7  ;;  %vm38_vm12 = vcmp.eq.s32.totalorder %v6446_v49, %v7721_v15  ;;  %vm60_vm13 = vcmp.eq.s32.totalorder %v6446_v49, %v7722_v32  ;;  %v7397_v43 = vand.u32 4294901760, %v6435_v23  ;;  %vm98_vm15 = vcmp.eq.s32.totalorder %v6446_v49, %v7726_v16 }
 0x196   :  { %2804 = vmatpush.msrb.mxu1 %v2803_v53  ;;  %2900 = vmatpush.msrb.mxu2 %v6338_v39  ;;  %vm6494_vm14 = vmor %vm38_vm12, %vm60_vm13  ;;  %7725 = vst [vmem:[#allocation20_spill] sm:$0xff] %v6501_v26  ;;  %v482_v53 = vld [vmem:[%s7284_s1 + $0x310] sm:$0xff]  ;;  %v7402_v25 = vand.u32 4294901760, %v6476_v46  ;;  %vm174_vm3 = vcmp.eq.s32.totalorder %v6446_v49, %v7735_v31  ;;  %vm212_vm4 = vcmp.eq.s32.totalorder %v6446_v49, %v4168_v61 }
 0x197   :  { %2567 = vmatpush.msra.mxu0 %v6150_v55  ;;  %2734 = vmatpush.msra.mxu3 %v6155_v2  ;;  %v483_v55 = vld [vmem:[%s7284_s1 + $0x318] sm:$0xff]  ;;  %v2832_v47 = vsub.f32 %v6435_v23, %v7397_v43  ;;  %vm6524_vm0 = vmor %vm6494_vm14, %vm98_vm15  ;;  %v2838_v43 = vsub.f32 %v6452_v6, %v7399_v28  ;;  %v7404_v2 = vand.u32 4294901760, %v6501_v26  ;;  %vm46_vm7 = vcmp.eq.s32.totalorder %v6446_v49, %v4261_v60 }
 0x198   :  { %2736 = vmatmul.f32.vlgmr.msra.gmra.mxu3 %v6172_v7  ;;  %2810 = vmatpush.msrb.mxu1 %v2809_v44  ;;  %v2821_v7 = vand.u32 4294901760, %v2820_v18  ;;  %v6520_v44 = vand.u32 4294901760, %v483_v55  ;;  %v2844_v41 = vsub.f32 %v6476_v46, %v7402_v25  ;;  %v7408_v25 = vand.u32 4294901760, %v6540_v3 }
 0x199   :  { %2903 = vmatpush.msrb.mxu2 %v6348_v59  ;;  %2958 = vmatpush.msrb.mxu3 %v6317_v57  ;;  %v2839_v18 = vand.u32 4294901760, %v2838_v43  ;;  %vm144_vm15 = vcmp.eq.s32.totalorder %v6446_v49, %v4269_v1 }
 0x19a   :  { %2570 = vmatpush.msra.mxu0 %v6185_v29  ;;  %2816 = vmatpush.msrb.mxu1 %v2815_v9  ;;  %v6518_v29 = vsub.f32 %v485_v21, %v6478_v8  ;;  %v2827_v9 = vand.u32 4294901760, %v2826_v34  ;;  %v481_v21 = vld [vmem:[%s7284_s1 + $0x308] sm:$0xff]  ;;  %v2833_v34 = vand.u32 4294901760, %v2832_v47  ;;  %v6564_v28 = vsub.f32 %v483_v55, %v6520_v44 }
 0x19b   :  { %2906 = vmatpush.msrb.mxu2 %v6362_v45  ;;  %2960 = vmatpush.msrb.mxu3 %v6327_v10  ;;  %v6566_v52 = vand.u32 4294901760, %v481_v21  ;;  %v2850_v55 = vsub.f32 %v6501_v26, %v7404_v2  ;;  %v7738_v2 = vld [vmem:[#allocation14_spill] sm:$0xff] }
 0x19c   :  { %7727 = vst [vmem:[#allocation22_spill] sm:$0xff] %v6518_v29  ;;  %2573 = vmatpush.msra.mxu0 %v6202_v12  ;;  %2626 = vmatmul.f32.gmra.mxu1 %v2414_v27  ;;  %v6542_v12 = vand.u32 4294901760, %v482_v53  ;;  %v7731_v27 = vld [vmem:[#allocation8_spill] sm:$0xff]  ;;  %v7406_v47 = vand.u32 4294901760, %v6518_v29  ;;  %vm68_vm8 = vcmp.eq.s32.totalorder %v6446_v49, %v7738_v2 }
 0x19d   :  { %2576 = vmatmul.f32.vlgmr.msra.gmra.mxu0 %v6199_v51  ;;  %2822 = vmatpush.msrb.mxu1 %v2821_v7  ;;  %vm136_vm1 = vcmp.eq.s32.totalorder %v6446_v49, %v7731_v27  ;;  %v480_v51 = vld [vmem:[%s7284_s1 + $0x300] sm:$0xff]  ;;  %7734 = vst [vmem:[#allocation24_spill] sm:$0xff] %v6564_v28  ;;  %v6600_v63 = vsub.f32 %v481_v21, %v6566_v52  ;;  %vm84_vm13 = vmor %vm46_vm7, %vm68_vm8 }
 0x19e   :  { %2745 = vmatpush.msrb.mxu0 %v6317_v57  ;;  %2909 = vmatpush.msrb.mxu2 %v6376_v11  ;;  %vm6553_vm2 = vmor %vm6524_vm0, %vm136_vm1  ;;  %v6580_v40 = vsub.f32 %v482_v53, %v6542_v12  ;;  %v6582_v43 = vand.u32 4294901760, %v480_v51  ;;  %v2845_v53 = vand.u32 4294901760, %v2844_v41  ;;  %v2856_v7 = vsub.f32 %v6518_v29, %v7406_v47  ;;  %v7741_v41 = vld [vmem:[#allocation15_spill] sm:$0xff] }
 0x19f   :  { %2962 = vmatpush.msrb.mxu3 %v6340_v4  ;;  %2699 = vmatmul.f32.gmra.mxu2 %v6241_v37  ;;  %vm190_vm5 = vmor %vm6553_vm2, %vm174_vm3  ;;  %7739 = vst [vmem:[#allocation28_spill] sm:$0xff] %v6600_v63  ;;  %vm106_vm11 = vcmp.eq.s32.totalorder %v6446_v49, %v7741_v41  ;;  %v2851_v47 = vand.u32 4294901760, %v2850_v55  ;;  %v2862_v21 = vsub.f32 %v6540_v3, %v7408_v25  ;;  %v7743_v55 = vand.u32 4294901760, %v6564_v28 }
 0x1a0   :  { %2747 = vmatpush.msrb.mxu0 %v6327_v10  ;;  %2828 = vmatpush.msrb.mxu1 %v2827_v9  ;;  %7736 = vst [vmem:[#allocation25_spill] sm:$0xff] %v6580_v40  ;;  %v7737_v9 = vld [vmem:[#allocation12_spill] sm:$0xff]  ;;  %vm228_vm9 = vmor %vm190_vm5, %vm212_vm4  ;;  %v7749_v56 = vand.u32 4294901760, %v6580_v40  ;;  %vm182_vm3 = vcmp.eq.s32.totalorder %v6446_v49, %v4331_v14  ;;  %vm220_vm5 = vcmp.eq.s32.totalorder %v6446_v49, %v4348_v30 }
 0x1a1   :  { %2912 = vmatpush.msrb.mxu2 %v6395_v20  ;;  %2964 = vmatpush.msrb.mxu3 %v6350_v54  ;;  %vm250_vm6 = vcmp.eq.s32.totalorder %v6446_v49, %v7737_v9  ;;  %v2868_v25 = vsub.f32 %v6564_v28, %v7743_v55  ;;  %vm6641_vm14 = vmor %vm84_vm13, %vm106_vm11  ;;  %v510_v55 = vld [vmem:[%s7284_s1 + $0x3f0] sm:$0xff]  ;;  %vm258_vm8 = vcmp.eq.s32.totalorder %v6446_v49, %v4316_v48 }
 0x1a2   :  { %2740 = vmatmul.f32.gmra.mxu3 %v6241_v37  ;;  %2749 = vmatpush.msrb.mxu0 %v6340_v4  ;;  %v6617_v37 = vsub.f32 %v480_v51, %v6582_v43  ;;  %vm266_vm12 = vmor %vm228_vm9, %vm250_vm6  ;;  %v2857_v51 = vand.u32 4294901760, %v2856_v7  ;;  %v7748_v7 = vld [vmem:[#allocation13_spill] sm:$0xff]  ;;  %v2874_v58 = vsub.f32 %v6580_v40, %v7749_v56  ;;  %v6687_v5 = vand.u32 4294901760, %v510_v55 }
 0x1a3   :  { %2834 = vmatpush.msrb.mxu1 %v2833_v34  ;;  %2915 = vmatpush.msrb.mxu2 %v6418_v62  ;;  %v7740_v34 = vld [vmem:[#allocation10_spill] sm:$0xff]  ;;  %vm326_vm1 = vcmp.eq.s32.totalorder %v6446_v49, %v7748_v7  ;;  %vm6672_vm2 = vmor %vm6641_vm14, %vm144_vm15  ;;  %v2869_v56 = vand.u32 4294901760, %v2868_v25  ;;  %v509_v25 = vld [vmem:[%s7284_s1 + $0x3e8] sm:$0xff]  ;;  %vm296_vm9 = vcmp.eq.s32.totalorder %v6446_v49, %v4447_v0  ;;  %vm334_vm13 = vcmp.eq.s32.totalorder %v6446_v49, %v4411_v22 }
 0x1a4   :  { %2966 = vmatpush.msrb.mxu3 %v6366_v36  ;;  %2751 = vmatpush.msrb.mxu0 %v6350_v54  ;;  %vm288_vm10 = vcmp.eq.s32.totalorder %v6446_v49, %v7740_v34  ;;  %7742 = vst [vmem:[#allocation29_spill] sm:$0xff] %v6617_v37  ;;  %vm198_vm6 = vmor %vm6672_vm2, %vm182_vm3 }
 0x1a5   :  { %2840 = vmatpush.msrb.mxu1 %v2839_v18  ;;  %2918 = vmatpush.msrb.mxu2 %v6435_v23  ;;  %v511_v18 = vld [vmem:[%s7284_s1 + $0x3f8] sm:$0xff]  ;;  %vm6652_vm0 = vmor %vm266_vm12, %vm288_vm10 }
 0x1a6   :  { %2968 = vmatpush.msrb.mxu3 %v6390_v24  ;;  %2581 = vmatmul.f32.gmra.mxu0 %v6258_v38  ;;  %v2863_v38 = vand.u32 4294901760, %v2862_v21  ;;  %v6666_v23 = vand.u32 4294901760, %v511_v18  ;;  %vm342_vm4 = vmor %vm6652_vm0, %vm326_vm1 }
 0x1a7   :  { %2753 = vmatpush.msrb.mxu0 %v6366_v36  ;;  %2846 = vmatpush.msrb.mxu1 %v2845_v53  ;;  %vm6713_vm7 = vmor %vm198_vm6, %vm220_vm5 }
 0x1a8   :  { %2921 = vmatpush.msrb.mxu2 %v6452_v6  ;;  %2970 = vmatpush.msrb.mxu3 %v6407_v42  ;;  %v7412_v6 = vand.u32 4294901760, %v6617_v37  ;;  %7750 = vst [vmem:[#allocation31_spill] sm:$0xff] %v6666_v23  ;;  %vm274_vm10 = vmor %vm6713_vm7, %vm258_vm8 }
 0x1a9   :  { %2755 = vmatpush.msrb.mxu0 %v6390_v24  ;;  %2852 = vmatpush.msrb.mxu1 %v2851_v47  ;;  %v7753_v47 = vand.u32 4294901760, %v6600_v63  ;;  %vm312_vm12 = vmor %vm274_vm10, %vm296_vm9 }
 0x1aa   :  { %2924 = vmatpush.msrb.mxu2 %v6476_v46  ;;  %2972 = vmatpush.msrb.mxu3 %v6420_v35  ;;  %v2886_v53 = vsub.f32 %v6617_v37, %v7412_v6  ;;  %v6723_v6 = vand.u32 4294901760, %v509_v25  ;;  %vm6776_vm15 = vmor %vm312_vm12, %vm334_vm13 }
 0x1ab   :  { %2757 = vmatpush.msrb.mxu0 %v6407_v42  ;;  %2858 = vmatpush.msrb.mxu1 %v2857_v51  ;;  %v2880_v21 = vsub.f32 %v6600_v63, %v7753_v47  ;;  %v2875_v51 = vand.u32 4294901760, %v2874_v58  ;;  %v6701_v47 = vsub.f32 %v511_v18, %v6666_v23  ;;  %v508_v18 = vld [vmem:[%s7284_s1 + $0x3e0] sm:$0xff] }
 0x1ac   :  { %2927 = vmatpush.msrb.mxu2 %v6501_v26  ;;  %2974 = vmatpush.msrb.mxu3 %v6443_v50  ;;  %v6731_v26 = vadd.s32 896, %v7719_v19  ;;  %v6745_v19 = vand.u32 4294901760, %v508_v18 }
 0x1ad   :  { %2759 = vmatpush.msrb.mxu0 %v6420_v35  ;;  %2864 = vmatpush.msrb.mxu1 %v2863_v38  ;;  %7754 = vst [vmem:[#allocation32_spill] sm:$0xff] %v6701_v47  ;;  %v6711_v38 = vsel %vm342_vm4, 1.0, %v7498_v13  ;;  %v2881_v62 = vand.u32 4294901760, %v2880_v21  ;;  %v2887_v21 = vand.u32 4294901760, %v2886_v53  ;;  %v506_v53 = vld [vmem:[%s7284_s1 + $0x3d0] sm:$0xff]  ;;  %v7760_v49 = vand.u32 4294901760, %v6701_v47 }
 0x1ae   :  { %2930 = vmatpush.msrb.mxu2 %v6518_v29  ;;  %2976 = vmatpush.msrb.mxu3 %v6462_v33  ;;  %7755 = vst [vmem:[#allocation26_spill] sm:$0xff] %v6711_v38  ;;  %v6726_v29 = vsub.f32 %v510_v55, %v6687_v5  ;;  %vm39_vm11 = vcmp.eq.s32.totalorder %v6731_v26, %v7721_v15  ;;  %v6783_v58 = vand.u32 4294901760, %v506_v53 }
 0x1af   :  { %2761 = vmatpush.msrb.mxu0 %v6443_v50  ;;  %2870 = vmatpush.msrb.mxu1 %v2869_v56  ;;  %v507_v56 = vld [vmem:[%s7284_s1 + $0x3d8] sm:$0xff]  ;;  %vm61_vm14 = vcmp.eq.s32.totalorder %v6731_v26, %v7722_v32  ;;  %v6766_v55 = vsub.f32 %v509_v25, %v6723_v6  ;;  %v6781_v25 = vsub.f32 %v508_v18, %v6745_v19 }
 0x1b0   :  { %7758 = vst [vmem:[#allocation33_spill] sm:$0xff] %v6726_v29  ;;  %2933 = vmatpush.msrb.mxu2 %v6540_v3  ;;  %2978 = vmatpush.msrb.mxu3 %v6478_v8  ;;  %v3168_v3 = vsub.f32 %v6701_v47, %v7760_v49  ;;  %vm6794_vm0 = vmor %vm39_vm11, %vm61_vm14  ;;  %v7766_v49 = vand.u32 4294901760, %v6726_v29  ;;  %vm99_vm1 = vcmp.eq.s32.totalorder %v6731_v26, %v7726_v16 }
 0x1b1   :  { %2763 = vmatpush.msrb.mxu0 %v6462_v33  ;;  %2876 = vmatpush.msrb.mxu1 %v2875_v51  ;;  %v2777_v51 = vsub.f32 %v6711_v38, %v6711_v38  ;;  %7759 = vst [vmem:[#allocation30_spill] sm:$0xff] %v6766_v55  ;;  %vm6825_vm2 = vmor %vm6794_vm0, %vm99_vm1  ;;  %vm137_vm3 = vcmp.eq.s32.totalorder %v6731_v26, %v7731_v27 }
 0x1b2   :  { %2936 = vmatpush.msrb.mxu2 %v6564_v28  ;;  %2980 = vmatpush.msrb.mxu3 %v6503_v17  ;;  %v6768_v28 = vand.u32 4294901760, %v507_v56  ;;  %7763 = vst [vmem:[#allocation34_spill] sm:$0xff] %v6781_v25  ;;  %v3174_v32 = vsub.f32 %v6726_v29, %v7766_v49  ;;  %v6819_v49 = vsel %vm6776_vm15, 1.0, %v7498_v13  ;;  %v3169_v16 = vand.u32 4294901760, %v3168_v3  ;;  %vm6867_vm4 = vmor %vm6825_vm2, %vm137_vm3 }
 0x1b3   :  { %2765 = vmatpush.msrb.mxu0 %v6478_v8  ;;  %2882 = vmatpush.msrb.mxu1 %v2881_v62  ;;  %v2778_v18 = vand.u32 4294901760, %v2777_v51  ;;  %v503_v62 = vld [vmem:[%s7284_s1 + $0x3b8] sm:$0xff]  ;;  %vm175_vm5 = vcmp.eq.s32.totalorder %v6731_v26, %v7735_v31  ;;  %vm213_vm6 = vcmp.eq.s32.totalorder %v6731_v26, %v4168_v61  ;;  %vm251_vm8 = vcmp.eq.s32.totalorder %v6731_v26, %v7737_v9 }
 0x1b4   :  { %2939 = vmatpush.msrb.mxu2 %v6580_v40  ;;  %2982 = vmatpush.msrb.mxu3 %v6520_v44  ;;  %v505_v40 = vld [vmem:[%s7284_s1 + $0x3c8] sm:$0xff]  ;;  %v6807_v15 = vsub.f32 %v507_v56, %v6768_v28  ;;  %v3175_v3 = vand.u32 4294901760, %v3174_v32  ;;  %v6860_v32 = vand.u32 4294901760, %v503_v62  ;;  %vm6900_vm7 = vmor %vm6867_vm4, %vm175_vm5  ;;  %vm47_vm9 = vcmp.eq.s32.totalorder %v6731_v26, %v4261_v60 }
 0x1b5   :  { %2767 = vmatpush.msrb.mxu0 %v6503_v17  ;;  %2888 = vmatpush.msrb.mxu1 %v2887_v21  ;;  %v6821_v47 = vand.u32 4294901760, %v505_v40  ;;  %v2779_v21 = vsub.f32 %v2777_v51, %v2778_v18  ;;  %vm69_vm10 = vcmp.eq.s32.totalorder %v6731_v26, %v7738_v2  ;;  %vm229_vm11 = vmor %vm6900_vm7, %vm213_vm6  ;;  %vm107_vm12 = vcmp.eq.s32.totalorder %v6731_v26, %v7741_v41 }
 0x1b6   :  { %2942 = vmatpush.msrb.mxu2 %v6600_v63  ;;  %2984 = vmatpush.msrb.mxu3 %v6542_v12  ;;  %7767 = vst [vmem:[#allocation27_spill] sm:$0xff] %v6807_v15  ;;  %v504_v63 = vld [vmem:[%s7284_s1 + $0x3c0] sm:$0xff]  ;;  %v7774_v31 = vand.u32 4294901760, %v6807_v15  ;;  %vm6949_vm13 = vmor %vm229_vm11, %vm251_vm8  ;;  %vm289_vm14 = vcmp.eq.s32.totalorder %v6731_v26, %v7740_v34  ;;  %vm327_vm0 = vcmp.eq.s32.totalorder %v6731_v26, %v7748_v7  ;;  %v7784_v60 = vand.u32 4294901760, %v6362_v45 }
 0x1b7   :  { %2890 = vmatmul.f32.vlgmr.msrb.gmra.mxu1 %v6711_v38  ;;  %2769 = vmatpush.msrb.mxu0 %v6520_v44  ;;  %v6841_v29 = vand.u32 4294901760, %v504_v63  ;;  %v6850_v38 = vsub.f32 %v6819_v49, %v6819_v49  ;;  %vm85_vm15 = vmor %vm47_vm9, %vm69_vm10  ;;  %vm145_vm2 = vcmp.eq.s32.totalorder %v6731_v26, %v4269_v1  ;;  %vm183_vm4 = vcmp.eq.s32.totalorder %v6731_v26, %v4331_v14 }
 0x1b8   :  { %3076 = vmatpush.msra.mxu1 %v6317_v57  ;;  %2945 = vmatpush.msrb.mxu2 %v6617_v37  ;;  %v6832_v37 = vsub.f32 %v506_v53, %v6783_v58  ;;  %v7770_v53 = vand.u32 4294901760, %v6766_v55  ;;  %vm6979_vm1 = vmor %vm85_vm15, %vm107_vm12  ;;  %vm221_vm7 = vcmp.eq.s32.totalorder %v6731_v26, %v4348_v30  ;;  %vm259_vm9 = vcmp.eq.s32.totalorder %v6731_v26, %v4316_v48 }
 0x1b9   :  { %2986 = vmatpush.msrb.mxu3 %v6566_v52  ;;  %2948 = vmatmul.f32.vlgmr.msrb.gmra.mxu2 %v2777_v51  ;;  %v502_v51 = vld [vmem:[%s7284_s1 + $0x3b0] sm:$0xff]  ;;  %v6886_v27 = vsub.f32 %v504_v63, %v6841_v29  ;;  %vm7004_vm3 = vmor %vm6949_vm13, %vm289_vm14  ;;  %vm297_vm11 = vcmp.eq.s32.totalorder %v6731_v26, %v4447_v0  ;;  %vm335_vm14 = vcmp.eq.s32.totalorder %v6731_v26, %v4411_v22  ;;  %v7799_v0 = vand.u32 4294901760, %v6476_v46 }
 0x1ba   :  { %3078 = vmatpush.msra.mxu1 %v6327_v10  ;;  %3117 = vmatpush.msra.mxu2 %v6666_v23  ;;  %v3180_v57 = vsub.f32 %v6766_v55, %v7770_v53  ;;  %v6858_v23 = vsub.f32 %v505_v40, %v6821_v47  ;;  %v501_v10 = vld [vmem:[%s7284_s1 + $0x3a8] sm:$0xff]  ;;  %v6888_v56 = vand.u32 4294901760, %v502_v51  ;;  %v2786_v40 = vand.u32 4294901760, %v6850_v38  ;;  %v499_v55 = vld [vmem:[%s7284_s1 + $0x398] sm:$0xff]  ;;  %vm7029_vm5 = vmor %vm6979_vm1, %vm145_vm2 }
 0x1bb   :  { %2771 = vmatpush.msrb.mxu0 %v6542_v12  ;;  %2988 = vmatpush.msrb.mxu3 %v6582_v43  ;;  %v6965_v63 = vand.u32 4294901760, %v499_v55  ;;  %vm7042_vm6 = vmor %vm7004_vm3, %vm327_vm0  ;;  %vm3488_vm0 = vcmask 392192  }
 0x1bc   :  { %2992 = vmatmul.f32.vlgmr.msrb.gmra.mxu3 %v2778_v18  ;;  %3080 = vmatpush.msra.mxu1 %v6340_v4  ;;  %v7773_v18 = vand.u32 4294901760, %v6781_v25  ;;  %vm199_vm8 = vmor %vm7029_vm5, %vm183_vm4  ;;  %v7075_v14 = vsel %vm7042_vm6, 1.0, %v7498_v13 }
 0x1bd   :  { %3119 = vmatpush.msra.mxu2 %v6687_v5  ;;  %3170 = vmatpush.msra.mxu3 %v3169_v16  ;;  %v2780_v16 = vand.u32 4294901760, %v2779_v21  ;;  %v6910_v21 = vsub.f32 %v503_v62, %v6860_v32  ;;  %v7778_v62 = vand.u32 4294901760, %v6338_v39  ;;  %vm237_vm10 = vmor %vm199_vm8, %vm221_vm7 }
 0x1be   :  { %v3186_v4 = vsub.f32 %v6781_v25, %v7773_v18  ;;  %2773 = vmatpush.msrb.mxu0 %v6566_v52  ;;  %3082 = vmatpush.msra.mxu1 %v6350_v54  ;;  %v3181_v18 = vand.u32 4294901760, %v3180_v57  ;;  %v3192_v25 = vsub.f32 %v6807_v15, %v7774_v31  ;;  %v500_v54 = vld [vmem:[%s7284_s1 + $0x3a0] sm:$0xff]  ;;  %v3203_v57 = vand.u32 4294901760, %v6858_v23  ;;  %vm275_vm12 = vmor %vm237_vm10, %vm259_vm9 }
 0x1bf   :  { %3121 = vmatpush.msra.mxu2 %v6723_v6  ;;  %3176 = vmatpush.msra.mxu3 %v3175_v3  ;;  %v6912_v3 = vand.u32 4294901760, %v501_v10  ;;  %v7777_v31 = vand.u32 4294901760, %v6832_v37  ;;  %vm313_vm13 = vmor %vm275_vm12, %vm297_vm11 }
 0x1c0   :  { %2775 = vmatpush.msrb.mxu0 %v6582_v43  ;;  %2894 = vmatmul.f32.gmra.mxu1 %v6819_v49  ;;  %v3187_v53 = vand.u32 4294901760, %v3186_v4  ;;  %v6930_v4 = vsub.f32 %v502_v51, %v6888_v56  ;;  %v3193_v39 = vand.u32 4294901760, %v3192_v25  ;;  %v498_v51 = vld [vmem:[%s7284_s1 + $0x390] sm:$0xff]  ;;  %v3215_v25 = vand.u32 4294901760, %v6910_v21  ;;  %vm351_vm15 = vmor %vm313_vm13, %vm335_vm14 }
 0x1c1   :  { %2781 = vmatmul.f32.vlgmr.msrb.gmra.mxu0 %v2780_v16  ;;  %3084 = vmatpush.msra.mxu1 %v6366_v36  ;;  %v3198_v15 = vsub.f32 %v6832_v37, %v7777_v31  ;;  %v3209_v36 = vand.u32 4294901760, %v6886_v27  ;;  %v6932_v16 = vand.u32 4294901760, %v500_v54  ;;  %v2787_v31 = vsub.f32 %v6850_v38, %v2786_v40 }
 0x1c2   :  { %3005 = vmatpush.msra.mxu0 %v7778_v62  ;;  %3123 = vmatpush.msra.mxu2 %v6745_v19  ;;  %v6963_v9 = vsub.f32 %v501_v10, %v6912_v3  ;;  %v6994_v41 = vand.u32 4294901760, %v498_v51  ;;  %v3216_v34 = vsub.f32 %v6910_v21, %v3215_v25 }
 0x1c3   :  { %3182 = vmatpush.msra.mxu3 %v3181_v18  ;;  %2953 = vmatmul.f32.gmra.mxu2 %v6850_v38  ;;  %v7781_v18 = vand.u32 4294901760, %v6348_v59  ;;  %v3204_v38 = vsub.f32 %v6858_v23, %v3203_v57  ;;  %v3199_v59 = vand.u32 4294901760, %v3198_v15  ;;  %v3210_v2 = vsub.f32 %v6886_v27, %v3209_v36 }
 0x1c4   :  { %3086 = vmatpush.msra.mxu1 %v6390_v24  ;;  %3125 = vmatpush.msra.mxu2 %v6768_v28  ;;  %v3221_v15 = vand.u32 4294901760, %v6930_v4  ;;  %v6992_v10 = vsub.f32 %v500_v54, %v6932_v16  ;;  %v7787_v54 = vand.u32 4294901760, %v6376_v11  ;;  %v3227_v61 = vand.u32 4294901760, %v6963_v9 }
 0x1c5   :  { %3009 = vmatpush.msra.mxu0 %v7781_v18  ;;  %3188 = vmatpush.msra.mxu3 %v3187_v53  ;;  %v497_v53 = vld [vmem:[%s7284_s1 + $0x388] sm:$0xff]  ;;  %v3205_v62 = vand.u32 4294901760, %v3204_v38  ;;  %v7019_v18 = vsub.f32 %v499_v55, %v6965_v63  ;;  %v3211_v1 = vand.u32 4294901760, %v3210_v2  ;;  %v7053_v7 = vsub.f32 %v498_v51, %v6994_v41 }
 0x1c6   :  { %2998 = vmatmul.f32.gmra.mxu3 %v2786_v40  ;;  %3088 = vmatpush.msra.mxu1 %v6407_v42  ;;  %v2788_v40 = vand.u32 4294901760, %v2787_v31  ;;  %v496_v42 = vld [vmem:[%s7284_s1 + $0x380] sm:$0xff]  ;;  %v3233_v31 = vand.u32 4294901760, %v6992_v10  ;;  %v7792_v38 = vand.u32 4294901760, %v6395_v20  ;;  %v3217_v51 = vand.u32 4294901760, %v3216_v34 }
 0x1c7   :  { %3013 = vmatpush.msra.mxu0 %v7784_v60  ;;  %3127 = vmatpush.msra.mxu2 %v6783_v58  ;;  %v7058_v24 = vand.u32 4294901760, %v496_v42  ;;  %v3228_v20 = vsub.f32 %v6963_v9, %v3227_v61 }
 0x1c8   :  { %3194 = vmatpush.msra.mxu3 %v3193_v39  ;;  %3090 = vmatpush.msra.mxu1 %v6420_v35  ;;  %v7035_v39 = vand.u32 4294901760, %v497_v53  ;;  %v3222_v35 = vsub.f32 %v6930_v4, %v3221_v15  ;;  %v3234_v30 = vsub.f32 %v6992_v10, %v3233_v31 }
 0x1c9   :  { %3017 = vmatpush.msra.mxu0 %v7787_v54  ;;  %3129 = vmatpush.msra.mxu2 %v6821_v47  ;;  %v7795_v54 = vld [vmem:[#allocation21_spill] sm:$0xff]  ;;  %v3229_v34 = vand.u32 4294901760, %v3228_v20  ;;  %v7802_v20 = vld [vmem:[#allocation22_spill] sm:$0xff] }
 0x1ca   :  { %3200 = vmatpush.msra.mxu3 %v3199_v59  ;;  %2789 = vmatmul.f32.gmra.mxu0 %v2788_v40  ;;  %v7793_v59 = vld [vmem:[#allocation18_spill] sm:$0xff]  ;;  %v7084_v2 = vsub.f32 %v497_v53, %v7035_v39  ;;  %v3223_v45 = vand.u32 4294901760, %v3222_v35  ;;  %v3245_v40 = vand.u32 4294901760, %v7053_v7  ;;  %v7101_v53 = vsub.f32 %v496_v42, %v7058_v24  ;;  %v7800_v35 = vld [vmem:[#allocation20_spill] sm:$0xff] }
 0x1cb   :  { %3021 = vmatpush.msra.mxu0 %v7792_v38  ;;  %3092 = vmatpush.msra.mxu1 %v6443_v50  ;;  %v3239_v50 = vand.u32 4294901760, %v7019_v18  ;;  %v7794_v60 = vand.u32 4294901760, %v7793_v59  ;;  %v3235_v55 = vand.u32 4294901760, %v3234_v30  ;;  %v7801_v38 = vand.u32 4294901760, %v7800_v35  ;;  %v7814_v35 = vld [vmem:[#allocation33_spill] sm:$0xff] }
 0x1cc   :  { %3131 = vmatpush.msra.mxu2 %v6841_v29  ;;  %3206 = vmatpush.msra.mxu3 %v3205_v62  ;;  %v7796_v62 = vand.u32 4294901760, %v7795_v54  ;;  %v3251_v48 = vand.u32 4294901760, %v7084_v2  ;;  %v3257_v26 = vand.u32 4294901760, %v7101_v53  ;;  %v7803_v59 = vand.u32 4294901760, %v7802_v20  ;;  %v7806_v54 = vld [vmem:[#allocation26_spill] sm:$0xff] }
 0x1cd   :  { %3025 = vmatpush.msra.mxu0 %v7794_v60  ;;  %3094 = vmatpush.msra.mxu1 %v6462_v33  ;;  %v7098_v33 = vsub.f32 %v7075_v14, %v7075_v14  ;;  %v3240_v11 = vsub.f32 %v7019_v18, %v3239_v50 }
 0x1ce   :  { %3133 = vmatpush.msra.mxu2 %v6860_v32  ;;  %3212 = vmatpush.msra.mxu3 %v3211_v1  ;;  %v3246_v1 = vsub.f32 %v7053_v7, %v3245_v40  ;;  %v3252_v46 = vsub.f32 %v7084_v2, %v3251_v48  ;;  %v3258_v60 = vsub.f32 %v7101_v53, %v3257_v26 }
 0x1cf   :  { %3029 = vmatpush.msra.mxu0 %v7796_v62  ;;  %3096 = vmatpush.msra.mxu1 %v6478_v8  ;;  %v7797_v8 = vld [vmem:[#allocation19_spill] sm:$0xff]  ;;  %v3150_v22 = vand.u32 4294901760, %v7098_v33  ;;  %v7807_v62 = vld [vmem:[#allocation24_spill] sm:$0xff] }
 0x1d0   :  { %3135 = vmatpush.msra.mxu2 %v6888_v56  ;;  %3218 = vmatpush.msra.mxu3 %v3217_v51  ;;  %v7798_v42 = vand.u32 4294901760, %v7797_v8  ;;  %v7137_v51 = vsel %vm351_vm15, 1.0, %v7498_v13  ;;  %v3253_v13 = vand.u32 4294901760, %v3252_v46  ;;  %v3259_v8 = vand.u32 4294901760, %v3258_v60  ;;  %v7820_v60 = vld [vmem:[#allocation29_spill] sm:$0xff] }
 0x1d1   :  { %3098 = vmatpush.msra.mxu1 %v6503_v17  ;;  %v3241_v17 = vand.u32 4294901760, %v3240_v11 }
 0x1d2   :  { %3033 = vmatpush.msra.mxu0 %v7798_v42  ;;  %3137 = vmatpush.msra.mxu2 %v6912_v3  ;;  %v7809_v42 = vld [vmem:[#allocation31_spill] sm:$0xff] }
 0x1d3   :  { %3224 = vmatpush.msra.mxu3 %v3223_v45  ;;  %3100 = vmatpush.msra.mxu1 %v6520_v44  ;;  %v3247_v44 = vand.u32 4294901760, %v3246_v1  ;;  %v7804_v45 = vld [vmem:[#allocation23_spill] sm:$0xff] }
 0x1d4   :  { %3037 = vmatpush.msra.mxu0 %v7799_v0  ;;  %3139 = vmatpush.msra.mxu2 %v6932_v16  ;;  %v7805_v30 = vand.u32 4294901760, %v7804_v45  ;;  %v7812_v0 = vld [vmem:[#allocation25_spill] sm:$0xff]  ;;  %v7821_v45 = vand.u32 4294901760, %v7820_v60 }
 0x1d5   :  { %3230 = vmatpush.msra.mxu3 %v3229_v34  ;;  %3102 = vmatpush.msra.mxu1 %v6542_v12  ;;  %v3151_v12 = vsub.f32 %v7098_v33, %v3150_v22  ;;  %v7808_v34 = vand.u32 4294901760, %v7807_v62 }
 0x1d6   :  { %3041 = vmatpush.msra.mxu0 %v7801_v38  ;;  %3141 = vmatpush.msra.mxu2 %v6965_v63  ;;  %v7815_v38 = vand.u32 4294901760, %v7814_v35 }
 0x1d7   :  { %3236 = vmatpush.msra.mxu3 %v3235_v55  ;;  %3104 = vmatpush.msra.mxu1 %v6566_v52  ;;  %v7154_v52 = vsub.f32 %v7137_v51, %v7137_v51  ;;  %v3152_v11 = vand.u32 4294901760, %v3151_v12  ;;  %v7810_v55 = vld [vmem:[#allocation32_spill] sm:$0xff] }
 0x1d8   :  { %3045 = vmatpush.msra.mxu0 %v7803_v59  ;;  %3143 = vmatpush.msra.mxu2 %v6994_v41  ;;  %v7811_v1 = vand.u32 4294901760, %v7810_v55  ;;  %v7818_v59 = vld [vmem:[#allocation30_spill] sm:$0xff] }
 0x1d9   :  { %3242 = vmatpush.msra.mxu3 %v3241_v17  ;;  %3106 = vmatpush.msra.mxu1 %v6582_v43  ;;  %v3158_v43 = vand.u32 4294901760, %v7154_v52  ;;  %v7813_v17 = vand.u32 4294901760, %v7812_v0  ;;  %v7819_v12 = vand.u32 4294901760, %v7818_v59 }
 0x1da   :  { %3049 = vmatpush.msra.mxu0 %v7805_v30  ;;  %3145 = vmatpush.msra.mxu2 %v7035_v39 }
 0x1db   :  { %3248 = vmatpush.msra.mxu3 %v3247_v44  ;;  %3108 = vmatmul.f32.vlgmr.msra.gmra.mxu1 %v7806_v54  ;;  %v3159_v46 = vsub.f32 %v7154_v52, %v3158_v43  ;;  %v7816_v44 = vld [vmem:[#allocation28_spill] sm:$0xff] }
 0x1dc   :  { %3053 = vmatpush.msra.mxu0 %v7808_v34  ;;  %3330 = vmatpush.msrb.mxu1 %v7809_v42  ;;  %v7817_v20 = vand.u32 4294901760, %v7816_v44 }
 0x1dd   :  { %3147 = vmatpush.msra.mxu2 %v7058_v24  ;;  %3254 = vmatpush.msra.mxu3 %v3253_v13  ;;  %v3160_v30 = vand.u32 4294901760, %v3159_v46  ;;  %v7822_v13 = vld [vmem:[#allocation34_spill] sm:$0xff] }
 0x1de   :  { %3153 = vmatmul.f32.vlgmr.msra.gmra.mxu2 %v3152_v11  ;;  %3332 = vmatpush.msrb.mxu1 %v6687_v5  ;;  %v7823_v62 = vand.u32 4294901760, %v7822_v13 }
 0x1df   :  { %3377 = vmatpush.msrb.mxu2 %v7811_v1  ;;  %3057 = vmatpush.msra.mxu0 %v7813_v17 }
 0x1e0   :  { %3260 = vmatpush.msra.mxu3 %v3259_v8  ;;  %3334 = vmatpush.msrb.mxu1 %v6723_v6 }
 0x1e1   :  { %3262 = vmatmul.f32.vlgmr.msra.gmra.mxu3 %v7075_v14  ;;  %3381 = vmatpush.msrb.mxu2 %v7815_v38 }
 0x1e2   :  { %3448 = vmatpush.msrb.mxu3 %v7809_v42  ;;  %3061 = vmatpush.msra.mxu0 %v7817_v20 }
 0x1e3   :  { %3336 = vmatpush.msrb.mxu1 %v6745_v19  ;;  %3385 = vmatpush.msrb.mxu2 %v7819_v12 }
 0x1e4   :  { %3450 = vmatpush.msrb.mxu3 %v6687_v5  ;;  %3065 = vmatpush.msra.mxu0 %v7821_v45  ;;  %v7824_v5 = vld [vmem:[#allocation27_spill] sm:$0xff] }
 0x1e5   :  { %3112 = vmatmul.f32.gmra.mxu1 %v6819_v49  ;;  %3067 = vmatmul.f32.vlgmr.msra.gmra.mxu0 %v7806_v54  ;;  %v7825_v34 = vand.u32 4294901760, %v7824_v5  ;;  %v7826_v54 = vand.u32 4294901760, %v6832_v37 }
 0x1e6   :  { %3338 = vmatpush.msrb.mxu1 %v6768_v28  ;;  %3272 = vmatpush.msrb.mxu0 %v7810_v55 }
 0x1e7   :  { %3389 = vmatpush.msrb.mxu2 %v7823_v62  ;;  %3452 = vmatpush.msrb.mxu3 %v6723_v6  ;;  %v1580_v6 = vpop.f32.mrf.mxu0 }
 0x1e8   :  { %3161 = vmatmul.f32.gmra.mxu2 %v3160_v30  ;;  %3275 = vmatpush.msrb.mxu0 %v7814_v35 }
 0x1e9   :  { %3340 = vmatpush.msrb.mxu1 %v6783_v58  ;;  %3393 = vmatpush.msrb.mxu2 %v7825_v34 }
 0x1ea   :  { %3454 = vmatpush.msrb.mxu3 %v6745_v19  ;;  %3278 = vmatpush.msrb.mxu0 %v7818_v59 }
 0x1eb   :  { %3266 = vmatmul.f32.gmra.mxu3 %v7137_v51  ;;  %3342 = vmatpush.msrb.mxu1 %v6821_v47 }
 0x1ec   :  { %3397 = vmatpush.msrb.mxu2 %v7826_v54  ;;  %3456 = vmatpush.msrb.mxu3 %v6768_v28  ;;  %v1666_v28 = vpop.f32.mrf.mxu2 }
 0x1ed   :  { %3281 = vmatpush.msrb.mxu0 %v7822_v13  ;;  %3344 = vmatpush.msrb.mxu1 %v6841_v29 }
 0x1ee   :  { %3401 = vmatpush.msrb.mxu2 %v3203_v57  ;;  %3458 = vmatpush.msrb.mxu3 %v6783_v58 }
 0x1ef   :  { %3071 = vmatmul.f32.gmra.mxu0 %v6819_v49  ;;  %3346 = vmatpush.msrb.mxu1 %v6860_v32 }
 0x1f0   :  { %3284 = vmatpush.msrb.mxu0 %v7824_v5  ;;  %3405 = vmatpush.msrb.mxu2 %v3209_v36 }
 0x1f1   :  { %3460 = vmatpush.msrb.mxu3 %v6821_v47  ;;  %3348 = vmatpush.msrb.mxu1 %v6888_v56  ;;  %v1584_v47 = vpop.f32.mrf.mxu0 }
 0x1f2   :  { %3287 = vmatpush.msrb.mxu0 %v6832_v37  ;;  %3409 = vmatpush.msrb.mxu2 %v3215_v25 }
 0x1f3   :  { %3462 = vmatpush.msrb.mxu3 %v6841_v29  ;;  %3350 = vmatpush.msrb.mxu1 %v6912_v3  ;;  %v1775_v29 = vpop.f32.mrf.mxu3 }
 0x1f4   :  { %3290 = vmatpush.msrb.mxu0 %v6858_v23  ;;  %3413 = vmatpush.msrb.mxu2 %v3221_v15  ;;  %v1621_v23 = vpop.f32.mrf.mxu1  ;;  %v1674_v19 = vpop.f32.mrf.mxu2 }
 0x1f5   :  { %3464 = vmatpush.msrb.mxu3 %v6860_v32  ;;  %3352 = vmatpush.msrb.mxu1 %v6932_v16 }
 0x1f6   :  { %3293 = vmatpush.msrb.mxu0 %v6886_v27  ;;  %3417 = vmatpush.msrb.mxu2 %v3227_v61 }
 0x1f7   :  { %3466 = vmatpush.msrb.mxu3 %v6888_v56  ;;  %3354 = vmatpush.msrb.mxu1 %v6965_v63 }
 0x1f8   :  { %3296 = vmatpush.msrb.mxu0 %v6910_v21  ;;  %3421 = vmatpush.msrb.mxu2 %v3233_v31 }
 0x1f9   :  { %3468 = vmatpush.msrb.mxu3 %v6912_v3  ;;  %3356 = vmatpush.msrb.mxu1 %v6994_v41  ;;  %v1833_v32 = vpop.f32.mrf.mxu0  ;;  %v7827_v3 = vld [vmem:[#allocation16_spill] sm:$0xff] }
 0x1fa   :  { %3299 = vmatpush.msrb.mxu0 %v6930_v4  ;;  %3425 = vmatpush.msrb.mxu2 %v3239_v50  ;;  %v1581_v36 = vadd.f32 %v1580_v6, %v7827_v3 }
 0x1fb   :  { %3470 = vmatpush.msrb.mxu3 %v6932_v16  ;;  %3358 = vmatpush.msrb.mxu1 %v7035_v39  ;;  %v1779_v58 = vpop.f32.mrf.mxu3 }
 0x1fc   :  { %3302 = vmatpush.msrb.mxu0 %v6963_v9  ;;  %3429 = vmatpush.msrb.mxu2 %v3245_v40  ;;  %v1625_v37 = vpop.f32.mrf.mxu1  ;;  %v1952_v27 = vpop.f32.mrf.mxu2  ;;  %v1622_v25 = vadd.f32 %v1621_v23, %v1581_v36 }
 0x1fd   :  { %3472 = vmatpush.msrb.mxu3 %v6965_v63  ;;  %3360 = vmatpush.msrb.mxu1 %v7058_v24 }
 0x1fe   :  { %3305 = vmatpush.msrb.mxu0 %v6992_v10  ;;  %3433 = vmatpush.msrb.mxu2 %v3251_v48  ;;  %v1667_v15 = vadd.f32 %v1666_v28, %v1622_v25  ;;  %v7828_v10 = vld [vmem:[#allocation17_spill] sm:$0xff] }
 0x1ff   :  { %3474 = vmatpush.msrb.mxu3 %v6994_v41  ;;  %3364 = vmatmul.f32.vlgmr.msrb.gmra.mxu1 %v3150_v22  ;;  %v1585_v41 = vadd.f32 %v1584_v47, %v7828_v10 }
 0x200   :  { %3308 = vmatpush.msrb.mxu0 %v7019_v18  ;;  %3437 = vmatpush.msrb.mxu2 %v3257_v26 }
 0x201   :  { %3476 = vmatpush.msrb.mxu3 %v7035_v39  ;;  %3439 = vmatmul.f32.vlgmr.msrb.gmra.mxu2 %v7075_v14  ;;  %v1838_v21 = vpop.f32.mrf.mxu0  ;;  %v1776_v39 = vadd.f32 %v1775_v29, %v1667_v15  ;;  %v1626_v31 = vadd.f32 %v1625_v37, %v1585_v41 }
 0x202   :  { %3311 = vmatpush.msrb.mxu0 %v7053_v7 }
 0x203   :  { %3478 = vmatpush.msrb.mxu3 %v7058_v24  ;;  %v1993_v56 = vpop.f32.mrf.mxu3  ;;  %v1834_v7 = vadd.f32 %v1833_v32, %v1776_v39  ;;  %v1675_v24 = vadd.f32 %v1674_v19, %v1626_v31 }
 0x204   :  { %3480 = vmatmul.f32.vlgmr.msrb.gmra.mxu3 %v7075_v14  ;;  %3314 = vmatpush.msrb.mxu0 %v7084_v2  ;;  %v1877_v49 = vpop.f32.mrf.mxu1  ;;  %v1956_v4 = vpop.f32.mrf.mxu2 }
 0x205   :  { %v1878_v2 = vadd.f32 %v1877_v49, %v1834_v7 }
 0x206   :  { %3317 = vmatpush.msrb.mxu0 %v7101_v53 }
 0x207   :  { %3320 = vmatmul.f32.vlgmr.msrb.gmra.mxu0 %v7098_v33  ;;  %3370 = vmatmul.f32.gmra.mxu1 %v3158_v43  ;;  %v1780_v33 = vadd.f32 %v1779_v58, %v1675_v24  ;;  %v1953_v48 = vadd.f32 %v1952_v27, %v1878_v2 }
 0x209   :  { %3443 = vmatmul.f32.gmra.mxu2 %v7137_v51  ;;  %v2038_v63 = vpop.f32.mrf.mxu0  ;;  %v1839_v22 = vadd.f32 %v1838_v21, %v1780_v33 }
 0x20b   :  { %v1997_v16 = vpop.f32.mrf.mxu3 }
 0x20c   :  { %3484 = vmatmul.f32.gmra.mxu3 %v7137_v51  ;;  %v1883_v57 = vpop.f32.mrf.mxu1  ;;  %v2205_v61 = vpop.f32.mrf.mxu2 }
 0x20d   :  { %v1884_v11 = vadd.f32 %v1883_v57, %v1839_v22 }
 0x20f   :  { %3325 = vmatmul.f32.gmra.mxu0 %v7154_v52  ;;  %v1994_v52 = vadd.f32 %v1993_v56, %v1953_v48  ;;  %v1957_v55 = vadd.f32 %v1956_v4, %v1884_v11 }
 0x211   :  { %v2046_v14 = vpop.f32.mrf.mxu0  ;;  %v2039_v42 = vadd.f32 %v2038_v63, %v1994_v52  ;;  %v1998_v0 = vadd.f32 %v1997_v16, %v1957_v55 }
 0x213   :  { %v2249_v18 = vpop.f32.mrf.mxu3  ;;  %v2047_v46 = vadd.f32 %v2046_v14, %v1998_v0 }
 0x214   :  { %v2147_v9 = vpop.f32.mrf.mxu1  ;;  %v2210_v40 = vpop.f32.mrf.mxu2 }
 0x215   :  { %v2148_v1 = vadd.f32 %v2147_v9, %v2039_v42 }
 0x217   :  { %v2206_v38 = vadd.f32 %v2205_v61, %v2148_v1 }
 0x219   :  { %v2324_v51 = vpop.f32.mrf.mxu0  ;;  %v2250_v59 = vadd.f32 %v2249_v18, %v2206_v38 }
 0x21b   :  { %v2255_v53 = vpop.f32.mrf.mxu3  ;;  %v2325_v60 = vadd.f32 %v2324_v51, %v2250_v59 }
 0x21c   :  { %v2151_v50 = vpop.f32.mrf.mxu1  ;;  %v2410_v8 = vpop.f32.mrf.mxu2 }
 0x21d   :  { %v2152_v12 = vadd.f32 %v2151_v50, %v2047_v46 }
 0x21f   :  { %v2211_v13 = vadd.f32 %v2210_v40, %v2152_v12 }
 0x221   :  { %v2328_v35 = vpop.f32.mrf.mxu0  ;;  %v2256_v54 = vadd.f32 %v2255_v53, %v2211_v13 }
 0x223   :  { %v2519_v43 = vpop.f32.mrf.mxu3  ;;  %v2329_v6 = vadd.f32 %v2328_v35, %v2256_v54 }
 0x224   :  { %v2365_v26 = vpop.f32.mrf.mxu1  ;;  %v2418_v44 = vpop.f32.mrf.mxu2 }
 0x225   :  { %v2366_v5 = vadd.f32 %v2365_v26, %v2325_v60 }
 0x227   :  { %v2411_v23 = vadd.f32 %v2410_v8, %v2366_v5 }
 0x229   :  { %v2577_v30 = vpop.f32.mrf.mxu0  ;;  %v2520_v37 = vadd.f32 %v2519_v43, %v2411_v23 }
 0x22b   :  { %v2523_v20 = vpop.f32.mrf.mxu3  ;;  %v2578_v58 = vadd.f32 %v2577_v30, %v2520_v37  ;;  %v3661_v37 = vmov 48.0  }
 0x22c   :  { %v2369_v17 = vpop.f32.mrf.mxu1  ;;  %v2696_v62 = vpop.f32.mrf.mxu2  ;;  %3619 = vrcp.f32 %v3661_v37 }
 0x22d   :  { %v2370_v47 = vadd.f32 %v2369_v17, %v2329_v6 }
 0x22f   :  { %v2419_v32 = vadd.f32 %v2418_v44, %v2370_v47 }
 0x231   :  { %v2582_v29 = vpop.f32.mrf.mxu0  ;;  %v2524_v21 = vadd.f32 %v2523_v20, %v2419_v32 }
 0x232   :  { %v3620_v47 = vpop.eup %3619 }
 0x233   :  { %v2737_v34 = vpop.f32.mrf.mxu3  ;;  %v2583_v4 = vadd.f32 %v2582_v29, %v2524_v21  ;;  %vm3500_vm1 = vweird.f32 %v3620_v47 }
 0x234   :  { %v2621_v45 = vpop.f32.mrf.mxu1  ;;  %v2700_v19 = vpop.f32.mrf.mxu2 }
 0x235   :  { %v2622_v27 = vadd.f32 %v2621_v45, %v2578_v58 }
 0x237   :  { %v2697_v36 = vadd.f32 %v2696_v62, %v2622_v27 }
 0x239   :  { %v2738_v25 = vadd.f32 %v2737_v34, %v2697_v36 }
 0x23b   :  { %v2741_v49 = vpop.f32.mrf.mxu3 }
 0x23c   :  { %v2627_v28 = vpop.f32.mrf.mxu1  ;;  %v2949_v3 = vpop.f32.mrf.mxu2 }
 0x23d   :  { %v2628_v9 = vadd.f32 %v2627_v28, %v2583_v4 }
 0x23e   :  { %v2782_v57 = vpop.f32.mrf.mxu0 }
 0x23f   :  { %v2783_v63 = vadd.f32 %v2782_v57, %v2738_v25  ;;  %v2701_v41 = vadd.f32 %v2700_v19, %v2628_v9  ;;  %v3496_v19 = vmul.f32 48.0, %v3620_v47 }
 0x241   :  { %v2742_v31 = vadd.f32 %v2741_v49, %v2701_v41  ;;  %v3497_v58 = vsub.f32 1.0, %v3496_v19 }
 0x243   :  { %v2993_v16 = vpop.f32.mrf.mxu3  ;;  %v3498_v49 = vmul.f32 %v3620_v47, %v3497_v58 }
 0x244   :  { %v2891_v56 = vpop.f32.mrf.mxu1 }
 0x245   :  { %v2892_v18 = vadd.f32 %v2891_v56, %v2783_v63  ;;  %v3499_v32 = vadd.f32 %v3620_v47, %v3498_v49 }
 0x246   :  { %v2954_v61 = vpop.f32.mrf.mxu2 }
 0x247   :  { %v2790_v10 = vpop.f32.mrf.mxu0  ;;  %v2950_v7 = vadd.f32 %v2949_v3, %v2892_v18  ;;  %v3501_v27 = vsel %vm3500_vm1, %v3620_v47, %v3499_v32 }
 0x248   :  { %v2791_v24 = vadd.f32 %v2790_v10, %v2742_v31 }
 0x249   :  { %v2994_v40 = vadd.f32 %v2993_v16, %v2950_v7 }
 0x24b   :  { %v2999_v39 = vpop.f32.mrf.mxu3 }
 0x24c   :  { %v2895_v15 = vpop.f32.mrf.mxu1 }
 0x24d   :  { %v2896_v33 = vadd.f32 %v2895_v15, %v2791_v24 }
 0x24f   :  { %v2955_v22 = vadd.f32 %v2954_v61, %v2896_v33 }
 0x251   :  { %v3000_v11 = vadd.f32 %v2999_v39, %v2955_v22 }
 0x258   :  { %v3109_v50 = vpop.f32.mrf.mxu1 }
 0x261   :  { %v3154_v2 = vpop.f32.mrf.mxu2 }
 0x262   :  { %v3068_v14 = vpop.f32.mrf.mxu0  ;;  %v3113_v51 = vpop.f32.mrf.mxu1 }
 0x263   :  { %v3069_v48 = vadd.f32 %v3068_v14, %v2994_v40 }
 0x264   :  { %v3263_v53 = vpop.f32.mrf.mxu3 }
 0x265   :  { %v3110_v26 = vadd.f32 %v3109_v50, %v3069_v48 }
 0x267   :  { %v3155_v42 = vadd.f32 %v3154_v2, %v3110_v26 }
 0x269   :  { %v3264_v1 = vadd.f32 %v3263_v53, %v3155_v42  ;;  %v3617_v53 = vld [vmem:[%s7285_s2] ss:$0 sm:$0xff] }
 0x26b   :  { %v3162_v8 = vpop.f32.mrf.mxu2 }
 0x26c   :  { %v3072_v52 = vpop.f32.mrf.mxu0 }
 0x26d   :  { %v3073_v43 = vadd.f32 %v3072_v52, %v3000_v11 }
 0x26e   :  { %v3267_v55 = vpop.f32.mrf.mxu3 }
 0x26f   :  { %v3114_v0 = vadd.f32 %v3113_v51, %v3073_v43  ;;  %v3618_v51 = vld [vmem:[%s7285_s2 + $0x1] ss:$0 sm:$0xff]  ;;  %s3663_s2 = smov 128  }
 0x271   :  { %v3163_v44 = vadd.f32 %v3162_v8, %v3114_v0 }
 0x273   :  { %v3268_v60 = vadd.f32 %v3267_v55, %v3163_v44 }
 0x27c   :  { %v3365_v17 = vpop.f32.mrf.mxu1 }
 0x284   :  { %v3321_v35 = vpop.f32.mrf.mxu0  ;;  %v3440_v46 = vpop.f32.mrf.mxu2 }
 0x285   :  { %v3322_v38 = vadd.f32 %v3321_v35, %v3264_v1  ;;  %v3371_v5 = vpop.f32.mrf.mxu1 }
 0x287   :  { %v3366_v20 = vadd.f32 %v3365_v17, %v3322_v38  ;;  %v3481_v59 = vpop.f32.mrf.mxu3 }
 0x289   :  { %v3441_v12 = vadd.f32 %v3440_v46, %v3366_v20 }
 0x28b   :  { %v3482_v45 = vadd.f32 %v3481_v59, %v3441_v12 }
 0x28c   :  { %v3326_v30 = vpop.f32.mrf.mxu0  ;;  %v3444_v54 = vpop.f32.mrf.mxu2 }
 0x28d   :  { %v3327_v13 = vadd.f32 %v3326_v30, %v3268_v60  ;;  %v3489_v62 = vsel %vm3488_vm0, %v3482_v45, 0.0 }
 0x28e   :  { %3490 = vadd.xlane.f32.xlu0 %v3489_v62 }
 0x28f   :  { %v3372_v34 = vadd.f32 %v3371_v5, %v3327_v13  ;;  %v3485_v6 = vpop.f32.mrf.mxu3 }
 0x291   :  { %v3445_v23 = vadd.f32 %v3444_v54, %v3372_v34 }
 0x293   :  { %v3486_v28 = vadd.f32 %v3485_v6, %v3445_v23 }
 0x295   :  { %v3492_v29 = vsel %vm3488_vm0, %v3486_v28, 0.0 }
 0x296   :  { %3493 = vadd.xlane.f32.xlu1 %v3492_v29 }
 0x301   :  { %v3491_v56 = vpop.xlane.xlu0 %3490 }
 0x302   :  { %v3502_v57 = vmul.f32 %v3501_v27, %v3491_v56 }
 0x304   :  { %v3504_v21 = vsub.f32 %v3482_v45, %v3502_v57 }
 0x306   :  { %v3506_v3 = vmul.f32 %v3504_v21, %v3504_v21 }
 0x308   :  { %v3508_v36 = vsel %vm3488_vm0, %v3506_v3, 0.0 }
 0x309   :  { %3509 = vadd.xlane.f32.xlu2 %v3508_v36  ;;  %v3494_v4 = vpop.xlane.xlu1 %3493 }
 0x30a   :  { %v3503_v16 = vmul.f32 %v3501_v27, %v3494_v4 }
 0x30c   :  { %v3505_v25 = vsub.f32 %v3486_v28, %v3503_v16 }
 0x30e   :  { %v3507_v9 = vmul.f32 %v3505_v25, %v3505_v25 }
 0x310   :  { %v3511_v63 = vsel %vm3488_vm0, %v3507_v9, 0.0 }
 0x311   :  { %3512 = vadd.xlane.f32.xlu2 %v3511_v63 }
 0x37c   :  { %v3510_v15 = vpop.xlane.xlu2 %3509 }
 0x37d   :  { %v3514_v10 = vmul.f32 %v3510_v15, %v3501_v27 }
 0x37f   :  { %v3516_v41 = vadd.f32 1e-05, %v3514_v10 }
 0x381   :  { %3621 = vrsqrt.f32 %v3516_v41  ;;  %vm3524_vm3 = vweird.f32 %v3516_v41 }
 0x384   :  { %v3513_v61 = vpop.xlane.xlu2 %3512 }
 0x385   :  { %v3515_v18 = vmul.f32 %v3513_v61, %v3501_v27 }
 0x387   :  { %v3622_v39 = vpop.eup %3621  ;;  %v3517_v31 = vadd.f32 1e-05, %v3515_v18 }
 0x388   :  { %v3519_v7 = vmul.f32 %v3622_v39, %v3516_v41  ;;  %vm3525_vm2 = vweird.f32 %v3622_v39 }
 0x389   :  { %3623 = vrsqrt.f32 %v3517_v31  ;;  %vm3526_vm4 = vmor %vm3524_vm3, %vm3525_vm2  ;;  %vm3534_vm6 = vweird.f32 %v3517_v31 }
 0x38a   :  { %v3520_v24 = vmul.f32 %v3622_v39, %v3519_v7 }
 0x38c   :  { %v3521_v50 = vmul.f32 0.5, %v3520_v24 }
 0x38e   :  { %v3522_v14 = vsub.f32 1.5, %v3521_v50 }
 0x38f   :  { %v3624_v2 = vpop.eup %3623 }
 0x390   :  { %v3523_v40 = vmul.f32 %v3622_v39, %v3522_v14  ;;  %v3529_v33 = vmul.f32 %v3624_v2, %v3517_v31  ;;  %vm3535_vm5 = vweird.f32 %v3624_v2 }
 0x391   :  { %vm3536_vm7 = vmor %vm3534_vm6, %vm3535_vm5 }
 0x392   :  { %v3527_v48 = vsel %vm3526_vm4, %v3622_v39, %v3523_v40  ;;  %v3530_v22 = vmul.f32 %v3624_v2, %v3529_v33 }
 0x393   :  { %v3538_v26 = vmul.f32 %v3527_v48, %v3504_v21 }
 0x394   :  { %v3531_v52 = vmul.f32 0.5, %v3530_v22 }
 0x395   :  { %v3542_v11 = vmul.f32 %v3617_v53, %v3538_v26 }
 0x396   :  { %v3532_v8 = vsub.f32 1.5, %v3531_v52 }
 0x397   :  { %v3546_v42 = vadd.f32 %v3618_v51, %v3542_v11 }
 0x398   :  { %v3533_v43 = vmul.f32 %v3624_v2, %v3532_v8 }
 0x399   :  { %3548 = vst.msk [vmem:[#allocation2] sm:$0xff] %vm3488_vm0, %v3546_v42 }
 0x39a   :  { %v3537_v55 = vsel %vm3536_vm7, %v3624_v2, %v3533_v43 }
 0x39b   :  { %v3539_v1 = vmul.f32 %v3537_v55, %v3505_v25 }
 0x39d   :  { %v3543_v0 = vmul.f32 %v3617_v53, %v3539_v1 }
 0x39f   :  { %v3547_v17 = vadd.f32 %v3618_v51, %v3543_v0 }
 0x3a1   :  { %3549 = vst.msk [vmem:[#allocation2 + $0x8] sm:$0xff] %vm3488_vm0, %v3547_v17 }
 0x3a2   :  { %3562 = dma.vmem_to_hbm [thread:$0]  %s3555_s23, 256, %s3557_s26, [#allocation3], %s3663_s2, %s3663_s2, %s3664_s27  }
 0x3a3   :  { %3649 = dma.done.wait [#allocation3], 256  }
 0x3a4   :  { %3650 = vsyncadd [#allocation3], 4294967040 }
 0x3a5   :  { %3567 = vsyncpa [#allocation3], 1 }

</bundles_post_ra>
